<compile_context>
chip_gen: v5e
topology: v5e:2x2
jax: 0.10.0
libtpu: 0.0.40
codegen_flags: <defaults>
</compile_context>

<pallas_src>
import numpy as np
import jax
import jax.numpy as jnp
from jax.experimental import pallas as pl
from jax.experimental.pallas import tpu as pltpu


CFG = {
    'network': {
        'num_layers': 4,           # hidden layers of the SDF trunk
        'hidden_dim': 64,
        'octaves_pe_points': 4,
        'octaves_pe_views': 4,
        'skips': [2],
        'rescale': 1.0,
        'feat_size': 8,
        'geometric_init': True,
        'latent_dim': 16,
        'bias': 0.6,
        'global_latent_dim': 16,
    }
}

TM = 512                      # max sample rows per grid step (sweepable)
_INV_SQRT2 = 0.7071067811865475


def _round_up(x, m):
    return ((x + m - 1) // m) * m


# ----------------------------------------------------------------------------
# Parameter init (deterministic; mirrors geometric_init + weight_norm at init)
# ----------------------------------------------------------------------------
def init_params(key, cfg):
    net = cfg['network']
    hidden = net['hidden_dim']
    L_pts = net['octaves_pe_points']
    latent_dim = net['latent_dim']
    feat_size = net['feat_size']
    skips = net['skips']
    bias_cfg = net['bias']
    dim = 3
    dim_embed = dim * L_pts * 2 + dim
    dims_geo = [dim_embed + latent_dim] + [hidden] * net['num_layers'] + [1 + feat_size]
    nl = len(dims_geo)

    params = {}
    keys = jax.random.split(key, nl + 1)
    for l in range(nl - 1):
        in_dim = dims_geo[l]
        out_dim = dims_geo[l + 1] - dims_geo[0] if (l + 1) in skips else dims_geo[l + 1]
        k = keys[l]
        if l == nl - 2:  # last geometric layer
            w = (np.sqrt(np.pi) / np.sqrt(dims_geo[l])
                 + 1e-4 * jax.random.normal(k, (out_dim, in_dim), jnp.float32))
            b = jnp.full((out_dim,), -bias_cfg, jnp.float32)
        elif l == 0:
            w = jnp.zeros((out_dim, in_dim), jnp.float32)
            w = w.at[:, :3].set(
                jax.random.normal(k, (out_dim, 3), jnp.float32)
                * (np.sqrt(2.0) / np.sqrt(out_dim)))
            b = jnp.zeros((out_dim,), jnp.float32)
        elif l in skips:
            w = jax.random.normal(k, (out_dim, in_dim), jnp.float32) \
                * (np.sqrt(2.0) / np.sqrt(out_dim))
            w = w.at[:, -(dims_geo[0] - 3):].set(0.0)
            b = jnp.zeros((out_dim,), jnp.float32)
        else:
            w = jax.random.normal(k, (out_dim, in_dim), jnp.float32) \
                * (np.sqrt(2.0) / np.sqrt(out_dim))
            b = jnp.zeros((out_dim,), jnp.float32)

        # nn.utils.weight_norm: w_eff = g * v / ||v|| (per output row); g init = ||v||
        g = jnp.linalg.norm(w, axis=1, keepdims=True)
        w_eff = g * w / jnp.maximum(g, 1e-12)

        params[f'w{l}'] = jnp.asarray(w_eff.T, jnp.float32)        # [in, out]
        params[f'b{l}'] = jnp.asarray(b.reshape(1, -1), jnp.float32)

    # bias_network: Linear(global_latent_dim -> hidden*8), default torch uniform init
    gld = net['global_latent_dim']
    bias_dim = hidden * 8
    bound = 1.0 / np.sqrt(gld)
    kb1, kb2 = jax.random.split(keys[nl], 2)
    params['bias_w'] = jax.random.uniform(kb1, (bias_dim, gld), jnp.float32, -bound, bound)
    params['bias_b'] = jax.random.uniform(kb2, (bias_dim,), jnp.float32, -bound, bound)
    return params, dims_geo


# ----------------------------------------------------------------------------
# Glue (plain JAX)
# ----------------------------------------------------------------------------
def positional_encoding(p, L):
    feats = [p]
    for i in range(L):
        feats.append(jnp.sin((2.0 ** i) * p))
        feats.append(jnp.cos((2.0 ** i) * p))
    return jnp.concatenate(feats, axis=-1)


def process_input(points, local_latent, cfg):
    net = cfg['network']
    pe = positional_encoding(points / net['rescale'], net['octaves_pe_points'])
    ll = jnp.transpose(local_latent, (1, 2, 0))     # [latent, B, N] -> [B, N, latent]
    return jnp.concatenate([pe, ll], axis=-1)


def get_bias(global_latent, params):
    b = global_latent @ params['bias_w'].T + params['bias_b']
    return jax.nn.sigmoid(b)                         # [hidden*8]


def _prepare_sdf_inputs(points, local_latent, global_latent, params, cfg):
    """Flatten inputs, fold global-latent gating into weights, fuse w0|w2b."""
    net = cfg['network']
    hidden = net['hidden_dim']
    B, N, _ = points.shape
    M = B * N
    inp = process_input(points, local_latent, cfg).reshape(M, -1).astype(jnp.float32)
    D0 = inp.shape[-1]
    skip_x = hidden - D0              # out dim of the layer feeding the skip (21)

    gbias = get_bias(global_latent, params)
    gb0 = gbias[0 * hidden:1 * hidden].reshape(1, hidden)
    gb2 = gbias[2 * hidden:3 * hidden].reshape(1, hidden)
    gb3 = gbias[3 * hidden:4 * hidden].reshape(1, hidden)

    w0, b0 = params['w0'], params['b0']
    w1, b1 = params['w1'], params['b1']
    w2, b2 = params['w2'], params['b2']
    w3, b3 = params['w3'], params['b3']
    w4, b4 = params['w4'], params['b4']
    w2a, w2b = w2[:skip_x, :], w2[skip_x:, :]

    bf = lambda a: a.astype(jnp.bfloat16)

    # Gate/scale folding (done once per call, in f32, on tiny weights):
    #   layer 0:   (inp@w0 + b0)*gb0            -> inp@(w0*gb0) + b0*gb0
    #   layer 2:  ((x@w2a + inp@w2b)/sqrt2 + b2)*gb2
    #              -> x@(w2a*gb2/sqrt2) + inp@(w2b*gb2/sqrt2) + b2*gb2
    #   layer 3:   (x@w3 + b3)*gb3              -> x@(w3*gb3) + b3*gb3
    wf = bf(jnp.concatenate([w0 * gb0, w2b * (gb2 * _INV_SQRT2)], axis=1))  # [D0, 2*hidden]
    kernel_args = (wf,
                   b0 * gb0,
                   bf(w1), b1,
                   bf(w2a * (gb2 * _INV_SQRT2)), b2 * gb2,
                   bf(w3 * gb3), b3 * gb3,
                   bf(w4), b4)
    return inp.astype(jnp.bfloat16), kernel_args, (B, N, M, D0)


# ----------------------------------------------------------------------------
# Pallas kernel: whole SDF MLP for one tile of `tm` sample rows
# (specialized to CFG: num_layers=4, skips=[2] => 5 linears, one skip concat)
# ----------------------------------------------------------------------------
def _sdf_mlp_kernel(inp_ref, wf_ref, b0_ref,
                    w1_ref, b1_ref,
                    w2a_ref, b2_ref,
                    w3_ref, b3_ref,
                    w4_ref, b4_ref,
                    out_ref):
    hid = b0_ref.shape[-1]

    def softplus100(x):                       # Softplus(beta=100), torch threshold 20
        z = 100.0 * x
        zs = jnp.where(z > 20.0, 0.0, z)
        return jnp.where(z > 20.0, x, jnp.log1p(jnp.exp(zs)) * 0.01)

    def mm(a, w_ref):                         # bf16 MXU matmul, f32 accumulate
        return jnp.dot(a.astype(jnp.bfloat16), w_ref[...],
                       preferred_element_type=jnp.float32)

    inp = inp_ref[...]                        # (tm, D0) bf16

    # fused layer-0 + skip-input matmul: one (tm, D0) x (D0, 2*hid) MXU pass
    h = jnp.dot(inp, wf_ref[...], preferred_element_type=jnp.float32)  # (tm, 2*hid) f32

    # l = 0 (gating already folded into wf/b0)
    x = softplus100(h[:, :hid] + b0_ref[...])
    # l = 1 (feeds skip layer; no gating)
    x = softplus100(mm(x, w1_ref) + b1_ref[...])
    # l = 2 skip: cat([x, input])/sqrt2 @ W  == x@w2a' + inp@w2b'  (folded scales)
    x = softplus100(mm(x, w2a_ref) + h[:, hid:] + b2_ref[...])
    # l = 3 (gating folded)
    x = softplus100(mm(x, w3_ref) + b3_ref[...])
    # l = 4 (last, no activation / gating) -> combined (sdf | features) output
    out_ref[...] = mm(x, w4_ref) + b4_ref[...]


def multihead_decoder_forward(points, local_latent, global_latent, params, cfg,
                              return_occupancy=True, return_feature_vec=True,
                              return_rgb=False):
    net = cfg['network']
    feat_size = net['feat_size']
    out_dim = 1 + feat_size

    inp, kernel_args, (B, N, M, D0) = _prepare_sdf_inputs(
        points, local_latent, global_latent, params, cfg)

    # Tile size: as large as useful, but never bigger than (padded) M.
    tm = min(TM, _round_up(M, 8))
    grid = pl.cdiv(M, tm)
    M_pad = grid * tm
    if M_pad != M:
        inp = jnp.pad(inp, ((0, M_pad - M), (0, 0)))

    def full(a):
        # whole (small) weight/bias tile, resident in VMEM across all grid steps
        return pl.BlockSpec(a.shape, lambda i: (0, 0))

    raw = pl.pallas_call(
        _sdf_mlp_kernel,
        out_shape=jax.ShapeDtypeStruct((M_pad, out_dim), jnp.float32),
        grid_spec=pltpu.PrefetchScalarGridSpec(
            num_scalar_prefetch=0,
            grid=(grid,),
            in_specs=[pl.BlockSpec((tm, D0), lambda i: (i, 0))]
                     + [full(a) for a in kernel_args],
            out_specs=pl.BlockSpec((tm, out_dim), lambda i: (i, 0)),
        ),
        compiler_params=pltpu.CompilerParams(
            dimension_semantics=("parallel",),
            vmem_limit_bytes=64 << 20,
        ),
    )(inp, *kernel_args)

    raw = raw[:M]
    occupancy = (jax.nn.sigmoid(-10.0 * raw[:, :1]).reshape(B, N, 1)
                 if return_occupancy else None)
    feature_vec = (raw[:, 1:].reshape(B, N, feat_size)
                   if return_feature_vec else None)
    rgb = None
    # TODO(synk): return_rgb path (SDF normals via autograd + `lina*` appearance MLP
    # on [points, view PE, normals, features]) is not implemented here.
    return occupancy, feature_vec, rgb


# ----------------------------------------------------------------------------
# Pure-JAX reference of the same (folded, bf16-matmul) math — sanity check
# ----------------------------------------------------------------------------
def _sdf_reference(inp_bf16, kernel_args):
    (wf, b0, w1, b1, w2a, b2, w3, b3, w4, b4) = kernel_args
    hid = b0.shape[-1]

    def softplus100(x):
        z = 100.0 * x
        zs = jnp.where(z > 20.0, 0.0, z)
        return jnp.where(z > 20.0, x, jnp.log1p(jnp.exp(zs)) * 0.01)

    mm = lambda a, w: jnp.dot(a.astype(jnp.bfloat16), w,
                              preferred_element_type=jnp.float32)
    h = mm(inp_bf16, wf)
    x = softplus100(h[:, :hid] + b0)
    x = softplus100(mm(x, w1) + b1)
    x = softplus100(mm(x, w2a) + h[:, hid:] + b2)
    x = softplus100(mm(x, w3) + b3)
    out = mm(x, w4) + b4
    occ = jax.nn.sigmoid(-10.0 * out[:, :1])
    return occ, out[:, 1:]


if __name__ == "__main__":
    key = jax.random.PRNGKey(0)
    kp, kl, kg, kparam = jax.random.split(key, 4)

    net = CFG['network']
    B, N = 2, 128
    points = jax.random.uniform(kp, (B, N, 3), jnp.float32, -1.0, 1.0)
    local_latent = jax.random.normal(kl, (net['latent_dim'], B, N), jnp.float32)
    global_latent = jax.random.normal(kg, (net['global_latent_dim'],), jnp.float32)

    params, dims_geo = init_params(kparam, CFG)

    occ, feat, rgb = multihead_decoder_forward(
        points, local_latent, global_latent, params, CFG,
        return_occupancy=True, return_feature_vec=True, return_rgb=False)
    jax.block_until_ready((occ, feat))

    # sanity check vs. pure-JAX reference of the same folded math
    inp, kernel_args, (B_, N_, M, D0) = _prepare_sdf_inputs(
        points, local_latent, global_latent, params, CFG)
    occ_ref, feat_ref = _sdf_reference(inp, kernel_args)
    np.testing.assert_allclose(np.asarray(occ).reshape(M, 1),
                               np.asarray(occ_ref), rtol=3e-3, atol=3e-3)
    np.testing.assert_allclose(np.asarray(feat).reshape(M, net['feat_size']),
                               np.asarray(feat_ref), rtol=3e-3, atol=3e-3)

    print("KERNEL_OK")
</pallas_src>

<mosaic_0001>
module attributes {stable_mosaic.version = 11 : i64} {
  func.func @_sdf_mlp_kernel(%arg0: i32, %arg1: memref<256x43xbf16, #tpu.memory_space<vmem>>, %arg2: memref<43x128xbf16, #tpu.memory_space<vmem>>, %arg3: memref<1x64xf32, #tpu.memory_space<vmem>>, %arg4: memref<64x21xbf16, #tpu.memory_space<vmem>>, %arg5: memref<1x21xf32, #tpu.memory_space<vmem>>, %arg6: memref<21x64xbf16, #tpu.memory_space<vmem>>, %arg7: memref<1x64xf32, #tpu.memory_space<vmem>>, %arg8: memref<64x64xbf16, #tpu.memory_space<vmem>>, %arg9: memref<1x64xf32, #tpu.memory_space<vmem>>, %arg10: memref<64x9xbf16, #tpu.memory_space<vmem>>, %arg11: memref<1x9xf32, #tpu.memory_space<vmem>>, %arg12: memref<256x9xf32, #tpu.memory_space<vmem>>) attributes {dimension_semantics = [#tpu.dimension_semantics<parallel>], iteration_bounds = array<i64: 1>, scalar_prefetch = 0 : i64, scratch_operands = 0 : i64, tpu.core_type = #tpu.core_type<tc>, window_params = [{transform_indices = @transform_0, window_bounds = array<i64: 256, 43>}, {pipeline_mode = #tpu.pipeline_mode<synchronous>, transform_indices = @transform_1, window_bounds = array<i64: 43, 128>}, {pipeline_mode = #tpu.pipeline_mode<synchronous>, transform_indices = @transform_2, window_bounds = array<i64: 1, 64>}, {pipeline_mode = #tpu.pipeline_mode<synchronous>, transform_indices = @transform_3, window_bounds = array<i64: 64, 21>}, {pipeline_mode = #tpu.pipeline_mode<synchronous>, transform_indices = @transform_4, window_bounds = array<i64: 1, 21>}, {pipeline_mode = #tpu.pipeline_mode<synchronous>, transform_indices = @transform_5, window_bounds = array<i64: 21, 64>}, {pipeline_mode = #tpu.pipeline_mode<synchronous>, transform_indices = @transform_6, window_bounds = array<i64: 1, 64>}, {pipeline_mode = #tpu.pipeline_mode<synchronous>, transform_indices = @transform_7, window_bounds = array<i64: 64, 64>}, {pipeline_mode = #tpu.pipeline_mode<synchronous>, transform_indices = @transform_8, window_bounds = array<i64: 1, 64>}, {pipeline_mode = #tpu.pipeline_mode<synchronous>, transform_indices = @transform_9, window_bounds = array<i64: 64, 9>}, {pipeline_mode = #tpu.pipeline_mode<synchronous>, transform_indices = @transform_10, window_bounds = array<i64: 1, 9>}, {transform_indices = @transform_11, window_bounds = array<i64: 256, 9>}]} {
    %c0 = arith.constant 0 : index
    %c0_0 = arith.constant 0 : index
    %0 = vector.load %arg1[%c0, %c0_0] : memref<256x43xbf16, #tpu.memory_space<vmem>>, vector<256x43xbf16>
    %c0_1 = arith.constant 0 : index
    %c0_2 = arith.constant 0 : index
    %1 = vector.load %arg2[%c0_1, %c0_2] : memref<43x128xbf16, #tpu.memory_space<vmem>>, vector<43x128xbf16>
    %cst = arith.constant dense<0.000000e+00> : vector<256x128xf32>
    %2 = tpu.matmul %0, %1, %cst {dimension_numbers = #tpu.dot_dimension_numbers<[1], [0], [0], [1], [0, 0, 1, 1], [], []>} : vector<256x43xbf16>, vector<43x128xbf16>, vector<256x128xf32> -> vector<256x128xf32>
    %3 = vector.extract_strided_slice %2 {offsets = [0, 0], sizes = [256, 64], strides = [1, 1]} : vector<256x128xf32> to vector<256x64xf32>
    %c0_3 = arith.constant 0 : index
    %c0_4 = arith.constant 0 : index
    %4 = vector.load %arg3[%c0_3, %c0_4] : memref<1x64xf32, #tpu.memory_space<vmem>>, vector<1x64xf32>
    %5 = vector.broadcast %4 : vector<1x64xf32> to vector<256x64xf32>
    %6 = arith.addf %3, %5 : vector<256x64xf32>
    %cst_5 = arith.constant 1.000000e+02 : f32
    %7 = vector.broadcast %cst_5 : f32 to vector<256x64xf32>
    %8 = arith.mulf %7, %6 : vector<256x64xf32>
    %cst_6 = arith.constant 2.000000e+01 : f32
    %9 = vector.broadcast %cst_6 : f32 to vector<256x64xf32>
    %10 = arith.cmpf ogt, %8, %9 : vector<256x64xf32>
    %cst_7 = arith.constant 0.000000e+00 : f32
    %11 = vector.broadcast %cst_7 : f32 to vector<256x64xf32>
    %12 = arith.select %10, %11, %8 : vector<256x64xi1>, vector<256x64xf32>
    %cst_8 = arith.constant 2.000000e+01 : f32
    %13 = vector.broadcast %cst_8 : f32 to vector<256x64xf32>
    %14 = arith.cmpf ogt, %8, %13 : vector<256x64xf32>
    %15 = math.exp %12 : vector<256x64xf32>
    %16 = math.log1p %15 : vector<256x64xf32>
    %cst_9 = arith.constant 0.00999999977 : f32
    %17 = vector.broadcast %cst_9 : f32 to vector<256x64xf32>
    %18 = arith.mulf %16, %17 : vector<256x64xf32>
    %19 = arith.select %14, %6, %18 : vector<256x64xi1>, vector<256x64xf32>
    %20 = arith.truncf %19 : vector<256x64xf32> to vector<256x64xbf16>
    %c0_10 = arith.constant 0 : index
    %c0_11 = arith.constant 0 : index
    %21 = vector.load %arg4[%c0_10, %c0_11] : memref<64x21xbf16, #tpu.memory_space<vmem>>, vector<64x21xbf16>
    %cst_12 = arith.constant dense<0.000000e+00> : vector<256x21xf32>
    %22 = tpu.matmul %20, %21, %cst_12 {dimension_numbers = #tpu.dot_dimension_numbers<[1], [0], [0], [1], [0, 0, 1, 1], [], []>} : vector<256x64xbf16>, vector<64x21xbf16>, vector<256x21xf32> -> vector<256x21xf32>
    %c0_13 = arith.constant 0 : index
    %c0_14 = arith.constant 0 : index
    %23 = vector.load %arg5[%c0_13, %c0_14] : memref<1x21xf32, #tpu.memory_space<vmem>>, vector<1x21xf32>
    %24 = vector.broadcast %23 : vector<1x21xf32> to vector<256x21xf32>
    %25 = arith.addf %22, %24 : vector<256x21xf32>
    %cst_15 = arith.constant 1.000000e+02 : f32
    %26 = vector.broadcast %cst_15 : f32 to vector<256x21xf32>
    %27 = arith.mulf %26, %25 : vector<256x21xf32>
    %cst_16 = arith.constant 2.000000e+01 : f32
    %28 = vector.broadcast %cst_16 : f32 to vector<256x21xf32>
    %29 = arith.cmpf ogt, %27, %28 : vector<256x21xf32>
    %cst_17 = arith.constant 0.000000e+00 : f32
    %30 = vector.broadcast %cst_17 : f32 to vector<256x21xf32>
    %31 = arith.select %29, %30, %27 : vector<256x21xi1>, vector<256x21xf32>
    %cst_18 = arith.constant 2.000000e+01 : f32
    %32 = vector.broadcast %cst_18 : f32 to vector<256x21xf32>
    %33 = arith.cmpf ogt, %27, %32 : vector<256x21xf32>
    %34 = math.exp %31 : vector<256x21xf32>
    %35 = math.log1p %34 : vector<256x21xf32>
    %cst_19 = arith.constant 0.00999999977 : f32
    %36 = vector.broadcast %cst_19 : f32 to vector<256x21xf32>
    %37 = arith.mulf %35, %36 : vector<256x21xf32>
    %38 = arith.select %33, %25, %37 : vector<256x21xi1>, vector<256x21xf32>
    %39 = arith.truncf %38 : vector<256x21xf32> to vector<256x21xbf16>
    %c0_20 = arith.constant 0 : index
    %c0_21 = arith.constant 0 : index
    %40 = vector.load %arg6[%c0_20, %c0_21] : memref<21x64xbf16, #tpu.memory_space<vmem>>, vector<21x64xbf16>
    %cst_22 = arith.constant dense<0.000000e+00> : vector<256x64xf32>
    %41 = tpu.matmul %39, %40, %cst_22 {dimension_numbers = #tpu.dot_dimension_numbers<[1], [0], [0], [1], [0, 0, 1, 1], [], []>} : vector<256x21xbf16>, vector<21x64xbf16>, vector<256x64xf32> -> vector<256x64xf32>
    %42 = vector.extract_strided_slice %2 {offsets = [0, 64], sizes = [256, 64], strides = [1, 1]} : vector<256x128xf32> to vector<256x64xf32>
    %43 = arith.addf %41, %42 : vector<256x64xf32>
    %c0_23 = arith.constant 0 : index
    %c0_24 = arith.constant 0 : index
    %44 = vector.load %arg7[%c0_23, %c0_24] : memref<1x64xf32, #tpu.memory_space<vmem>>, vector<1x64xf32>
    %45 = vector.broadcast %44 : vector<1x64xf32> to vector<256x64xf32>
    %46 = arith.addf %43, %45 : vector<256x64xf32>
    %cst_25 = arith.constant 1.000000e+02 : f32
    %47 = vector.broadcast %cst_25 : f32 to vector<256x64xf32>
    %48 = arith.mulf %47, %46 : vector<256x64xf32>
    %cst_26 = arith.constant 2.000000e+01 : f32
    %49 = vector.broadcast %cst_26 : f32 to vector<256x64xf32>
    %50 = arith.cmpf ogt, %48, %49 : vector<256x64xf32>
    %cst_27 = arith.constant 0.000000e+00 : f32
    %51 = vector.broadcast %cst_27 : f32 to vector<256x64xf32>
    %52 = arith.select %50, %51, %48 : vector<256x64xi1>, vector<256x64xf32>
    %cst_28 = arith.constant 2.000000e+01 : f32
    %53 = vector.broadcast %cst_28 : f32 to vector<256x64xf32>
    %54 = arith.cmpf ogt, %48, %53 : vector<256x64xf32>
    %55 = math.exp %52 : vector<256x64xf32>
    %56 = math.log1p %55 : vector<256x64xf32>
    %cst_29 = arith.constant 0.00999999977 : f32
    %57 = vector.broadcast %cst_29 : f32 to vector<256x64xf32>
    %58 = arith.mulf %56, %57 : vector<256x64xf32>
    %59 = arith.select %54, %46, %58 : vector<256x64xi1>, vector<256x64xf32>
    %60 = arith.truncf %59 : vector<256x64xf32> to vector<256x64xbf16>
    %c0_30 = arith.constant 0 : index
    %c0_31 = arith.constant 0 : index
    %61 = vector.load %arg8[%c0_30, %c0_31] : memref<64x64xbf16, #tpu.memory_space<vmem>>, vector<64x64xbf16>
    %cst_32 = arith.constant dense<0.000000e+00> : vector<256x64xf32>
    %62 = tpu.matmul %60, %61, %cst_32 {dimension_numbers = #tpu.dot_dimension_numbers<[1], [0], [0], [1], [0, 0, 1, 1], [], []>} : vector<256x64xbf16>, vector<64x64xbf16>, vector<256x64xf32> -> vector<256x64xf32>
    %c0_33 = arith.constant 0 : index
    %c0_34 = arith.constant 0 : index
    %63 = vector.load %arg9[%c0_33, %c0_34] : memref<1x64xf32, #tpu.memory_space<vmem>>, vector<1x64xf32>
    %64 = vector.broadcast %63 : vector<1x64xf32> to vector<256x64xf32>
    %65 = arith.addf %62, %64 : vector<256x64xf32>
    %cst_35 = arith.constant 1.000000e+02 : f32
    %66 = vector.broadcast %cst_35 : f32 to vector<256x64xf32>
    %67 = arith.mulf %66, %65 : vector<256x64xf32>
    %cst_36 = arith.constant 2.000000e+01 : f32
    %68 = vector.broadcast %cst_36 : f32 to vector<256x64xf32>
    %69 = arith.cmpf ogt, %67, %68 : vector<256x64xf32>
    %cst_37 = arith.constant 0.000000e+00 : f32
    %70 = vector.broadcast %cst_37 : f32 to vector<256x64xf32>
    %71 = arith.select %69, %70, %67 : vector<256x64xi1>, vector<256x64xf32>
    %cst_38 = arith.constant 2.000000e+01 : f32
    %72 = vector.broadcast %cst_38 : f32 to vector<256x64xf32>
    %73 = arith.cmpf ogt, %67, %72 : vector<256x64xf32>
    %74 = math.exp %71 : vector<256x64xf32>
    %75 = math.log1p %74 : vector<256x64xf32>
    %cst_39 = arith.constant 0.00999999977 : f32
    %76 = vector.broadcast %cst_39 : f32 to vector<256x64xf32>
    %77 = arith.mulf %75, %76 : vector<256x64xf32>
    %78 = arith.select %73, %65, %77 : vector<256x64xi1>, vector<256x64xf32>
    %79 = arith.truncf %78 : vector<256x64xf32> to vector<256x64xbf16>
    %c0_40 = arith.constant 0 : index
    %c0_41 = arith.constant 0 : index
    %80 = vector.load %arg10[%c0_40, %c0_41] : memref<64x9xbf16, #tpu.memory_space<vmem>>, vector<64x9xbf16>
    %cst_42 = arith.constant dense<0.000000e+00> : vector<256x9xf32>
    %81 = tpu.matmul %79, %80, %cst_42 {dimension_numbers = #tpu.dot_dimension_numbers<[1], [0], [0], [1], [0, 0, 1, 1], [], []>} : vector<256x64xbf16>, vector<64x9xbf16>, vector<256x9xf32> -> vector<256x9xf32>
    %c0_43 = arith.constant 0 : index
    %c0_44 = arith.constant 0 : index
    %82 = vector.load %arg11[%c0_43, %c0_44] : memref<1x9xf32, #tpu.memory_space<vmem>>, vector<1x9xf32>
    %83 = vector.broadcast %82 : vector<1x9xf32> to vector<256x9xf32>
    %84 = arith.addf %81, %83 : vector<256x9xf32>
    %c0_45 = arith.constant 0 : index
    %c0_46 = arith.constant 0 : index
    %85 = vector.load %arg12[%c0_45, %c0_46] : memref<256x9xf32, #tpu.memory_space<vmem>>, vector<256x9xf32>
    tpu.vector_store %arg12[%c0_45, %c0_46], %84 {strides = array<i32>} : memref<256x9xf32, #tpu.memory_space<vmem>>, vector<256x9xf32>,
    return
  }
  func.func @transform_0(%arg0: i32) -> (i32, i32) {
    %c0_i32 = arith.constant 0 : i32
    %c0_i32_0 = arith.constant 0 : i32
    return %arg0, %c0_i32 : i32, i32
  }
  func.func @transform_1(%arg0: i32) -> (i32, i32) {
    %c0_i32 = arith.constant 0 : i32
    %c0_i32_0 = arith.constant 0 : i32
    %c0_i32_1 = arith.constant 0 : i32
    return %c0_i32, %c0_i32_0 : i32, i32
  }
  func.func @transform_2(%arg0: i32) -> (i32, i32) {
    %c0_i32 = arith.constant 0 : i32
    %c0_i32_0 = arith.constant 0 : i32
    %c0_i32_1 = arith.constant 0 : i32
    return %c0_i32, %c0_i32_0 : i32, i32
  }
  func.func @transform_3(%arg0: i32) -> (i32, i32) {
    %c0_i32 = arith.constant 0 : i32
    %c0_i32_0 = arith.constant 0 : i32
    %c0_i32_1 = arith.constant 0 : i32
    return %c0_i32, %c0_i32_0 : i32, i32
  }
  func.func @transform_4(%arg0: i32) -> (i32, i32) {
    %c0_i32 = arith.constant 0 : i32
    %c0_i32_0 = arith.constant 0 : i32
    %c0_i32_1 = arith.constant 0 : i32
    return %c0_i32, %c0_i32_0 : i32, i32
  }
  func.func @transform_5(%arg0: i32) -> (i32, i32) {
    %c0_i32 = arith.constant 0 : i32
    %c0_i32_0 = arith.constant 0 : i32
    %c0_i32_1 = arith.constant 0 : i32
    return %c0_i32, %c0_i32_0 : i32, i32
  }
  func.func @transform_6(%arg0: i32) -> (i32, i32) {
    %c0_i32 = arith.constant 0 : i32
    %c0_i32_0 = arith.constant 0 : i32
    %c0_i32_1 = arith.constant 0 : i32
    return %c0_i32, %c0_i32_0 : i32, i32
  }
  func.func @transform_7(%arg0: i32) -> (i32, i32) {
    %c0_i32 = arith.constant 0 : i32
    %c0_i32_0 = arith.constant 0 : i32
    %c0_i32_1 = arith.constant 0 : i32
    return %c0_i32, %c0_i32_0 : i32, i32
  }
  func.func @transform_8(%arg0: i32) -> (i32, i32) {
    %c0_i32 = arith.constant 0 : i32
    %c0_i32_0 = arith.constant 0 : i32
    %c0_i32_1 = arith.constant 0 : i32
    return %c0_i32, %c0_i32_0 : i32, i32
  }
  func.func @transform_9(%arg0: i32) -> (i32, i32) {
    %c0_i32 = arith.constant 0 : i32
    %c0_i32_0 = arith.constant 0 : i32
    %c0_i32_1 = arith.constant 0 : i32
    return %c0_i32, %c0_i32_0 : i32, i32
  }
  func.func @transform_10(%arg0: i32) -> (i32, i32) {
    %c0_i32 = arith.constant 0 : i32
    %c0_i32_0 = arith.constant 0 : i32
    %c0_i32_1 = arith.constant 0 : i32
    return %c0_i32, %c0_i32_0 : i32, i32
  }
  func.func @transform_11(%arg0: i32) -> (i32, i32) {
    %c0_i32 = arith.constant 0 : i32
    %c0_i32_0 = arith.constant 0 : i32
    return %arg0, %c0_i32 : i32, i32
  }
}

</mosaic_0001>

<bundles_post_ra>
// kernel: tpu_custom_call.1
= control target key start
LH: loop header
LB: loop body
LE: loop exit
PB: predicated region body
PF: predicated region fallthrough
CT: control target
= control target key end

     0   :  { %vm223_vm0 = vcmask 1044480   ;;  %vm224_vm1 = vcmask 1045504   ;;  %v4121_v2 = vmov 65535   ;;  %vm174_vm2 = vcmask 351232   ;;  %s4122_s13 = smov 64   ;;  %s6798_s1 = inlined_call_operand.vmem [shape: bf16[43,128], index: 1, kind: input, shape index: {}]   ;;  %s6799_s2 = inlined_call_operand.vmem [shape: f32[1,64], index: 2, kind: input, shape index: {}]   ;;  %s6800_s0 = inlined_call_operand.vmem [shape: bf16[256,43], index: 0, kind: input, shape index: {}]   ;;  %s6801_s5 = inlined_call_operand.vmem [shape: bf16[21,64], index: 5, kind: input, shape index: {}]   ;;  %s6802_s3 = inlined_call_operand.vmem [shape: bf16[64,21], index: 3, kind: input, shape index: {}]   ;;  %s6803_s4 = inlined_call_operand.vmem [shape: f32[1,21], index: 4, kind: input, shape index: {}]   ;;  %s6804_s6 = inlined_call_operand.vmem [shape: f32[1,64], index: 6, kind: input, shape index: {}]   ;;  %s6805_s7 = inlined_call_operand.vmem [shape: bf16[64,64], index: 7, kind: input, shape index: {}]   ;;  %s6806_s8 = inlined_call_operand.vmem [shape: f32[1,64], index: 8, kind: input, shape index: {}]   ;;  %s6807_s9 = inlined_call_operand.vmem [shape: bf16[64,9], index: 9, kind: input, shape index: {}]   ;;  %s6808_s10 = inlined_call_operand.vmem [shape: f32[1,9], index: 10, kind: input, shape index: {}]   ;;  %s6809_s11 = inlined_call_operand.vmem [shape: f32[256,9], index: 11, kind: output, shape index: {}]  }
   0x1   :  { %v3419_v0 = vld [vmem:[%s6798_s1 + $0x10] sm:$0xf]  ;;  %v3571_v1 = vld [vmem:[%s6798_s1 + $0x10] sm:$0x30]  ;;  %v225_v3 = vsel %vm223_vm0, 4294967295, %v4121_v2  ;;  %v3570_v7 = vld [vmem:[%s6798_s1 + $0x8] sm:$0xff] }
   0x2   :  { %v3420_v4 = vor.u32 %v3571_v1, %v3419_v0  ;;  %v226_v5 = vsel %vm224_vm1, %v225_v3, 0  ;;  %v3569_v8 = vld [vmem:[%s6798_s1] sm:$0xff]  ;;  %v3554_v10 = vld [vmem:[%s6800_s0 + $0x8] sm:$0xff]  ;;  %v3555_v11 = vld [vmem:[%s6800_s0 + $0x10] sm:$0xff]  ;;  %vm1774_vm3 = vcmask 1041408   ;;  %vm1775_vm4 = vcmask 1042432  }
   0x3   :  { %v3553_v9 = vld [vmem:[%s6800_s0] sm:$0xff]  ;;  %v3556_v12 = vld [vmem:[%s6800_s0 + $0x18] sm:$0xff]  ;;  %v1776_v14 = vsel %vm1774_vm3, 4294967295, %v4121_v2  ;;  %v1587_v15 = vld [vmem:[%s6801_s5 + $0x8] sm:$0x7]  ;;  %vm919_vm12 = vcmask 523264  }
   0x4   :  { %v228_v6 = vand.u32 %v3420_v4, %v226_v5  ;;  %v3557_v13 = vld [vmem:[%s6800_s0 + $0x20] sm:$0xff]  ;;  %v1593_v16 = vunpack.c.l.b16 %v1587_v15  ;;  %v1777_v17 = vsel %vm1775_vm4, %v1776_v14, 0  ;;  %v3558_v20 = vld [vmem:[%s6800_s0 + $0x28] sm:$0xff]  ;;  %v3559_v21 = vld [vmem:[%s6800_s0 + $0x30] sm:$0xff] }
   0x5   :  { %v3560_v22 = vld [vmem:[%s6800_s0 + $0x38] sm:$0xff]  ;;  %v3574_v24 = vld [vmem:[%s6802_s3 + $0x10] sm:$0xff]  ;;  %v4239_v25 = vld [vmem:[%s6799_s2] ss:$0 sm:$0xff] }
   0x6   :  { %235 = vmatpush.bf16.msra.mxu0 %v228_v6  ;;  %3585 = vmatpush.bf16.msra.mxu3 %v228_v6  ;;  %v1595_v18 = vpack.c.b16 %v1593_v16, %v1593_v16  ;;  %v3575_v23 = vld [vmem:[%s6802_s3 + $0x18] sm:$0xff]  ;;  %v3561_v26 = vld [vmem:[%s6800_s0 + $0x40] sm:$0xff]  ;;  %v3573_v28 = vld [vmem:[%s6802_s3 + $0x8] sm:$0xff] }
   0x7   :  { %972 = vmatpush.bf16.msra.mxu1 %v3575_v23  ;;  %v3572_v31 = vld [vmem:[%s6802_s3] sm:$0xff]  ;;  %v3562_v39 = vld [vmem:[%s6800_s0 + $0x48] sm:$0xff]  ;;  %v3563_v0 = vld [vmem:[%s6800_s0 + $0x50] sm:$0xff] }
   0x8   :  { %v1779_v19 = vand.u32 %v1777_v17, %v1595_v18 }
   0xa   :  { %236 = vmatpush.bf16.msra.mxu0 %v3570_v7  ;;  %3586 = vmatpush.bf16.msra.mxu3 %v3570_v7 }
   0xb   :  { %3593 = vmatpush.bf16.msra.mxu2 %v1779_v19  ;;  %973 = vmatpush.bf16.msra.mxu1 %v3574_v24 }
   0xe   :  { %237 = vmatpush.bf16.msra.mxu0 %v3569_v8  ;;  %3587 = vmatpush.bf16.msra.mxu3 %v3569_v8 }
   0xf   :  { %974 = vmatpush.bf16.msra.mxu1 %v3573_v28 }
  0x11   :  { %3421 = vmatmul.msk.bf16.vlgmr.msra.gmra.mxu0 %vm174_vm2, %v3553_v9 }
  0x12   :  { %1787 = vmatpush.bf16.msrb.mxu0 %v1779_v19  ;;  %3588 = vmatpush.bf16.msrb.mxu3 %v3575_v23  ;;  %v3568_v23 = vld [vmem:[%s6800_s0 + $0x78] sm:$0xff] }
  0x13   :  { %975 = vmatpush.bf16.msra.mxu1 %v3572_v31  ;;  %3436 = vmatmul.msk.bf16.vlgmr.msra.gmra.mxu3 %vm174_vm2, %v3568_v23 }
  0x16   :  { %3589 = vmatpush.bf16.msrb.mxu3 %v3574_v24 }
  0x17   :  { %3592 = vmatpush.bf16.msrb.mxu1 %v1779_v19 }
  0x1a   :  { %3590 = vmatpush.bf16.msrb.mxu3 %v3573_v28 }
  0x1e   :  { %3591 = vmatpush.bf16.msrb.mxu3 %v3572_v31 }
  0x21   :  { %3422 = vmatmul.msk.bf16.gmra.mxu0 %vm174_vm2, %v3554_v10 }
  0x31   :  { %3423 = vmatmul.msk.bf16.gmra.mxu0 %vm174_vm2, %v3555_v11 }
  0x41   :  { %3424 = vmatmul.msk.bf16.gmra.mxu0 %vm174_vm2, %v3556_v12 }
  0x51   :  { %3425 = vmatmul.msk.bf16.gmra.mxu0 %vm174_vm2, %v3557_v13 }
  0x61   :  { %3426 = vmatmul.msk.bf16.gmra.mxu0 %vm174_vm2, %v3558_v20 }
  0x71   :  { %3427 = vmatmul.msk.bf16.gmra.mxu0 %vm174_vm2, %v3559_v21 }
  0x81   :  { %3428 = vmatmul.msk.bf16.gmra.mxu0 %vm174_vm2, %v3560_v22 }
  0x8e   :  { %v239_v27 = vpop.f32.mrf.mxu0 }
  0x8f   :  { %v4248_v29 = vadd.f32 %v4239_v25, %v239_v27  ;;  %1629 = vrot.lane.b32.xlu0 %v239_v27, %s4122_s13 }
  0x91   :  { %v4252_v30 = vmul.f32 100.0, %v4248_v29  ;;  %3429 = vmatmul.msk.bf16.gmra.mxu0 %vm174_vm2, %v3561_v26 }
  0x93   :  { %vm387_vm5 = vcmp.gt.f32.partialorder %v4252_v30, 20.0 }
  0x94   :  { %v419_v32 = vsel %vm387_vm5, 0.0, %v4252_v30 }
  0x95   :  { %v451_v33 = vmul.f32 1.442695, %v419_v32 }
  0x96   :  { %v241_v34 = vpop.f32.mrf.mxu0 }
  0x97   :  { %3603 = vpow2.f32 %v451_v33  ;;  %v4263_v35 = vadd.f32 %v4239_v25, %v241_v34  ;;  %1631 = vrot.lane.b32.xlu0 %v241_v34, %s4122_s13 }
  0x99   :  { %v4267_v36 = vmul.f32 100.0, %v4263_v35 }
  0x9b   :  { %vm388_vm6 = vcmp.gt.f32.partialorder %v4267_v36, 20.0 }
  0x9c   :  { %v420_v37 = vsel %vm388_vm6, 0.0, %v4267_v36 }
  0x9d   :  { %v3604_v38 = vpop.eup %3603  ;;  %v453_v40 = vmul.f32 1.442695, %v420_v37  ;;  %v3564_v37 = vld [vmem:[%s6800_s0 + $0x58] sm:$0xff] }
  0x9e   :  { %v244_v41 = vpop.f32.mrf.mxu0  ;;  %v515_v42 = vadd.f32 1.0, %v3604_v38  ;;  %v518_v45 = vmul.f32 -0.5, %v3604_v38  ;;  %v521_v55 = vand.u32 2147483647, %v3604_v38 }
  0x9f   :  { %v4277_v43 = vadd.f32 %v4239_v25, %v244_v41  ;;  %1633 = vrot.lane.b32.xlu1 %v244_v41, %s4122_s13  ;;  %3605 = vpow2.f32 %v453_v40 }
  0xa0   :  { %3607 = vlog2.f32 %v515_v42  ;;  %v519_v53 = vadd.f32 1.0, %v518_v45  ;;  %vm4296_vm9 = vcmp.lt.f32.partialorder %v521_v55, 0.0004427343 }
  0xa1   :  { %v4281_v44 = vmul.f32 100.0, %v4277_v43  ;;  %3430 = vmatmul.msk.bf16.gmra.mxu0 %vm174_vm2, %v3562_v39 }
  0xa2   :  { %v520_v58 = vmul.f32 %v3604_v38, %v519_v53 }
  0xa3   :  { %vm389_vm7 = vcmp.gt.f32.partialorder %v4281_v44, 20.0 }
  0xa4   :  { %v421_v46 = vsel %vm389_vm7, 0.0, %v4281_v44 }
  0xa5   :  { %v3606_v47 = vpop.eup %3605  ;;  %v455_v48 = vmul.f32 1.442695, %v421_v46 }
  0xa6   :  { %v3608_v49 = vpop.eup %3607  ;;  %v246_v50 = vpop.f32.mrf.mxu0  ;;  %v524_v51 = vadd.f32 1.0, %v3606_v47  ;;  %v527_v54 = vmul.f32 -0.5, %v3606_v47  ;;  %v530_v61 = vand.u32 2147483647, %v3606_v47 }
  0xa7   :  { %3609 = vpow2.f32 %v455_v48  ;;  %v4289_v52 = vadd.f32 %v4239_v25, %v246_v50  ;;  %1635 = vrot.lane.b32.xlu1 %v246_v50, %s4122_s13  ;;  %v517_v57 = vmul.f32 0.6931472, %v3608_v49 }
  0xa8   :  { %3611 = vlog2.f32 %v524_v51  ;;  %v528_v59 = vadd.f32 1.0, %v527_v54  ;;  %vm531_vm10 = vcmp.lt.f32.partialorder %v530_v61, 0.0004427343 }
  0xa9   :  { %v4293_v56 = vmul.f32 100.0, %v4289_v52  ;;  %v523_v1 = vsel %vm4296_vm9, %v520_v58, %v517_v57 }
  0xaa   :  { %v529_v8 = vmul.f32 %v3606_v47, %v528_v59  ;;  %v803_v9 = vmul.f32 0.01, %v523_v1 }
  0xab   :  { %vm390_vm8 = vcmp.gt.f32.partialorder %v4293_v56, 20.0 }
  0xac   :  { %v422_v62 = vsel %vm390_vm8, 0.0, %v4293_v56  ;;  %v835_v15 = vsel %vm387_vm5, %v4248_v29, %v803_v9  ;;  %v3565_v9 = vld [vmem:[%s6800_s0 + $0x60] sm:$0xff] }
  0xad   :  { %v3610_v63 = vpop.eup %3609  ;;  %v457_v2 = vmul.f32 1.442695, %v422_v62 }
  0xae   :  { %v3612_v3 = vpop.eup %3611  ;;  %v249_v4 = vpop.f32.mrf.mxu0  ;;  %v533_v5 = vadd.f32 1.0, %v3610_v63  ;;  %v536_v13 = vmul.f32 -0.5, %v3610_v63  ;;  %v539_v28 = vand.u32 2147483647, %v3610_v63 }
  0xaf   :  { %v4309_v6 = vadd.f32 %v4239_v25, %v249_v4  ;;  %1637 = vrot.lane.b32.xlu2 %v249_v4, %s4122_s13  ;;  %v526_v7 = vmul.f32 0.6931472, %v3612_v3  ;;  %3613 = vpow2.f32 %v457_v2 }
  0xb0   :  { %3615 = vlog2.f32 %v533_v5  ;;  %v537_v26 = vadd.f32 1.0, %v536_v13  ;;  %vm4339_vm14 = vcmp.lt.f32.partialorder %v539_v28, 0.0004427343 }
  0xb1   :  { %v4313_v10 = vmul.f32 100.0, %v4309_v6  ;;  %3431 = vmatmul.msk.bf16.gmra.mxu0 %vm174_vm2, %v3563_v0  ;;  %v532_v11 = vsel %vm531_vm10, %v529_v8, %v526_v7 }
  0xb2   :  { %v804_v12 = vmul.f32 0.01, %v532_v11  ;;  %v538_v31 = vmul.f32 %v3610_v63, %v537_v26 }
  0xb3   :  { %vm391_vm11 = vcmp.gt.f32.partialorder %v4313_v10, 20.0 }
  0xb4   :  { %v423_v14 = vsel %vm391_vm11, 0.0, %v4313_v10  ;;  %v836_v16 = vsel %vm388_vm6, %v4263_v35, %v804_v12 }
  0xb5   :  { %v3614_v17 = vpop.eup %3613  ;;  %v459_v18 = vmul.f32 1.442695, %v423_v14  ;;  %v867_v19 = vpack.c.bf16 %v836_v16, %v835_v15 }
  0xb6   :  { %v3616_v20 = vpop.eup %3615  ;;  %v251_v21 = vpop.f32.mrf.mxu0  ;;  %v542_v22 = vadd.f32 1.0, %v3614_v17  ;;  %v545_v27 = vmul.f32 -0.5, %v3614_v17  ;;  %v548_v34 = vand.u32 2147483647, %v3614_v17 }
  0xb7   :  { %3617 = vpow2.f32 %v459_v18  ;;  %v4330_v24 = vadd.f32 %v4239_v25, %v251_v21  ;;  %3453 = vmatmul.msk.bf16.vlgmr.msra.gmra.mxu1 %vm919_vm12, %v867_v19  ;;  %1639 = vrot.lane.b32.xlu2 %v251_v21, %s4122_s13  ;;  %v535_v30 = vmul.f32 0.6931472, %v3616_v20 }
  0xb8   :  { %3619 = vlog2.f32 %v542_v22  ;;  %v546_v32 = vadd.f32 1.0, %v545_v27  ;;  %vm549_vm15 = vcmp.lt.f32.partialorder %v548_v34, 0.0004427343 }
  0xb9   :  { %v4336_v29 = vmul.f32 100.0, %v4330_v24  ;;  %v541_v38 = vsel %vm4339_vm14, %v538_v31, %v535_v30 }
  0xba   :  { %v547_v47 = vmul.f32 %v3614_v17, %v546_v32  ;;  %v805_v48 = vmul.f32 0.01, %v541_v38 }
  0xbb   :  { %vm392_vm13 = vcmp.gt.f32.partialorder %v4336_v29, 20.0 }
  0xbc   :  { %v424_v35 = vsel %vm392_vm13, 0.0, %v4336_v29  ;;  %v837_v55 = vsel %vm389_vm7, %v4277_v43, %v805_v48  ;;  %v3566_v48 = vld [vmem:[%s6800_s0 + $0x68] sm:$0xff] }
  0xbd   :  { %v3618_v36 = vpop.eup %3617  ;;  %v461_v39 = vmul.f32 1.442695, %v424_v35 }
  0xbe   :  { %v3620_v40 = vpop.eup %3619  ;;  %v254_v41 = vpop.f32.mrf.mxu0  ;;  %v551_v42 = vadd.f32 1.0, %v3618_v36  ;;  %v554_v53 = vmul.f32 -0.5, %v3618_v36  ;;  %v557_v1 = vand.u32 2147483647, %v3618_v36 }
  0xbf   :  { %v4352_v45 = vadd.f32 %v4239_v25, %v254_v41  ;;  %1641 = vrot.lane.b32.xlu0 %v254_v41, %s4122_s13  ;;  %v544_v46 = vmul.f32 0.6931472, %v3620_v40  ;;  %3621 = vpow2.f32 %v461_v39 }
  0xc0   :  { %3623 = vlog2.f32 %v551_v42  ;;  %v555_v44 = vadd.f32 1.0, %v554_v53  ;;  %vm4378_vm3 = vcmp.lt.f32.partialorder %v557_v1, 0.0004427343 }
  0xc1   :  { %v4356_v49 = vmul.f32 100.0, %v4352_v45  ;;  %3432 = vmatmul.msk.bf16.gmra.mxu0 %vm174_vm2, %v3564_v37  ;;  %v550_v50 = vsel %vm549_vm15, %v547_v47, %v544_v46 }
  0xc2   :  { %v806_v51 = vmul.f32 0.01, %v550_v50  ;;  %v556_v2 = vmul.f32 %v3618_v36, %v555_v44 }
  0xc3   :  { %vm393_vm0 = vcmp.gt.f32.partialorder %v4356_v49, 20.0 }
  0xc4   :  { %v425_v54 = vsel %vm393_vm0, 0.0, %v4356_v49  ;;  %v838_v57 = vsel %vm390_vm8, %v4289_v52, %v806_v51 }
  0xc5   :  { %v3622_v58 = vpop.eup %3621  ;;  %v463_v59 = vmul.f32 1.442695, %v425_v54  ;;  %v868_v60 = vpack.c.bf16 %v838_v57, %v837_v55 }
  0xc6   :  { %v3624_v61 = vpop.eup %3623  ;;  %v256_v62 = vpop.f32.mrf.mxu0  ;;  %v560_v63 = vadd.f32 1.0, %v3622_v58  ;;  %v563_v43 = vmul.f32 -0.5, %v3622_v58  ;;  %v566_v5 = vand.u32 2147483647, %v3622_v58 }
  0xc7   :  { %3625 = vpow2.f32 %v463_v59  ;;  %v4370_v0 = vadd.f32 %v4239_v25, %v256_v62  ;;  %3454 = vmatmul.msk.bf16.gmra.mxu1 %vm919_vm12, %v868_v60  ;;  %1643 = vrot.lane.b32.xlu1 %v256_v62, %s4122_s13  ;;  %v553_v56 = vmul.f32 0.6931472, %v3624_v61 }
  0xc8   :  { %3627 = vlog2.f32 %v560_v63  ;;  %v564_v3 = vadd.f32 1.0, %v563_v43  ;;  %vm567_vm4 = vcmp.lt.f32.partialorder %v566_v5, 0.0004427343 }
  0xc9   :  { %v4375_v52 = vmul.f32 100.0, %v4370_v0  ;;  %v559_v11 = vsel %vm4378_vm3, %v556_v2, %v553_v56 }
  0xca   :  { %v565_v18 = vmul.f32 %v3622_v58, %v564_v3  ;;  %v807_v19 = vmul.f32 0.01, %v559_v11 }
  0xcb   :  { %vm394_vm1 = vcmp.gt.f32.partialorder %v4375_v52, 20.0 }
  0xcc   :  { %v426_v7 = vsel %vm394_vm1, 0.0, %v4375_v52  ;;  %v839_v27 = vsel %vm391_vm11, %v4309_v6, %v807_v19  ;;  %v3567_v19 = vld [vmem:[%s6800_s0 + $0x70] sm:$0xff] }
  0xcd   :  { %v3626_v8 = vpop.eup %3625  ;;  %v465_v12 = vmul.f32 1.442695, %v426_v7 }
  0xce   :  { %v3628_v13 = vpop.eup %3627  ;;  %v259_v14 = vpop.f32.mrf.mxu0  ;;  %v569_v15 = vadd.f32 1.0, %v3626_v8  ;;  %v572_v23 = vmul.f32 -0.5, %v3626_v8  ;;  %v575_v29 = vand.u32 2147483647, %v3626_v8 }
  0xcf   :  { %v4391_v16 = vadd.f32 %v4239_v25, %v259_v14  ;;  %1645 = vrot.lane.b32.xlu2 %v259_v14, %s4122_s13  ;;  %v562_v17 = vmul.f32 0.6931472, %v3628_v13  ;;  %3629 = vpow2.f32 %v465_v12 }
  0xd0   :  { %3631 = vlog2.f32 %v569_v15  ;;  %v573_v10 = vadd.f32 1.0, %v572_v23  ;;  %vm4420_vm7 = vcmp.lt.f32.partialorder %v575_v29, 0.0004427343 }
  0xd1   :  { %v4395_v20 = vmul.f32 100.0, %v4391_v16  ;;  %3433 = vmatmul.msk.bf16.gmra.mxu0 %vm174_vm2, %v3565_v9  ;;  %v568_v21 = vsel %vm567_vm4, %v565_v18, %v562_v17 }
  0xd2   :  { %v808_v22 = vmul.f32 0.01, %v568_v21  ;;  %v574_v39 = vmul.f32 %v3626_v8, %v573_v10 }
  0xd3   :  { %vm395_vm5 = vcmp.gt.f32.partialorder %v4395_v20, 20.0 }
  0xd4   :  { %v427_v26 = vsel %vm395_vm5, 0.0, %v4395_v20  ;;  %v840_v28 = vsel %vm392_vm13, %v4330_v24, %v808_v22  ;;  %v3576_v24 = vld [vmem:[%s6801_s5] sm:$0xff] }
  0xd5   :  { %v3630_v30 = vpop.eup %3629  ;;  %v467_v31 = vmul.f32 1.442695, %v427_v26  ;;  %v869_v32 = vpack.c.bf16 %v840_v28, %v839_v27  ;;  %1788 = vmatpush.bf16.msrb.mxu0 %v3576_v24  ;;  %3594 = vmatpush.bf16.msrb.mxu1 %v3576_v24 }
  0xd6   :  { %v3632_v33 = vpop.eup %3631  ;;  %v261_v34 = vpop.f32.mrf.mxu0  ;;  %v578_v35 = vadd.f32 1.0, %v3630_v30  ;;  %v581_v6 = vmul.f32 -0.5, %v3630_v30  ;;  %3595 = vmatpush.bf16.msra.mxu2 %v3576_v24  ;;  %v584_v42 = vand.u32 2147483647, %v3630_v30 }
  0xd7   :  { %3633 = vpow2.f32 %v467_v31  ;;  %v4409_v36 = vadd.f32 %v4239_v25, %v261_v34  ;;  %3455 = vmatmul.msk.bf16.gmra.mxu1 %vm919_vm12, %v869_v32  ;;  %1647 = vrot.lane.b32.xlu0 %v261_v34, %s4122_s13  ;;  %v571_v38 = vmul.f32 0.6931472, %v3632_v33 }
  0xd8   :  { %3635 = vlog2.f32 %v578_v35  ;;  %v582_v40 = vadd.f32 1.0, %v581_v6  ;;  %vm585_vm8 = vcmp.lt.f32.partialorder %v584_v42, 0.0004427343 }
  0xd9   :  { %v4417_v37 = vmul.f32 100.0, %v4409_v36  ;;  %v577_v50 = vsel %vm4420_vm7, %v574_v39, %v571_v38 }
  0xda   :  { %v583_v59 = vmul.f32 %v3630_v30, %v582_v40  ;;  %v809_v60 = vmul.f32 0.01, %v577_v50 }
  0xdb   :  { %vm396_vm6 = vcmp.gt.f32.partialorder %v4417_v37, 20.0 }
  0xdc   :  { %v428_v46 = vsel %vm396_vm6, 0.0, %v4417_v37  ;;  %v841_v1 = vsel %vm393_vm0, %v4352_v45, %v809_v60 }
  0xdd   :  { %v3634_v47 = vpop.eup %3633  ;;  %v469_v51 = vmul.f32 1.442695, %v428_v46 }
  0xde   :  { %v3636_v53 = vpop.eup %3635  ;;  %v264_v54 = vpop.f32.mrf.mxu0  ;;  %v587_v55 = vadd.f32 1.0, %v3634_v47  ;;  %v590_v44 = vmul.f32 -0.5, %v3634_v47  ;;  %v593_v11 = vand.u32 2147483647, %v3634_v47 }
  0xdf   :  { %v4433_v57 = vadd.f32 %v4239_v25, %v264_v54  ;;  %1649 = vrot.lane.b32.xlu1 %v264_v54, %s4122_s13  ;;  %v580_v58 = vmul.f32 0.6931472, %v3636_v53  ;;  %3637 = vpow2.f32 %v469_v51 }
  0xe0   :  { %3639 = vlog2.f32 %v587_v55  ;;  %v591_v49 = vadd.f32 1.0, %v590_v44  ;;  %vm4459_vm11 = vcmp.lt.f32.partialorder %v593_v11, 0.0004427343 }
  0xe1   :  { %v4437_v61 = vmul.f32 100.0, %v4433_v57  ;;  %3434 = vmatmul.msk.bf16.gmra.mxu0 %vm174_vm2, %v3566_v48  ;;  %v586_v62 = vsel %vm585_vm8, %v583_v59, %v580_v58 }
  0xe2   :  { %v810_v63 = vmul.f32 0.01, %v586_v62  ;;  %v592_v12 = vmul.f32 %v3634_v47, %v591_v49 }
  0xe3   :  { %vm397_vm9 = vcmp.gt.f32.partialorder %v4437_v61, 20.0 }
  0xe4   :  { %v429_v43 = vsel %vm397_vm9, 0.0, %v4437_v61  ;;  %v842_v56 = vsel %vm394_vm1, %v4370_v0, %v810_v63 }
  0xe5   :  { %v3638_v2 = vpop.eup %3637  ;;  %v471_v3 = vmul.f32 1.442695, %v429_v43  ;;  %v870_v4 = vpack.c.bf16 %v842_v56, %v841_v1 }
  0xe6   :  { %v3640_v5 = vpop.eup %3639  ;;  %v266_v7 = vpop.f32.mrf.mxu0  ;;  %v596_v8 = vadd.f32 1.0, %v3638_v2  ;;  %v599_v45 = vmul.f32 -0.5, %v3638_v2  ;;  %v602_v15 = vand.u32 2147483647, %v3638_v2 }
  0xe7   :  { %3641 = vpow2.f32 %v471_v3  ;;  %v4451_v9 = vadd.f32 %v4239_v25, %v266_v7  ;;  %3456 = vmatmul.msk.bf16.gmra.mxu1 %vm919_vm12, %v870_v4  ;;  %1651 = vrot.lane.b32.xlu2 %v266_v7, %s4122_s13  ;;  %v589_v52 = vmul.f32 0.6931472, %v3640_v5 }
  0xe8   :  { %3643 = vlog2.f32 %v596_v8  ;;  %v600_v13 = vadd.f32 1.0, %v599_v45  ;;  %vm603_vm13 = vcmp.lt.f32.partialorder %v602_v15, 0.0004427343 }
  0xe9   :  { %v4456_v0 = vmul.f32 100.0, %v4451_v9  ;;  %v595_v21 = vsel %vm4459_vm11, %v592_v12, %v589_v52 }
  0xea   :  { %v601_v31 = vmul.f32 %v3638_v2, %v600_v13  ;;  %v811_v32 = vmul.f32 0.01, %v595_v21 }
  0xeb   :  { %vm398_vm10 = vcmp.gt.f32.partialorder %v4456_v0, 20.0 }
  0xec   :  { %v430_v17 = vsel %vm398_vm10, 0.0, %v4456_v0  ;;  %v843_v24 = vsel %vm395_vm5, %v4391_v16, %v811_v32 }
  0xed   :  { %v3642_v18 = vpop.eup %3641  ;;  %v473_v22 = vmul.f32 1.442695, %v430_v17 }
  0xee   :  { %v3644_v23 = vpop.eup %3643  ;;  %v269_v26 = vpop.f32.mrf.mxu0  ;;  %v605_v27 = vadd.f32 1.0, %v3642_v18  ;;  %v608_v10 = vmul.f32 -0.5, %v3642_v18  ;;  %v611_v48 = vand.u32 2147483647, %v3642_v18 }
  0xef   :  { %v4472_v28 = vadd.f32 %v4239_v25, %v269_v26  ;;  %1653 = vrot.lane.b32.xlu0 %v269_v26, %s4122_s13  ;;  %v598_v30 = vmul.f32 0.6931472, %v3644_v23  ;;  %3645 = vpow2.f32 %v473_v22 }
  0xf0   :  { %3647 = vlog2.f32 %v605_v27  ;;  %v609_v20 = vadd.f32 1.0, %v608_v10  ;;  %vm612_vm15 = vcmp.lt.f32.partialorder %v611_v48, 0.0004427343 }
  0xf1   :  { %v4476_v33 = vmul.f32 100.0, %v4472_v28  ;;  %3435 = vmatmul.msk.bf16.gmra.mxu0 %vm174_vm2, %v3567_v19  ;;  %v604_v34 = vsel %vm603_vm13, %v601_v31, %v598_v30 }
  0xf2   :  { %v812_v35 = vmul.f32 0.01, %v604_v34  ;;  %v610_v50 = vmul.f32 %v3642_v18, %v609_v20 }
  0xf3   :  { %vm399_vm14 = vcmp.gt.f32.partialorder %v4476_v33, 20.0 }
  0xf4   :  { %v431_v6 = vsel %vm399_vm14, 0.0, %v4476_v33  ;;  %v844_v29 = vsel %vm396_vm6, %v4409_v36, %v812_v35 }
  0xf5   :  { %v3646_v38 = vpop.eup %3645  ;;  %v475_v39 = vmul.f32 1.442695, %v431_v6  ;;  %v871_v40 = vpack.c.bf16 %v844_v29, %v843_v24 }
  0xf6   :  { %v3648_v41 = vpop.eup %3647  ;;  %v271_v42 = vpop.f32.mrf.mxu0  ;;  %v614_v46 = vadd.f32 1.0, %v3646_v38  ;;  %v617_v16 = vmul.f32 -0.5, %v3646_v38  ;;  %v620_v53 = vand.u32 2147483647, %v3646_v38 }
  0xf7   :  { %3649 = vpow2.f32 %v475_v39  ;;  %v4490_v47 = vadd.f32 %v4239_v25, %v271_v42  ;;  %3457 = vmatmul.msk.bf16.gmra.mxu1 %vm919_vm12, %v871_v40  ;;  %1655 = vrot.lane.b32.xlu1 %v271_v42, %s4122_s13  ;;  %v607_v37 = vmul.f32 0.6931472, %v3648_v41 }
  0xf8   :  { %3651 = vlog2.f32 %v614_v46  ;;  %v618_v51 = vadd.f32 1.0, %v617_v16  ;;  %vm621_vm0 = vcmp.lt.f32.partialorder %v620_v53, 0.0004427343 }
  0xf9   :  { %v4495_v36 = vmul.f32 100.0, %v4490_v47  ;;  %v613_v58 = vsel %vm612_vm15, %v610_v50, %v607_v37 }
  0xfa   :  { %v619_v1 = vmul.f32 %v3646_v38, %v618_v51  ;;  %v813_v56 = vmul.f32 0.01, %v613_v58 }
  0xfb   :  { %vm400_vm2 = vcmp.gt.f32.partialorder %v4495_v36, 20.0 }
  0xfc   :  { %v432_v54 = vsel %vm400_vm2, 0.0, %v4495_v36  ;;  %v845_v8 = vsel %vm397_vm9, %v4433_v57, %v813_v56 }
  0xfd   :  { %v3650_v55 = vpop.eup %3649  ;;  %v477_v59 = vmul.f32 1.442695, %v432_v54 }
  0xfe   :  { %v3652_v60 = vpop.eup %3651  ;;  %v274_v62 = vpop.f32.mrf.mxu0  ;;  %v623_v63 = vadd.f32 1.0, %v3650_v55  ;;  %v626_v5 = vmul.f32 -0.5, %v3650_v55  ;;  %v629_v17 = vand.u32 2147483647, %v3650_v55 }
  0xff   :  { %v4502_v44 = vadd.f32 %v4239_v25, %v274_v62  ;;  %1657 = vrot.lane.b32.xlu2 %v274_v62, %s4122_s13  ;;  %v616_v43 = vmul.f32 0.6931472, %v3652_v60  ;;  %3653 = vpow2.f32 %v477_v59 }
 0x100   :  { %3655 = vlog2.f32 %v623_v63  ;;  %v627_v61 = vadd.f32 1.0, %v626_v5  ;;  %vm630_vm4 = vcmp.lt.f32.partialorder %v629_v17, 0.0004427343 }
 0x101   :  { %v4506_v2 = vmul.f32 100.0, %v4502_v44  ;;  %v622_v3 = vsel %vm621_vm0, %v619_v1, %v616_v43 }
 0x102   :  { %v814_v4 = vmul.f32 0.01, %v622_v3  ;;  %v628_v18 = vmul.f32 %v3650_v55, %v627_v61 }
 0x103   :  { %vm401_vm1 = vcmp.gt.f32.partialorder %v4506_v2, 20.0 }
 0x104   :  { %v433_v7 = vsel %vm401_vm1, 0.0, %v4506_v2  ;;  %v846_v49 = vsel %vm398_vm10, %v4451_v9, %v814_v4 }
 0x105   :  { %v3654_v45 = vpop.eup %3653  ;;  %v479_v11 = vmul.f32 1.442695, %v433_v7  ;;  %v872_v52 = vpack.c.bf16 %v846_v49, %v845_v8 }
 0x106   :  { %v3656_v12 = vpop.eup %3655  ;;  %v276_v13 = vpop.f32.mrf.mxu0  ;;  %v632_v14 = vadd.f32 1.0, %v3654_v45  ;;  %v635_v57 = vmul.f32 -0.5, %v3654_v45  ;;  %v638_v21 = vand.u32 2147483647, %v3654_v45 }
 0x107   :  { %3657 = vpow2.f32 %v479_v11  ;;  %v4519_v15 = vadd.f32 %v4239_v25, %v276_v13  ;;  %3458 = vmatmul.msk.bf16.gmra.mxu1 %vm919_vm12, %v872_v52  ;;  %1659 = vrot.lane.b32.xlu0 %v276_v13, %s4122_s13  ;;  %v625_v0 = vmul.f32 0.6931472, %v3656_v12 }
 0x108   :  { %3659 = vlog2.f32 %v632_v14  ;;  %v636_v19 = vadd.f32 1.0, %v635_v57  ;;  %vm639_vm5 = vcmp.lt.f32.partialorder %v638_v21, 0.0004427343 }
 0x109   :  { %v4524_v9 = vmul.f32 100.0, %v4519_v15  ;;  %v631_v26 = vsel %vm630_vm4, %v628_v18, %v625_v0 }
 0x10a   :  { %v637_v10 = vmul.f32 %v3654_v45, %v636_v19  ;;  %v815_v6 = vmul.f32 0.01, %v631_v26 }
 0x10b   :  { %vm402_vm3 = vcmp.gt.f32.partialorder %v4524_v9, 20.0 }
 0x10c   :  { %v434_v22 = vsel %vm402_vm3, 0.0, %v4524_v9  ;;  %v847_v41 = vsel %vm399_vm14, %v4472_v28, %v815_v6 }
 0x10d   :  { %v3658_v23 = vpop.eup %3657  ;;  %v481_v27 = vmul.f32 1.442695, %v434_v22 }
 0x10e   :  { %v3660_v30 = vpop.eup %3659  ;;  %v279_v31 = vpop.f32.mrf.mxu0  ;;  %v641_v32 = vadd.f32 1.0, %v3658_v23  ;;  %v644_v39 = vmul.f32 -0.5, %v3658_v23  ;;  %v647_v53 = vand.u32 2147483647, %v3658_v23 }
 0x10f   :  { %v4531_v34 = vadd.f32 %v4239_v25, %v279_v31  ;;  %1661 = vrot.lane.b32.xlu1 %v279_v31, %s4122_s13  ;;  %v634_v35 = vmul.f32 0.6931472, %v3660_v30  ;;  %3661 = vpow2.f32 %v481_v27 }
 0x110   :  { %3663 = vlog2.f32 %v641_v32  ;;  %v645_v33 = vadd.f32 1.0, %v644_v39  ;;  %vm648_vm8 = vcmp.lt.f32.partialorder %v647_v53, 0.0004427343 }
 0x111   :  { %v4535_v24 = vmul.f32 100.0, %v4531_v34  ;;  %v640_v29 = vsel %vm639_vm5, %v637_v10, %v634_v35 }
 0x112   :  { %v816_v38 = vmul.f32 0.01, %v640_v29  ;;  %v646_v54 = vmul.f32 %v3658_v23, %v645_v33 }
 0x113   :  { %vm403_vm6 = vcmp.gt.f32.partialorder %v4535_v24, 20.0 }
 0x114   :  { %v435_v40 = vsel %vm403_vm6, 0.0, %v4535_v24  ;;  %v848_v42 = vsel %vm400_vm2, %v4490_v47, %v816_v38 }
 0x115   :  { %v3662_v46 = vpop.eup %3661  ;;  %v483_v20 = vmul.f32 1.442695, %v435_v40  ;;  %v873_v16 = vpack.c.bf16 %v848_v42, %v847_v41  ;;  %v4598_v42 = vld [vmem:[%s6803_s4] ss:$0 sm:$0xff] }
 0x116   :  { %v3664_v48 = vpop.eup %3663  ;;  %v281_v37 = vpop.f32.mrf.mxu0  ;;  %v650_v50 = vadd.f32 1.0, %v3662_v46  ;;  %v653_v28 = vmul.f32 -0.5, %v3662_v46  ;;  %v656_v59 = vand.u32 2147483647, %v3662_v46 }
 0x117   :  { %3665 = vpow2.f32 %v483_v20  ;;  %v4548_v51 = vadd.f32 %v4239_v25, %v281_v37  ;;  %3459 = vmatmul.msk.bf16.gmra.mxu1 %vm919_vm12, %v873_v16  ;;  %1663 = vrot.lane.b32.xlu2 %v281_v37, %s4122_s13  ;;  %v643_v36 = vmul.f32 0.6931472, %v3664_v48 }
 0x118   :  { %3667 = vlog2.f32 %v650_v50  ;;  %v654_v55 = vadd.f32 1.0, %v653_v28  ;;  %vm657_vm9 = vcmp.lt.f32.partialorder %v656_v59, 0.0004427343 }
 0x119   :  { %v4553_v47 = vmul.f32 100.0, %v4548_v51  ;;  %v649_v63 = vsel %vm648_vm8, %v646_v54, %v643_v36 }
 0x11a   :  { %v655_v5 = vmul.f32 %v3662_v46, %v654_v55  ;;  %v817_v7 = vmul.f32 0.01, %v649_v63 }
 0x11b   :  { %vm404_vm7 = vcmp.gt.f32.partialorder %v4553_v47, 20.0 }
 0x11c   :  { %v436_v58 = vsel %vm404_vm7, 0.0, %v4553_v47  ;;  %v849_v12 = vsel %vm401_vm1, %v4502_v44, %v817_v7 }
 0x11d   :  { %v3666_v60 = vpop.eup %3665  ;;  %v485_v62 = vmul.f32 1.442695, %v436_v58 }
 0x11e   :  { %v3668_v43 = vpop.eup %3667  ;;  %v284_v1 = vpop.f32.mrf.mxu0  ;;  %v659_v56 = vadd.f32 1.0, %v3666_v60  ;;  %v662_v11 = vmul.f32 -0.5, %v3666_v60  ;;  %v665_v21 = vand.u32 2147483647, %v3666_v60 }
 0x11f   :  { %3669 = vpow2.f32 %v485_v62  ;;  %v4560_v3 = vadd.f32 %v4239_v25, %v284_v1  ;;  %1665 = vrot.lane.b32.xlu0 %v284_v1, %s4122_s13  ;;  %v652_v4 = vmul.f32 0.6931472, %v3668_v43 }
 0x120   :  { %3671 = vlog2.f32 %v659_v56  ;;  %v663_v2 = vadd.f32 1.0, %v662_v11  ;;  %vm666_vm13 = vcmp.lt.f32.partialorder %v665_v21, 0.0004427343 }
 0x121   :  { %v4564_v8 = vmul.f32 100.0, %v4560_v3  ;;  %v658_v49 = vsel %vm657_vm9, %v655_v5, %v652_v4 }
 0x122   :  { %v818_v45 = vmul.f32 0.01, %v658_v49  ;;  %v664_v22 = vmul.f32 %v3666_v60, %v663_v2 }
 0x123   :  { %vm405_vm10 = vcmp.gt.f32.partialorder %v4564_v8, 20.0 }
 0x124   :  { %v437_v52 = vsel %vm405_vm10, 0.0, %v4564_v8  ;;  %v850_v13 = vsel %vm402_vm3, %v4519_v15, %v818_v45 }
 0x125   :  { %v3670_v14 = vpop.eup %3669  ;;  %v487_v61 = vmul.f32 1.442695, %v437_v52  ;;  %v874_v57 = vpack.c.bf16 %v850_v13, %v849_v12 }
 0x126   :  { %v3672_v17 = vpop.eup %3671  ;;  %v286_v0 = vpop.f32.mrf.mxu0  ;;  %v668_v18 = vadd.f32 1.0, %v3670_v14  ;;  %v671_v44 = vmul.f32 -0.5, %v3670_v14  ;;  %v674_v27 = vand.u32 2147483647, %v3670_v14 }
 0x127   :  { %3673 = vpow2.f32 %v487_v61  ;;  %v4577_v19 = vadd.f32 %v4239_v25, %v286_v0  ;;  %3460 = vmatmul.msk.bf16.gmra.mxu1 %vm919_vm12, %v874_v57  ;;  %1667 = vrot.lane.b32.xlu1 %v286_v0, %s4122_s13  ;;  %v661_v9 = vmul.f32 0.6931472, %v3672_v17 }
 0x128   :  { %3675 = vlog2.f32 %v668_v18  ;;  %v672_v23 = vadd.f32 1.0, %v671_v44  ;;  %vm675_vm14 = vcmp.lt.f32.partialorder %v674_v27, 0.0004427343 }
 0x129   :  { %v4582_v15 = vmul.f32 100.0, %v4577_v19  ;;  %v667_v32 = vsel %vm666_vm13, %v664_v22, %v661_v9 }
 0x12a   :  { %v673_v39 = vmul.f32 %v3670_v14, %v672_v23  ;;  %v819_v40 = vmul.f32 0.01, %v667_v32 }
 0x12b   :  { %vm406_vm11 = vcmp.gt.f32.partialorder %v4582_v15, 20.0 }
 0x12c   :  { %v438_v26 = vsel %vm406_vm11, 0.0, %v4582_v15  ;;  %v851_v50 = vsel %vm403_vm6, %v4531_v34, %v819_v40 }
 0x12d   :  { %v3674_v30 = vpop.eup %3673  ;;  %v489_v31 = vmul.f32 1.442695, %v438_v26 }
 0x12e   :  { %v3676_v35 = vpop.eup %3675  ;;  %v289_v10 = vpop.f32.mrf.mxu0  ;;  %v677_v6 = vadd.f32 1.0, %v3674_v30  ;;  %v680_v20 = vmul.f32 -0.5, %v3674_v30  ;;  %v683_v60 = vand.u32 2147483647, %v3674_v30 }
 0x12f   :  { %3677 = vpow2.f32 %v489_v31  ;;  %v4589_v29 = vadd.f32 %v4239_v25, %v289_v10  ;;  %1669 = vrot.lane.b32.xlu2 %v289_v10, %s4122_s13  ;;  %v670_v38 = vmul.f32 0.6931472, %v3676_v35 }
 0x130   :  { %3679 = vlog2.f32 %v677_v6  ;;  %v681_v55 = vadd.f32 1.0, %v680_v20  ;;  %vm684_vm0 = vcmp.lt.f32.partialorder %v683_v60, 0.0004427343 }
 0x131   :  { %v4593_v41 = vmul.f32 100.0, %v4589_v29  ;;  %v676_v46 = vsel %vm675_vm14, %v673_v39, %v670_v38  ;;  %vm1725_vm14 = vcmask 171008  }
 0x132   :  { %v820_v16 = vmul.f32 0.01, %v676_v46  ;;  %v682_v43 = vmul.f32 %v3674_v30, %v681_v55 }
 0x133   :  { %vm407_vm2 = vcmp.gt.f32.partialorder %v4593_v41, 20.0 }
 0x134   :  { %v439_v48 = vsel %vm407_vm2, 0.0, %v4593_v41  ;;  %v977_v37 = vpop.f32.mrf.mxu1  ;;  %v852_v33 = vsel %vm404_vm7, %v4548_v51, %v820_v16 }
 0x135   :  { %v3678_v28 = vpop.eup %3677  ;;  %v491_v53 = vmul.f32 1.442695, %v439_v48  ;;  %v4611_v36 = vadd.f32 %v4598_v42, %v977_v37  ;;  %v875_v54 = vpack.c.bf16 %v852_v33, %v851_v50  ;;  %v4668_v37 = vld [vmem:[%s6799_s2] ss:$0 sm:$0xff] }
 0x136   :  { %v3680_v58 = vpop.eup %3679  ;;  %v291_v59 = vpop.f32.mrf.mxu0  ;;  %v686_v62 = vadd.f32 1.0, %v3678_v28  ;;  %v689_v63 = vmul.f32 -0.5, %v3678_v28  ;;  %v692_v45 = vand.u32 2147483647, %v3678_v28 }
 0x137   :  { %3681 = vpow2.f32 %v491_v53  ;;  %v4614_v24 = vmul.f32 100.0, %v4611_v36  ;;  %v4617_v34 = vadd.f32 %v4239_v25, %v291_v59  ;;  %3461 = vmatmul.msk.bf16.gmra.mxu1 %vm919_vm12, %v875_v54  ;;  %1671 = vrot.lane.b32.xlu0 %v291_v59, %s4122_s13  ;;  %v679_v51 = vmul.f32 0.6931472, %v3680_v58 }
 0x138   :  { %3683 = vlog2.f32 %v686_v62  ;;  %v690_v56 = vadd.f32 1.0, %v689_v63  ;;  %vm693_vm3 = vcmp.lt.f32.partialorder %v692_v45, 0.0004427343 }
 0x139   :  { %vm1089_vm15 = vcmp.gt.f32.partialorder %v4614_v24, 20.0  ;;  %v4623_v47 = vmul.f32 100.0, %v4617_v34  ;;  %v685_v5 = vsel %vm684_vm0, %v682_v43, %v679_v51  ;;  %v4689_v43 = vpop.f32.mrf.mxu3 }
 0x13a   :  { %v1121_v1 = vsel %vm1089_vm15, 0.0, %v4614_v24  ;;  %v691_v61 = vmul.f32 %v3678_v28, %v690_v56  ;;  %v821_v57 = vmul.f32 0.01, %v685_v5 }
 0x13b   :  { %v1153_v4 = vmul.f32 1.442695, %v1121_v1  ;;  %vm408_vm1 = vcmp.gt.f32.partialorder %v4623_v47, 20.0 }
 0x13c   :  { %v440_v7 = vsel %vm408_vm1, 0.0, %v4623_v47  ;;  %v979_v49 = vpop.f32.mrf.mxu1  ;;  %v853_v27 = vsel %vm405_vm10, %v4560_v3, %v821_v57 }
 0x13d   :  { %v3682_v11 = vpop.eup %3681  ;;  %3685 = vpow2.f32 %v1153_v4  ;;  %v493_v52 = vmul.f32 1.442695, %v440_v7  ;;  %v4633_v12 = vadd.f32 %v4598_v42, %v979_v49  ;;  %v4696_v49 = vadd.f32 %v4668_v37, %v4689_v43 }
 0x13e   :  { %v3684_v13 = vpop.eup %3683  ;;  %v294_v14 = vpop.f32.mrf.mxu0  ;;  %v695_v17 = vadd.f32 1.0, %v3682_v11  ;;  %v698_v44 = vmul.f32 -0.5, %v3682_v11  ;;  %v701_v30 = vand.u32 2147483647, %v3682_v11 }
 0x13f   :  { %3687 = vpow2.f32 %v493_v52  ;;  %v4636_v0 = vmul.f32 100.0, %v4633_v12  ;;  %v4639_v18 = vadd.f32 %v4239_v25, %v294_v14  ;;  %1673 = vrot.lane.b32.xlu1 %v294_v14, %s4122_s13  ;;  %v688_v2 = vmul.f32 0.6931472, %v3684_v13 }
 0x140   :  { %3689 = vlog2.f32 %v695_v17  ;;  %v699_v6 = vadd.f32 1.0, %v698_v44  ;;  %vm4675_vm6 = vcmp.lt.f32.partialorder %v701_v30, 0.0004427343 }
 0x141   :  { %vm1090_vm4 = vcmp.gt.f32.partialorder %v4636_v0, 20.0  ;;  %v4644_v21 = vmul.f32 100.0, %v4639_v18  ;;  %v694_v9 = vsel %vm693_vm3, %v691_v61, %v688_v2 }
 0x142   :  { %v1122_v22 = vsel %vm1090_vm4, 0.0, %v4636_v0  ;;  %v822_v23 = vmul.f32 0.01, %v694_v9 }
 0x143   :  { %v3686_v26 = vpop.eup %3685  ;;  %v1155_v25 = vmul.f32 1.442695, %v1122_v22  ;;  %vm409_vm5 = vcmp.gt.f32.partialorder %v4644_v21, 20.0 }
 0x144   :  { %v1217_v31 = vadd.f32 1.0, %v3686_v26  ;;  %v1220_v32 = vmul.f32 -0.5, %v3686_v26  ;;  %v441_v35 = vsel %vm409_vm5, 0.0, %v4644_v21  ;;  %v982_v10 = vpop.f32.mrf.mxu1  ;;  %v854_v8 = vsel %vm406_vm11, %v4577_v19, %v822_v23 }
 0x145   :  { %v3688_v38 = vpop.eup %3687  ;;  %3691 = vpow2.f32 %v1155_v25  ;;  %v495_v39 = vmul.f32 1.442695, %v441_v35  ;;  %v4657_v40 = vadd.f32 %v4598_v42, %v982_v10  ;;  %v876_v16 = vpack.c.bf16 %v854_v8, %v853_v27 }
 0x146   :  { %v3690_v3 = vpop.eup %3689  ;;  %3693 = vlog2.f32 %v1217_v31  ;;  %v1221_v46 = vadd.f32 1.0, %v1220_v32  ;;  %v296_v20 = vpop.f32.mrf.mxu0  ;;  %v700_v19 = vmul.f32 %v3682_v11, %v699_v6  ;;  %v704_v28 = vadd.f32 1.0, %v3688_v38 }
 0x147   :  { %v4663_v48 = vmul.f32 100.0, %v4657_v40  ;;  %v4671_v50 = vadd.f32 %v4668_v37, %v296_v20  ;;  %1675 = vrot.lane.b32.xlu2 %v296_v20, %s4122_s13  ;;  %v697_v15 = vmul.f32 0.6931472, %v3690_v3  ;;  %3462 = vmatmul.msk.bf16.gmra.mxu1 %vm919_vm12, %v876_v16  ;;  %3695 = vpow2.f32 %v495_v39 }
 0x148   :  { %v707_v54 = vmul.f32 -0.5, %v3688_v38  ;;  %v1222_v55 = vmul.f32 %v3686_v26, %v1221_v46  ;;  %v1223_v58 = vand.u32 2147483647, %v3686_v26  ;;  %3697 = vlog2.f32 %v704_v28 }
 0x149   :  { %vm1091_vm7 = vcmp.gt.f32.partialorder %v4663_v48, 20.0  ;;  %v4681_v53 = vmul.f32 100.0, %v4671_v50  ;;  %v703_v63 = vsel %vm4675_vm6, %v700_v19, %v697_v15  ;;  %v710_v51 = vand.u32 2147483647, %v3688_v38 }
 0x14a   :  { %v1123_v59 = vsel %vm1091_vm7, 0.0, %v4663_v48  ;;  %v708_v52 = vadd.f32 1.0, %v707_v54  ;;  %vm4701_vm9 = vcmp.lt.f32.partialorder %v1223_v58, 0.0004427343  ;;  %v823_v25 = vmul.f32 0.01, %v703_v63 }
 0x14b   :  { %v3692_v60 = vpop.eup %3691  ;;  %v1157_v62 = vmul.f32 1.442695, %v1123_v59  ;;  %vm410_vm8 = vcmp.gt.f32.partialorder %v4681_v53, 20.0  ;;  %vm4716_vm10 = vcmp.lt.f32.partialorder %v710_v51, 0.0004427343  ;;  %v4721_v27 = vmul.f32 100.0, %v4696_v49 }
 0x14c   :  { %v3694_v1 = vpop.eup %3693  ;;  %v1226_v56 = vadd.f32 1.0, %v3692_v60  ;;  %v1229_v4 = vmul.f32 -0.5, %v3692_v60  ;;  %v442_v5 = vsel %vm410_vm8, 0.0, %v4681_v53  ;;  %v984_v7 = vpop.f32.mrf.mxu1  ;;  %v1232_v14 = vand.u32 2147483647, %v3692_v60 }
 0x14d   :  { %v1219_v45 = vmul.f32 0.6931472, %v3694_v1  ;;  %3699 = vpow2.f32 %v1157_v62  ;;  %v4699_v11 = vadd.f32 %v4598_v42, %v984_v7  ;;  %v497_v61 = vmul.f32 1.442695, %v442_v5  ;;  %v4705_v17 = vpop.eup %3695 }
 0x14e   :  { %3701 = vlog2.f32 %v1226_v56  ;;  %v299_v57 = vpop.f32.mrf.mxu0  ;;  %v1230_v44 = vadd.f32 1.0, %v1229_v4  ;;  %v3698_v23 = vpop.eup %3697  ;;  %v709_v32 = vmul.f32 %v3688_v38, %v708_v52  ;;  %vm4727_vm13 = vcmp.lt.f32.partialorder %v1232_v14, 0.0004427343 }
 0x14f   :  { %v1225_v2 = vsel %vm4701_vm9, %v1222_v55, %v1219_v45  ;;  %v4710_v9 = vmul.f32 100.0, %v4699_v11  ;;  %v4713_v22 = vadd.f32 %v4668_v37, %v299_v57  ;;  %1677 = vrot.lane.b32.xlu0 %v299_v57, %s4122_s13  ;;  %v706_v31 = vmul.f32 0.6931472, %v3698_v23 }
 0x150   :  { %v1505_v35 = vmul.f32 0.01, %v1225_v2  ;;  %3703 = vpow2.f32 %v497_v61  ;;  %v1231_v8 = vmul.f32 %v3692_v60, %v1230_v44  ;;  %vm417_vm3 = vcmp.gt.f32.partialorder %v4721_v27, 20.0 }
 0x151   :  { %vm1092_vm11 = vcmp.gt.f32.partialorder %v4710_v9, 20.0  ;;  %v4725_v30 = vmul.f32 100.0, %v4713_v22  ;;  %v712_v46 = vsel %vm4716_vm10, %v709_v32, %v706_v31  ;;  %v713_v60 = vadd.f32 1.0, %v4705_v17 }
 0x152   :  { %v1124_v6 = vsel %vm1092_vm11, 0.0, %v4710_v9  ;;  %v824_v59 = vmul.f32 0.01, %v712_v46  ;;  %v855_v5 = vsel %vm407_vm2, %v4589_v29, %v823_v25  ;;  %v449_v13 = vsel %vm417_vm3, 0.0, %v4721_v27 }
 0x153   :  { %v3700_v39 = vpop.eup %3699  ;;  %v1159_v3 = vmul.f32 1.442695, %v1124_v6  ;;  %vm411_vm0 = vcmp.gt.f32.partialorder %v4725_v30, 20.0  ;;  %v1537_v14 = vsel %vm1089_vm15, %v4611_v36, %v1505_v35 }
 0x154   :  { %v3702_v38 = vpop.eup %3701  ;;  %v1235_v20 = vadd.f32 1.0, %v3700_v39  ;;  %v1238_v16 = vmul.f32 -0.5, %v3700_v39  ;;  %v443_v15 = vsel %vm411_vm0, 0.0, %v4725_v30  ;;  %v987_v19 = vpop.f32.mrf.mxu1  ;;  %v1241_v55 = vand.u32 2147483647, %v3700_v39 }
 0x155   :  { %v1228_v33 = vmul.f32 0.6931472, %v3702_v38  ;;  %3705 = vpow2.f32 %v1159_v3  ;;  %v499_v28 = vmul.f32 1.442695, %v443_v15  ;;  %v4742_v54 = vadd.f32 %v4598_v42, %v987_v19 }
 0x156   :  { %3707 = vlog2.f32 %v1235_v20  ;;  %v301_v58 = vpop.f32.mrf.mxu0  ;;  %v4754_v1 = vpop.eup %3703  ;;  %v1239_v4 = vadd.f32 1.0, %v1238_v16  ;;  %v856_v7 = vsel %vm408_vm1, %v4617_v34, %v824_v59  ;;  %vm4775_vm2 = vcmp.lt.f32.partialorder %v1241_v55, 0.0004427343 }
 0x157   :  { %v1234_v62 = vsel %vm4727_vm13, %v1231_v8, %v1228_v33  ;;  %3709 = vpow2.f32 %v499_v28  ;;  %v4748_v63 = vmul.f32 100.0, %v4742_v54  ;;  %v4751_v51 = vadd.f32 %v4668_v37, %v301_v58  ;;  %1679 = vrot.lane.b32.xlu1 %v301_v58, %s4122_s13 }
 0x158   :  { %v1506_v56 = vmul.f32 0.01, %v1234_v62  ;;  %v877_v52 = vpack.c.bf16 %v856_v7, %v855_v5  ;;  %3711 = vlog2.f32 %v713_v60  ;;  %v1240_v24 = vmul.f32 %v3700_v39, %v1239_v4  ;;  %v4791_v39 = vpop.f32.mrf.mxu3 }
 0x159   :  { %vm1093_vm6 = vcmp.gt.f32.partialorder %v4748_v63, 20.0  ;;  %v4764_v45 = vmul.f32 100.0, %v4751_v51  ;;  %v4796_v38 = vmul.f32 1.442695, %v449_v13  ;;  %v4806_v33 = vadd.f32 %v4668_v37, %v4791_v39 }
 0x15a   :  { %v1538_v29 = vsel %vm1090_vm4, %v4633_v12, %v1506_v56  ;;  %v1125_v34 = vsel %vm1093_vm6, 0.0, %v4748_v63  ;;  %3463 = vmatmul.msk.bf16.gmra.mxu1 %vm919_vm12, %v877_v52  ;;  %v716_v28 = vmul.f32 -0.5, %v4705_v17  ;;  %v719_v59 = vand.u32 2147483647, %v4705_v17 }
 0x15b   :  { %v3706_v47 = vpop.eup %3705  ;;  %v1569_v61 = vpack.c.bf16 %v1538_v29, %v1537_v14  ;;  %v1161_v57 = vmul.f32 1.442695, %v1125_v34  ;;  %vm412_vm1 = vcmp.gt.f32.partialorder %v4764_v45, 20.0 }
 0x15c   :  { %v3708_v36 = vpop.eup %3707  ;;  %v1244_v0 = vadd.f32 1.0, %v3706_v47  ;;  %v1247_v12 = vmul.f32 -0.5, %v3706_v47  ;;  %v444_v2 = vsel %vm412_vm1, 0.0, %v4764_v45  ;;  %v989_v44 = vpop.f32.mrf.mxu1  ;;  %v1250_v35 = vand.u32 2147483647, %v3706_v47 }
 0x15d   :  { %v3710_v23 = vpop.eup %3709  ;;  %v1237_v26 = vmul.f32 0.6931472, %v3708_v36  ;;  %3713 = vpow2.f32 %v1161_v57  ;;  %v501_v25 = vmul.f32 1.442695, %v444_v2  ;;  %v4788_v31 = vadd.f32 %v4598_v42, %v989_v44  ;;  %3473 = vmatmul.msk.bf16.vlgmr.msrb.gmra.mxu0 %vm1725_vm14, %v1569_v61 }
 0x15e   :  { %3715 = vlog2.f32 %v1244_v0  ;;  %v1248_v32 = vadd.f32 1.0, %v1247_v12  ;;  %v731_v10 = vadd.f32 1.0, %v3710_v23  ;;  %v304_v6 = vpop.f32.mrf.mxu0  ;;  %v734_v3 = vmul.f32 -0.5, %v3710_v23  ;;  %v3712_v16 = vpop.eup %3711 }
 0x15f   :  { %v1243_v8 = vsel %vm4775_vm2, %v1240_v24, %v1237_v26  ;;  %v737_v46 = vand.u32 2147483647, %v3710_v23  ;;  %3717 = vpow2.f32 %v501_v25  ;;  %1681 = vrot.lane.b32.xlu2 %v304_v6, %s4122_s13  ;;  %v4799_v20 = vmul.f32 100.0, %v4788_v31 }
 0x160   :  { %3719 = vlog2.f32 %v731_v10  ;;  %v1507_v15 = vmul.f32 0.01, %v1243_v8  ;;  %v4802_v19 = vadd.f32 %v4668_v37, %v304_v6  ;;  %v1249_v55 = vmul.f32 %v3706_v47, %v1248_v32 }
 0x161   :  { %vm4809_vm15 = vcmp.lt.f32.partialorder %v1250_v35, 0.0004427343  ;;  %vm1094_vm4 = vcmp.gt.f32.partialorder %v4799_v20, 20.0  ;;  %v735_v62 = vadd.f32 1.0, %v734_v3  ;;  %vm4815_vm9 = vcmp.lt.f32.partialorder %v737_v46, 0.0004427343 }
 0x162   :  { %v1126_v4 = vsel %vm1094_vm4, 0.0, %v4799_v20  ;;  %v4823_v5 = vmul.f32 100.0, %v4802_v19  ;;  %v4825_v41 = vmul.f32 0.6931472, %v3712_v16  ;;  %v1539_v47 = vsel %vm1091_vm7, %v4657_v40, %v1507_v15 }
 0x163   :  { %v3714_v60 = vpop.eup %3713  ;;  %v1163_v57 = vmul.f32 1.442695, %v1126_v4  ;;  %v717_v2 = vadd.f32 1.0, %v716_v28  ;;  %vm4836_vm13 = vcmp.lt.f32.partialorder %v719_v59, 0.0004427343  ;;  %v736_v10 = vmul.f32 %v3710_v23, %v735_v62 }
 0x164   :  { %v3716_v7 = vpop.eup %3715  ;;  %v1253_v52 = vadd.f32 1.0, %v3714_v60  ;;  %v1256_v13 = vmul.f32 -0.5, %v3714_v60  ;;  %v1259_v14 = vand.u32 2147483647, %v3714_v60  ;;  %v992_v29 = vpop.f32.mrf.mxu1  ;;  %vm413_vm10 = vcmp.gt.f32.partialorder %v4823_v5, 20.0 }
 0x165   :  { %v3718_v34 = vpop.eup %3717  ;;  %v1246_v61 = vmul.f32 0.6931472, %v3716_v7  ;;  %v4832_v0 = vadd.f32 %v4598_v42, %v992_v29  ;;  %v445_v35 = vsel %vm413_vm10, 0.0, %v4823_v5  ;;  %v722_v8 = vadd.f32 1.0, %v4754_v1 }
 0x166   :  { %v3720_v36 = vpop.eup %3719  ;;  %3721 = vlog2.f32 %v1253_v52  ;;  %v740_v24 = vadd.f32 1.0, %v3718_v34  ;;  %v306_v12 = vpop.f32.mrf.mxu0  ;;  %v743_v25 = vmul.f32 -0.5, %v3718_v34  ;;  %v1257_v32 = vadd.f32 1.0, %v1256_v13 }
 0x167   :  { %v1252_v44 = vsel %vm4809_vm15, %v1249_v55, %v1246_v61  ;;  %v733_v26 = vmul.f32 0.6931472, %v3720_v36  ;;  %1683 = vrot.lane.b32.xlu0 %v306_v12, %s4122_s13  ;;  %vm4844_vm7 = vcmp.lt.f32.partialorder %v1259_v14, 0.0004427343  ;;  %v746_v46 = vand.u32 2147483647, %v3718_v34 }
 0x168   :  { %v1508_v40 = vmul.f32 0.01, %v1252_v44  ;;  %3723 = vlog2.f32 %v740_v24  ;;  %v503_v16 = vmul.f32 1.442695, %v445_v35  ;;  %v4853_v15 = vmul.f32 100.0, %v4832_v0 }
 0x169   :  { %3725 = vpow2.f32 %v1163_v57  ;;  %v739_v23 = vsel %vm4815_vm9, %v736_v10, %v733_v26  ;;  %v744_v55 = vadd.f32 1.0, %v743_v25  ;;  %v4858_v58 = vadd.f32 %v4668_v37, %v306_v12 }
 0x16a   :  { %v1540_v3 = vsel %vm1092_vm11, %v4699_v11, %v1508_v40  ;;  %v1258_v62 = vmul.f32 %v3714_v60, %v1257_v32  ;;  %3727 = vpow2.f32 %v503_v16  ;;  %vm1095_vm2 = vcmp.gt.f32.partialorder %v4853_v15, 20.0 }
 0x16b   :  { %v1570_v28 = vpack.c.bf16 %v1540_v3, %v1539_v47  ;;  %v725_v11 = vmul.f32 -0.5, %v4754_v1  ;;  %v1127_v7 = vsel %vm1095_vm2, 0.0, %v4853_v15  ;;  %v4866_v56 = vmul.f32 100.0, %v4858_v58 }
 0x16c   :  { %v3722_v59 = vpop.eup %3721  ;;  %v994_v9 = vpop.f32.mrf.mxu1  ;;  %3729 = vlog2.f32 %v722_v8  ;;  %v827_v13 = vmul.f32 0.01, %v739_v23  ;;  %vm4869_vm11 = vcmp.lt.f32.partialorder %v746_v46, 0.0004427343  ;;  %v1165_v14 = vmul.f32 1.442695, %v1127_v7 }
 0x16d   :  { %v1255_v4 = vmul.f32 0.6931472, %v3722_v59  ;;  %3474 = vmatmul.msk.bf16.gmra.mxu0 %vm1725_vm14, %v1570_v28  ;;  %v718_v29 = vmul.f32 %v4705_v17, %v717_v2  ;;  %v745_v24 = vmul.f32 %v3718_v34, %v744_v55  ;;  %vm414_vm15 = vcmp.gt.f32.partialorder %v4866_v56, 20.0 }
 0x16e   :  { %v3724_v52 = vpop.eup %3723  ;;  %v309_v47 = vpop.f32.mrf.mxu0  ;;  %v726_v2 = vadd.f32 1.0, %v725_v11  ;;  %3731 = vpow2.f32 %v1165_v14  ;;  %v446_v34 = vsel %vm414_vm15, 0.0, %v4866_v56  ;;  %v728_v25 = vand.u32 2147483647, %v4754_v1 }
 0x16f   :  { %v3726_v61 = vpop.eup %3725  ;;  %v1261_v57 = vsel %vm4844_vm7, %v1258_v62, %v1255_v4  ;;  %v742_v36 = vmul.f32 0.6931472, %v3724_v52  ;;  %1685 = vrot.lane.b32.xlu1 %v309_v47, %s4122_s13  ;;  %1689 = vrot.lane.b32.xlu0 %v4689_v43, %s4122_s13  ;;  %v721_v17 = vsel %vm4836_vm13, %v718_v29, %v4825_v41  ;;  %v4892_v35 = vadd.f32 %v4598_v42, %v994_v9 }
 0x170   :  { %v1262_v12 = vadd.f32 1.0, %v3726_v61  ;;  %v1265_v44 = vmul.f32 -0.5, %v3726_v61  ;;  %v1509_v26 = vmul.f32 0.01, %v1261_v57  ;;  %v4887_v40 = vpop.eup %3727  ;;  %v1268_v32 = vand.u32 2147483647, %v3726_v61 }
 0x171   :  { %v748_v43 = vsel %vm4869_vm11, %v745_v24, %v742_v36  ;;  %v4897_v48 = vsel %vm411_vm0, %v4713_v22, %v827_v13  ;;  %v749_v10 = vadd.f32 1.0, %v4887_v40  ;;  %v825_v6 = vmul.f32 0.01, %v721_v17 }
 0x172   :  { %3733 = vlog2.f32 %v1262_v12  ;;  %v3730_v41 = vpop.eup %3729  ;;  %v1266_v8 = vadd.f32 1.0, %v1265_v44  ;;  %v752_v3 = vmul.f32 -0.5, %v4887_v40  ;;  %v505_v46 = vmul.f32 1.442695, %v446_v34 }
 0x173   :  { %3735 = vpow2.f32 %v4796_v38  ;;  %v724_v16 = vmul.f32 0.6931472, %v3730_v41  ;;  %v4905_v23 = vsel %vm1093_vm6, %v4742_v54, %v1509_v26  ;;  %v828_v55 = vmul.f32 0.01, %v748_v43 }
 0x174   :  { %v997_v28 = vpop.f32.mrf.mxu1  ;;  %3737 = vlog2.f32 %v749_v10  ;;  %v727_v22 = vmul.f32 %v4754_v1, %v726_v2  ;;  %vm4908_vm0 = vcmp.lt.f32.partialorder %v1268_v32, 0.0004427343  ;;  %vm729_vm9 = vcmp.lt.f32.partialorder %v728_v25, 0.0004427343  ;;  %v3732_v62 = vpop.eup %3731 }
 0x175   :  { %3739 = vpow2.f32 %v505_v46  ;;  %v4913_v38 = vmul.f32 100.0, %v4892_v35  ;;  %v755_v11 = vand.u32 2147483647, %v4887_v40  ;;  %v4917_v54 = vadd.f32 %v4668_v37, %v309_v47 }
 0x176   :  { %v311_v59 = vpop.f32.mrf.mxu0  ;;  %v730_v63 = vsel %vm729_vm9, %v727_v22, %v724_v16  ;;  %v4920_v9 = vadd.f32 %v4598_v42, %v997_v28  ;;  %v1267_v4 = vmul.f32 %v3726_v61, %v1266_v8  ;;  %v753_v7 = vadd.f32 1.0, %v752_v3 }
 0x177   :  { %1687 = vrot.lane.b32.xlu2 %v311_v59, %s4122_s13  ;;  %v1271_v52 = vadd.f32 1.0, %v3732_v62  ;;  %v826_v13 = vmul.f32 0.01, %v730_v63  ;;  %1691 = vrot.lane.b32.xlu1 %v4791_v39, %s4122_s13  ;;  %v1274_v29 = vmul.f32 -0.5, %v3732_v62  ;;  %vm1096_vm6 = vcmp.gt.f32.partialorder %v4913_v38, 20.0 }
 0x178   :  { %v3734_v1 = vpop.eup %3733  ;;  %v4929_v47 = vmul.f32 100.0, %v4917_v54  ;;  %v857_v61 = vsel %vm409_vm5, %v4639_v18, %v825_v6  ;;  %v4938_v39 = vmul.f32 100.0, %v4920_v9  ;;  %v1128_v44 = vsel %vm1096_vm6, 0.0, %v4913_v38 }
 0x179   :  { %v4925_v60 = vpop.eup %3735  ;;  %v1264_v14 = vmul.f32 0.6931472, %v3734_v1  ;;  %3741 = vlog2.f32 %v1271_v52  ;;  %v858_v57 = vsel %vm410_vm8, %v4671_v50, %v826_v13  ;;  %v4949_v18 = vsel %vm412_vm1, %v4751_v51, %v828_v55 }
 0x17a   :  { %v3738_v36 = vpop.eup %3737  ;;  %v878_v12 = vpack.c.bf16 %v858_v57, %v857_v61  ;;  %vm415_vm13 = vcmp.gt.f32.partialorder %v4929_v47, 20.0  ;;  %v1167_v17 = vmul.f32 1.442695, %v1128_v44  ;;  %v754_v26 = vmul.f32 %v4887_v40, %v753_v7 }
 0x17b   :  { %v1270_v24 = vsel %vm4908_vm0, %v1267_v4, %v1264_v14  ;;  %v3740_v21 = vpop.eup %3739  ;;  %v751_v53 = vmul.f32 0.6931472, %v3738_v36  ;;  %v1275_v34 = vadd.f32 1.0, %v1274_v29  ;;  %v447_v43 = vsel %vm415_vm13, 0.0, %v4929_v47 }
 0x17c   :  { %v1510_v50 = vmul.f32 0.01, %v1270_v24  ;;  %v999_v2 = vpop.f32.mrf.mxu1  ;;  %v758_v25 = vadd.f32 1.0, %v3740_v21  ;;  %3464 = vmatmul.msk.bf16.gmra.mxu1 %vm919_vm12, %v878_v12  ;;  %v761_v51 = vmul.f32 -0.5, %v3740_v21  ;;  %3743 = vpow2.f32 %v1167_v17 }
 0x17d   :  { %v507_v32 = vmul.f32 1.442695, %v447_v43  ;;  %vm4960_vm5 = vcmp.lt.f32.partialorder %v755_v11, 0.0004427343  ;;  %v1277_v40 = vand.u32 2147483647, %v3732_v62  ;;  %v1276_v3 = vmul.f32 %v3732_v62, %v1275_v34 }
 0x17e   :  { %v1542_v45 = vsel %vm1094_vm4, %v4788_v31, %v1510_v50  ;;  %3745 = vlog2.f32 %v758_v25  ;;  %v757_v8 = vsel %vm4960_vm5, %v754_v26, %v751_v53  ;;  %vm1097_vm8 = vcmp.gt.f32.partialorder %v4938_v39, 20.0 }
 0x17f   :  { %v1571_v41 = vpack.c.bf16 %v1542_v45, %v4905_v23  ;;  %v3742_v6 = vpop.eup %3741  ;;  %3747 = vpow2.f32 %v507_v32  ;;  %v4968_v31 = vadd.f32 %v4668_v37, %v311_v59  ;;  %v764_v46 = vand.u32 2147483647, %v3740_v21 }
 0x180   :  { %v1273_v20 = vmul.f32 0.6931472, %v3742_v6  ;;  %v1129_v16 = vsel %vm1097_vm8, 0.0, %v4938_v39  ;;  %v762_v28 = vadd.f32 1.0, %v761_v51  ;;  %v4978_v22 = vadd.f32 %v4598_v42, %v999_v2 }
 0x181   :  { %3475 = vmatmul.msk.bf16.gmra.mxu0 %vm1725_vm14, %v1571_v41  ;;  %v1169_v23 = vmul.f32 1.442695, %v1129_v16  ;;  %v4975_v55 = vmul.f32 100.0, %v4968_v31  ;;  %v879_v37 = vpack.c.bf16 %v4949_v18, %v4897_v48  ;;  %v4982_v30 = vmul.f32 0.01, %v757_v8 }
 0x182   :  { %v4985_v59 = vmul.f32 100.0, %v4806_v33  ;;  %vm4987_vm1 = vcmp.lt.f32.partialorder %v1277_v40, 0.0004427343  ;;  %v3744_v11 = vpop.eup %3743  ;;  %v4995_v1 = vmul.f32 100.0, %v4978_v22  ;;  %vm4997_vm7 = vcmp.lt.f32.partialorder %v764_v46, 0.0004427343 }
 0x183   :  { %v1279_v63 = vsel %vm4987_vm1, %v1276_v3, %v1273_v20  ;;  %3749 = vpow2.f32 %v1169_v23  ;;  %vm416_vm4 = vcmp.gt.f32.partialorder %v4975_v55, 20.0  ;;  %v1280_v52 = vadd.f32 1.0, %v3744_v11 }
 0x184   :  { %v1002_v48 = vpop.f32.mrf.mxu1  ;;  %v3746_v4 = vpop.eup %3745  ;;  %v1283_v13 = vmul.f32 -0.5, %v3744_v11  ;;  %v448_v14 = vsel %vm416_vm4, 0.0, %v4975_v55  ;;  %v763_v57 = vmul.f32 %v3740_v21, %v762_v28  ;;  %vm1098_vm11 = vcmp.gt.f32.partialorder %v4995_v1, 20.0 }
 0x185   :  { %v3748_v29 = vpop.eup %3747  ;;  %v760_v61 = vmul.f32 0.6931472, %v3746_v4  ;;  %v509_v36 = vmul.f32 1.442695, %v448_v14  ;;  %v1511_v24 = vmul.f32 0.01, %v1279_v63  ;;  %3751 = vlog2.f32 %v1280_v52 }
 0x186   :  { %v767_v12 = vadd.f32 1.0, %v3748_v29  ;;  %vm418_vm0 = vcmp.gt.f32.partialorder %v4985_v59, 20.0  ;;  %v1284_v18 = vadd.f32 1.0, %v1283_v13  ;;  %v1286_v50 = vand.u32 2147483647, %v3744_v11 }
 0x187   :  { %v766_v44 = vsel %vm4997_vm7, %v763_v57, %v760_v61  ;;  %3753 = vpow2.f32 %v509_v36  ;;  %v770_v53 = vmul.f32 -0.5, %v3748_v29  ;;  %v773_v17 = vand.u32 2147483647, %v3748_v29 }
 0x188   :  { %3755 = vlog2.f32 %v767_v12  ;;  %v1130_v21 = vsel %vm1098_vm11, 0.0, %v4995_v1  ;;  %v5012_v34 = vadd.f32 %v4598_v42, %v1002_v48  ;;  %v450_v25 = vsel %vm418_vm0, 0.0, %v4985_v59 }
 0x189   :  { %v3750_v2 = vpop.eup %3749  ;;  %v1171_v26 = vmul.f32 1.442695, %v1130_v21  ;;  %v785_v43 = vadd.f32 1.0, %v4925_v60  ;;  %v1543_v45 = vsel %vm1095_vm2, %v4832_v0, %v1511_v24  ;;  %v830_v51 = vmul.f32 0.01, %v766_v44 }
 0x18a   :  { %v1289_v32 = vadd.f32 1.0, %v3750_v2  ;;  %v1292_v41 = vmul.f32 -0.5, %v3750_v2  ;;  %v1285_v10 = vmul.f32 %v3744_v11, %v1284_v18  ;;  %vm5021_vm9 = vcmp.lt.f32.partialorder %v1286_v50, 0.0004427343 }
 0x18b   :  { %3757 = vpow2.f32 %v1171_v26  ;;  %v5026_v6 = vmul.f32 100.0, %v5012_v34  ;;  %v3752_v20 = vpop.eup %3751  ;;  %v771_v3 = vadd.f32 1.0, %v770_v53  ;;  %vm5028_vm5 = vcmp.lt.f32.partialorder %v773_v17, 0.0004427343 }
 0x18c   :  { %v1004_v8 = vpop.f32.mrf.mxu1  ;;  %3759 = vlog2.f32 %v1289_v32  ;;  %3465 = vmatmul.msk.bf16.gmra.mxu1 %vm919_vm12, %v879_v37  ;;  %v1282_v16 = vmul.f32 0.6931472, %v3752_v20  ;;  %v1293_v28 = vadd.f32 1.0, %v1292_v41  ;;  %v513_v23 = vmul.f32 1.442695, %v450_v25 }
 0x18d   :  { %v5034_v0 = vadd.f32 %v4598_v42, %v1004_v8  ;;  %v3754_v15 = vpop.eup %3753  ;;  %vm1099_vm2 = vcmp.gt.f32.partialorder %v5026_v6, 20.0  ;;  %v5040_v11 = vsel %vm414_vm15, %v4858_v58, %v830_v51  ;;  %3761 = vlog2.f32 %v785_v43 }
 0x18e   :  { %v3756_v62 = vpop.eup %3755  ;;  %v776_v63 = vadd.f32 1.0, %v3754_v15  ;;  %v779_v48 = vmul.f32 -0.5, %v3754_v15  ;;  %v1288_v37 = vsel %vm5021_vm9, %v1285_v10, %v1282_v16  ;;  %v1131_v7 = vsel %vm1099_vm2, 0.0, %v5026_v6 }
 0x18f   :  { %v769_v4 = vmul.f32 0.6931472, %v3756_v62  ;;  %v5048_v52 = vmul.f32 100.0, %v5034_v0  ;;  %v1512_v13 = vmul.f32 0.01, %v1288_v37  ;;  %v772_v14 = vmul.f32 %v3748_v29, %v771_v3 }
 0x190   :  { %v1295_v61 = vand.u32 2147483647, %v3750_v2  ;;  %3763 = vlog2.f32 %v776_v63  ;;  %v1294_v56 = vmul.f32 %v3750_v2, %v1293_v28  ;;  %v1173_v57 = vmul.f32 1.442695, %v1131_v7 }
 0x191   :  { %v3758_v58 = vpop.eup %3757  ;;  %vm1100_vm15 = vcmp.gt.f32.partialorder %v5048_v52, 20.0  ;;  %3765 = vpow2.f32 %v513_v23  ;;  %v1544_v24 = vsel %vm1096_vm6, %v4892_v35, %v1512_v13  ;;  %v780_v12 = vadd.f32 1.0, %v779_v48 }
 0x192   :  { %v3760_v36 = vpop.eup %3759  ;;  %v782_v44 = vand.u32 2147483647, %v3754_v15  ;;  %v1298_v18 = vadd.f32 1.0, %v3758_v58  ;;  %v1572_v50 = vpack.c.bf16 %v1544_v24, %v1543_v45  ;;  %v775_v29 = vsel %vm5028_vm5, %v772_v14, %v769_v4 }
 0x193   :  { %v1291_v53 = vmul.f32 0.6931472, %v3760_v36  ;;  %v1301_v17 = vmul.f32 -0.5, %v3758_v58  ;;  %v3762_v2 = vpop.eup %3761  ;;  %v1304_v26 = vand.u32 2147483647, %v3758_v58  ;;  %v1132_v25 = vsel %vm1100_vm15, 0.0, %v5048_v52 }
 0x194   :  { %v1007_v21 = vpop.f32.mrf.mxu1  ;;  %3767 = vlog2.f32 %v1298_v18  ;;  %v861_v35 = vsel %vm413_vm10, %v4802_v19, %v4982_v30  ;;  %vm5066_vm6 = vcmp.lt.f32.partialorder %v1295_v61, 0.0004427343  ;;  %3476 = vmatmul.msk.bf16.gmra.mxu0 %vm1725_vm14, %v1572_v50  ;;  %v788_v45 = vmul.f32 -0.5, %v4925_v60 }
 0x195   :  { %v5060_v38 = vadd.f32 %v4598_v42, %v1007_v21  ;;  %3769 = vpow2.f32 %v1173_v57  ;;  %v831_v32 = vmul.f32 0.01, %v775_v29  ;;  %v1297_v41 = vsel %vm5066_vm6, %v1294_v56, %v1291_v53 }
 0x196   :  { %v3764_v51 = vpop.eup %3763  ;;  %v1175_v10 = vmul.f32 1.442695, %v1132_v25  ;;  %v880_v19 = vpack.c.bf16 %v5040_v11, %v861_v35  ;;  %v781_v8 = vmul.f32 %v3754_v15, %v780_v12  ;;  %v1302_v20 = vadd.f32 1.0, %v1301_v17 }
 0x197   :  { %v5075_v40 = vmul.f32 100.0, %v5060_v38  ;;  %v3766_v5 = vpop.eup %3765  ;;  %v778_v30 = vmul.f32 0.6931472, %v3764_v51  ;;  %vm783_vm10 = vcmp.lt.f32.partialorder %v782_v44, 0.0004427343  ;;  %v863_v15 = vsel %vm415_vm13, %v4917_v54, %v831_v32 }
 0x198   :  { %vm5078_vm1 = vcmp.lt.f32.partialorder %v1304_v26, 0.0004427343  ;;  %3771 = vpow2.f32 %v1175_v10  ;;  %v1513_v46 = vmul.f32 0.01, %v1297_v41  ;;  %v794_v23 = vadd.f32 1.0, %v3766_v5 }
 0x199   :  { %vm1101_vm7 = vcmp.gt.f32.partialorder %v5075_v40, 20.0  ;;  %v784_v16 = vsel %vm783_vm10, %v781_v8, %v778_v30  ;;  %v789_v48 = vadd.f32 1.0, %v788_v45  ;;  %v1303_v7 = vmul.f32 %v3758_v58, %v1302_v20  ;;  %v5128_v8 = vld [vmem:[%s6803_s4] ss:$0 sm:$0xff] }
 0x19a   :  { %v1133_v28 = vsel %vm1101_vm7, 0.0, %v5075_v40  ;;  %v3768_v62 = vpop.eup %3767  ;;  %v832_v11 = vmul.f32 0.01, %v784_v16  ;;  %v791_v14 = vand.u32 2147483647, %v4925_v60  ;;  %3773 = vlog2.f32 %v794_v23 }
 0x19b   :  { %v1177_v63 = vmul.f32 1.442695, %v1133_v28  ;;  %v3770_v37 = vpop.eup %3769  ;;  %v1300_v4 = vmul.f32 0.6931472, %v3768_v62  ;;  %v797_v47 = vmul.f32 -0.5, %v3766_v5  ;;  %v790_v29 = vmul.f32 %v4925_v60, %v789_v48 }
 0x19c   :  { %v1009_v13 = vpop.f32.mrf.mxu1  ;;  %v864_v61 = vsel %vm416_vm4, %v4968_v31, %v832_v11  ;;  %v1307_v56 = vadd.f32 1.0, %v3770_v37  ;;  %v1310_v57 = vmul.f32 -0.5, %v3770_v37  ;;  %3466 = vmatmul.msk.bf16.gmra.mxu1 %vm919_vm12, %v880_v19  ;;  %v787_v44 = vmul.f32 0.6931472, %v3762_v2 }
 0x19d   :  { %v881_v54 = vpack.c.bf16 %v864_v61, %v863_v15  ;;  %v1306_v36 = vsel %vm5078_vm1, %v1303_v7, %v1300_v4  ;;  %3775 = vpow2.f32 %v1177_v63  ;;  %v5097_v58 = vadd.f32 %v4598_v42, %v1009_v13 }
 0x19e   :  { %v3772_v24 = vpop.eup %3771  ;;  %v1514_v12 = vmul.f32 0.01, %v1306_v36  ;;  %3777 = vlog2.f32 %v1307_v56  ;;  %v800_v18 = vand.u32 2147483647, %v3766_v5  ;;  %v1545_v31 = vsel %vm1097_vm8, %v4920_v9, %v1513_v46 }
 0x19f   :  { %v1316_v55 = vadd.f32 1.0, %v3772_v24  ;;  %3467 = vmatmul.msk.bf16.vlgmr.msrb.gmra.mxu3 %vm919_vm12, %v881_v54  ;;  %v5104_v50 = vmul.f32 100.0, %v5097_v58  ;;  %v1319_v53 = vmul.f32 -0.5, %v3772_v24  ;;  %vm5110_vm13 = vcmp.lt.f32.partialorder %v791_v14, 0.0004427343 }
 0x1a0   :  { %v1546_v42 = vsel %vm1098_vm11, %v4978_v22, %v1514_v12  ;;  %v798_v21 = vadd.f32 1.0, %v797_v47  ;;  %v3774_v39 = vpop.eup %3773  ;;  %v1311_v2 = vadd.f32 1.0, %v1310_v57  ;;  %v1313_v26 = vand.u32 2147483647, %v3770_v37 }
 0x1a1   :  { %v1573_v9 = vpack.c.bf16 %v1546_v42, %v1545_v31  ;;  %3779 = vlog2.f32 %v1316_v55  ;;  %vm1102_vm8 = vcmp.gt.f32.partialorder %v5104_v50, 20.0  ;;  %v796_v25 = vmul.f32 0.6931472, %v3774_v39 }
 0x1a2   :  { %v799_v35 = vmul.f32 %v3766_v5, %v798_v21  ;;  %vm5115_vm4 = vcmp.lt.f32.partialorder %v800_v18, 0.0004427343  ;;  %v1134_v1 = vsel %vm1102_vm8, 0.0, %v5104_v50  ;;  %v793_v45 = vsel %vm5110_vm13, %v790_v29, %v787_v44 }
 0x1a3   :  { %v3776_v22 = vpop.eup %3775  ;;  %v1320_v32 = vadd.f32 1.0, %v1319_v53  ;;  %v1322_v41 = vand.u32 2147483647, %v3772_v24  ;;  %v1179_v19 = vmul.f32 1.442695, %v1134_v1  ;;  %v1312_v5 = vmul.f32 %v3770_v37, %v1311_v2 }
 0x1a4   :  { %v1012_v43 = vpop.f32.mrf.mxu1  ;;  %v3778_v51 = vpop.eup %3777  ;;  %v1325_v10 = vadd.f32 1.0, %v3776_v22  ;;  %3477 = vmatmul.msk.bf16.gmra.mxu0 %vm1725_vm14, %v1573_v9  ;;  %v802_v3 = vsel %vm5115_vm4, %v799_v35, %v796_v25  ;;  %vm1314_vm11 = vcmp.lt.f32.partialorder %v1313_v26, 0.0004427343  ;;  %v833_v46 = vmul.f32 0.01, %v793_v45 }
 0x1a5   :  { %v1309_v30 = vmul.f32 0.6931472, %v3778_v51  ;;  %v5131_v20 = vadd.f32 %v5128_v8, %v1012_v43  ;;  %v834_v16 = vmul.f32 0.01, %v802_v3  ;;  %3781 = vpow2.f32 %v1179_v19 }
 0x1a6   :  { %v1321_v11 = vmul.f32 %v3772_v24, %v1320_v32  ;;  %3783 = vlog2.f32 %v1325_v10  ;;  %vm1323_vm9 = vcmp.lt.f32.partialorder %v1322_v41, 0.0004427343  ;;  %v865_v4 = vsel %vm417_vm3, %v4696_v49, %v833_v46 }
 0x1a7   :  { %v3780_v28 = vpop.eup %3779  ;;  %v1315_v23 = vsel %vm1314_vm11, %v1312_v5, %v1309_v30  ;;  %v5136_v62 = vmul.f32 100.0, %v5131_v20  ;;  %v866_v7 = vsel %vm418_vm0, %v4806_v33, %v834_v16  ;;  %v1328_v14 = vmul.f32 -0.5, %v3776_v22 }
 0x1a8   :  { %v1318_v15 = vmul.f32 0.6931472, %v3780_v28  ;;  %v1515_v63 = vmul.f32 0.01, %v1315_v23  ;;  %v882_v27 = vpack.c.bf16 %v866_v7, %v865_v4  ;;  %v1331_v18 = vand.u32 2147483647, %v3776_v22 }
 0x1a9   :  { %vm1103_vm5 = vcmp.gt.f32.partialorder %v5136_v62, 20.0  ;;  %v1329_v24 = vadd.f32 1.0, %v1328_v14 }
 0x1aa   :  { %v1324_v48 = vsel %vm1323_vm9, %v1321_v11, %v1318_v15  ;;  %v1135_v37 = vsel %vm1103_vm5, 0.0, %v5136_v62  ;;  %v1547_v54 = vsel %vm1099_vm2, %v5012_v34, %v1515_v63  ;;  %vm1332_vm0 = vcmp.lt.f32.partialorder %v1331_v18, 0.0004427343 }
 0x1ab   :  { %v1516_v13 = vmul.f32 0.01, %v1324_v48  ;;  %v1181_v61 = vmul.f32 1.442695, %v1135_v37  ;;  %v3782_v47 = vpop.eup %3781  ;;  %v1330_v52 = vmul.f32 %v3776_v22, %v1329_v24 }
 0x1ac   :  { %v1014_v56 = vpop.f32.mrf.mxu1  ;;  %v3784_v59 = vpop.eup %3783  ;;  %v1334_v36 = vadd.f32 1.0, %v3782_v47  ;;  %v1337_v12 = vmul.f32 -0.5, %v3782_v47  ;;  %v1340_v42 = vand.u32 2147483647, %v3782_v47 }
 0x1ad   :  { %v5149_v57 = vadd.f32 %v5128_v8, %v1014_v56  ;;  %v1548_v49 = vsel %vm1100_vm15, %v5034_v0, %v1516_v13  ;;  %3785 = vpow2.f32 %v1181_v61  ;;  %v1327_v34 = vmul.f32 0.6931472, %v3784_v59 }
 0x1ae   :  { %v1574_v33 = vpack.c.bf16 %v1548_v49, %v1547_v54  ;;  %3787 = vlog2.f32 %v1334_v36  ;;  %v1338_v31 = vadd.f32 1.0, %v1337_v12  ;;  %vm1341_vm2 = vcmp.lt.f32.partialorder %v1340_v42, 0.0004427343 }
 0x1af   :  { %3468 = vmatmul.msk.bf16.gmra.mxu3 %vm919_vm12, %v882_v27  ;;  %v5159_v44 = vmul.f32 100.0, %v5149_v57  ;;  %v1333_v21 = vsel %vm1332_vm0, %v1330_v52, %v1327_v34 }
 0x1b0   :  { %3478 = vmatmul.msk.bf16.vlgmr.msrb.gmra.mxu1 %vm1725_vm14, %v1574_v33  ;;  %v1339_v26 = vmul.f32 %v3782_v47, %v1338_v31  ;;  %v1517_v25 = vmul.f32 0.01, %v1333_v21 }
 0x1b1   :  { %vm1104_vm3 = vcmp.gt.f32.partialorder %v5159_v44, 20.0 }
 0x1b2   :  { %v1136_v6 = vsel %vm1104_vm3, 0.0, %v5159_v44  ;;  %v1549_v32 = vsel %vm1101_vm7, %v5060_v38, %v1517_v25 }
 0x1b3   :  { %v3786_v0 = vpop.eup %3785  ;;  %v1183_v55 = vmul.f32 1.442695, %v1136_v6 }
 0x1b4   :  { %v1017_v29 = vpop.f32.mrf.mxu1  ;;  %v1343_v53 = vadd.f32 1.0, %v3786_v0  ;;  %v3788_v39 = vpop.eup %3787  ;;  %v1346_v1 = vmul.f32 -0.5, %v3786_v0  ;;  %v1349_v16 = vand.u32 2147483647, %v3786_v0 }
 0x1b5   :  { %v5167_v17 = vadd.f32 %v5128_v8, %v1017_v29  ;;  %3789 = vpow2.f32 %v1183_v55  ;;  %v1336_v2 = vmul.f32 0.6931472, %v3788_v39 }
 0x1b6   :  { %3791 = vlog2.f32 %v1343_v53  ;;  %v1347_v46 = vadd.f32 1.0, %v1346_v1  ;;  %vm1350_vm10 = vcmp.lt.f32.partialorder %v1349_v16, 0.0004427343 }
 0x1b7   :  { %v5170_v9 = vmul.f32 100.0, %v5167_v17  ;;  %v1342_v35 = vsel %vm1341_vm2, %v1339_v26, %v1336_v2 }
 0x1b8   :  { %v1518_v22 = vmul.f32 0.01, %v1342_v35 }
 0x1b9   :  { %vm1105_vm15 = vcmp.gt.f32.partialorder %v5170_v9, 20.0 }
 0x1ba   :  { %v1137_v60 = vsel %vm1105_vm15, 0.0, %v5170_v9  ;;  %v1550_v41 = vsel %vm1102_vm8, %v5097_v58, %v1518_v22  ;;  %v1348_v58 = vmul.f32 %v3786_v0, %v1347_v46 }
 0x1bb   :  { %v1185_v43 = vmul.f32 1.442695, %v1137_v60  ;;  %v3790_v45 = vpop.eup %3789  ;;  %v1575_v30 = vpack.c.bf16 %v1550_v41, %v1549_v32  ;;  %v1630_v60 = vpop.permute.xlu0 %1629 }
 0x1bc   :  { %v1019_v51 = vpop.f32.mrf.mxu1  ;;  %v1352_v10 = vadd.f32 1.0, %v3790_v45  ;;  %v3792_v19 = vpop.eup %3791  ;;  %v1355_v5 = vmul.f32 -0.5, %v3790_v45  ;;  %v1358_v50 = vand.u32 2147483647, %v3790_v45 }
 0x1bd   :  { %3793 = vpow2.f32 %v1185_v43  ;;  %v5183_v3 = vadd.f32 %v5128_v8, %v1019_v51  ;;  %v1345_v40 = vmul.f32 0.6931472, %v3792_v19 }
 0x1be   :  { %3795 = vlog2.f32 %v1352_v10  ;;  %v1356_v38 = vadd.f32 1.0, %v1355_v5  ;;  %vm1359_vm1 = vcmp.lt.f32.partialorder %v1358_v50, 0.0004427343  ;;  %v5226_v10 = vld [vmem:[%s6804_s6] ss:$0 sm:$0xff] }
 0x1bf   :  { %v5186_v28 = vmul.f32 100.0, %v5183_v3  ;;  %v1351_v48 = vsel %vm1350_vm10, %v1348_v58, %v1345_v40 }
 0x1c0   :  { %3479 = vmatmul.msk.bf16.gmra.mxu1 %vm1725_vm14, %v1575_v30  ;;  %v1357_v13 = vmul.f32 %v3790_v45, %v1356_v38  ;;  %v1519_v61 = vmul.f32 0.01, %v1351_v48 }
 0x1c1   :  { %vm1106_vm6 = vcmp.gt.f32.partialorder %v5186_v28, 20.0 }
 0x1c2   :  { %v1138_v23 = vsel %vm1106_vm6, 0.0, %v5186_v28  ;;  %v1551_v36 = vsel %vm1103_vm5, %v5131_v20, %v1519_v61 }
 0x1c3   :  { %v3794_v15 = vpop.eup %3793  ;;  %v1187_v11 = vmul.f32 1.442695, %v1138_v23 }
 0x1c4   :  { %v3796_v63 = vpop.eup %3795  ;;  %v1361_v37 = vadd.f32 1.0, %v3794_v15  ;;  %v1022_v4 = vpop.f32.mrf.mxu1  ;;  %v1364_v27 = vmul.f32 -0.5, %v3794_v15  ;;  %v1367_v52 = vand.u32 2147483647, %v3794_v15 }
 0x1c5   :  { %v1354_v7 = vmul.f32 0.6931472, %v3796_v63  ;;  %3797 = vpow2.f32 %v1187_v11  ;;  %v5194_v14 = vadd.f32 %v5128_v8, %v1022_v4 }
 0x1c6   :  { %3799 = vlog2.f32 %v1361_v37  ;;  %vm1368_vm8 = vcmp.lt.f32.partialorder %v1367_v52, 0.0004427343  ;;  %v1632_v37 = vpop.permute.xlu0 %1631 }
 0x1c7   :  { %v1360_v56 = vsel %vm1359_vm1, %v1357_v13, %v1354_v7  ;;  %v5197_v47 = vmul.f32 100.0, %v5194_v14 }
 0x1c8   :  { %v1520_v54 = vmul.f32 0.01, %v1360_v56 }
 0x1c9   :  { %vm1107_vm7 = vcmp.gt.f32.partialorder %v5197_v47, 20.0 }
 0x1ca   :  { %v1552_v49 = vsel %vm1104_vm3, %v5149_v57, %v1520_v54  ;;  %v1139_v59 = vsel %vm1107_vm7, 0.0, %v5197_v47  ;;  %v1365_v57 = vadd.f32 1.0, %v1364_v27 }
 0x1cb   :  { %v3798_v33 = vpop.eup %3797  ;;  %v1189_v24 = vmul.f32 1.442695, %v1139_v59  ;;  %v1576_v12 = vpack.c.bf16 %v1552_v49, %v1551_v36 }
 0x1cc   :  { %v1370_v18 = vadd.f32 1.0, %v3798_v33  ;;  %v1024_v34 = vpop.f32.mrf.mxu1  ;;  %v3800_v6 = vpop.eup %3799  ;;  %v1373_v0 = vmul.f32 -0.5, %v3798_v33  ;;  %v1366_v62 = vmul.f32 %v3794_v15, %v1365_v57  ;;  %v1376_v29 = vand.u32 2147483647, %v3798_v33 }
 0x1cd   :  { %3801 = vpow2.f32 %v1189_v24  ;;  %v5210_v44 = vadd.f32 %v5128_v8, %v1024_v34  ;;  %v1363_v55 = vmul.f32 0.6931472, %v3800_v6  ;;  %v1634_v57 = vpop.permute.xlu1 %1633 }
 0x1ce   :  { %3803 = vlog2.f32 %v1370_v18  ;;  %v1374_v20 = vadd.f32 1.0, %v1373_v0  ;;  %vm1377_vm4 = vcmp.lt.f32.partialorder %v1376_v29, 0.0004427343 }
 0x1cf   :  { %v5213_v31 = vmul.f32 100.0, %v5210_v44  ;;  %v1369_v2 = vsel %vm1368_vm8, %v1366_v62, %v1363_v55 }
 0x1d0   :  { %3480 = vmatmul.msk.bf16.gmra.mxu1 %vm1725_vm14, %v1576_v12  ;;  %v1375_v35 = vmul.f32 %v3798_v33, %v1374_v20  ;;  %v1521_v22 = vmul.f32 0.01, %v1369_v2 }
 0x1d1   :  { %vm1108_vm13 = vcmp.gt.f32.partialorder %v5213_v31, 20.0 }
 0x1d2   :  { %v1140_v42 = vsel %vm1108_vm13, 0.0, %v5213_v31  ;;  %v1553_v16 = vsel %vm1105_vm15, %v5167_v17, %v1521_v22 }
 0x1d3   :  { %v3802_v53 = vpop.eup %3801  ;;  %v1191_v21 = vmul.f32 1.442695, %v1140_v42 }
 0x1d4   :  { %v3804_v39 = vpop.eup %3803  ;;  %v1379_v26 = vadd.f32 1.0, %v3802_v53  ;;  %v1382_v32 = vmul.f32 -0.5, %v3802_v53  ;;  %v1385_v11 = vand.u32 2147483647, %v3802_v53 }
 0x1d5   :  { %v1372_v25 = vmul.f32 0.6931472, %v3804_v39  ;;  %3805 = vpow2.f32 %v1191_v21 }
 0x1d6   :  { %3807 = vlog2.f32 %v1379_v26  ;;  %v1383_v50 = vadd.f32 1.0, %v1382_v32  ;;  %vm1386_vm5 = vcmp.lt.f32.partialorder %v1385_v11, 0.0004427343  ;;  %v3580_v26 = vld [vmem:[%s6805_s7 + $0x18] sm:$0xff] }
 0x1d7   :  { %v1378_v1 = vsel %vm1377_vm4, %v1375_v35, %v1372_v25  ;;  %v1027_v43 = vpop.f32.mrf.mxu1  ;;  %2522 = vmatpush.bf16.msra.mxu3 %v3580_v26 }
 0x1d8   :  { %v1522_v45 = vmul.f32 0.01, %v1378_v1  ;;  %v5221_v51 = vadd.f32 %v5128_v8, %v1027_v43  ;;  %v1384_v4 = vmul.f32 %v3802_v53, %v1383_v50  ;;  %v3579_v50 = vld [vmem:[%s6805_s7 + $0x10] sm:$0xff] }
 0x1da   :  { %v1790_v41 = vpop.f32.mrf.mxu0  ;;  %v1554_v19 = vsel %vm1106_vm6, %v5183_v3, %v1522_v45  ;;  %v5232_v30 = vmul.f32 100.0, %v5221_v51 }
 0x1db   :  { %v1791_v5 = vadd.f32 %v1790_v41, %v1630_v60  ;;  %v3806_v46 = vpop.eup %3805  ;;  %v1577_v40 = vpack.c.bf16 %v1554_v19, %v1553_v16  ;;  %2523 = vmatpush.bf16.msra.mxu3 %v3579_v50 }
 0x1dc   :  { %v1388_v38 = vadd.f32 1.0, %v3806_v46  ;;  %vm1109_vm11 = vcmp.gt.f32.partialorder %v5232_v30, 20.0  ;;  %v3808_v58 = vpop.eup %3807  ;;  %v1391_v23 = vmul.f32 -0.5, %v3806_v46  ;;  %v1394_v61 = vand.u32 2147483647, %v3806_v46 }
 0x1dd   :  { %v1141_v3 = vsel %vm1109_vm11, 0.0, %v5232_v30  ;;  %v5242_v28 = vadd.f32 %v5226_v10, %v1791_v5  ;;  %v1381_v63 = vmul.f32 0.6931472, %v3808_v58 }
 0x1de   :  { %3809 = vlog2.f32 %v1388_v38  ;;  %v1193_v15 = vmul.f32 1.442695, %v1141_v3  ;;  %v1392_v7 = vadd.f32 1.0, %v1391_v23  ;;  %vm1395_vm0 = vcmp.lt.f32.partialorder %v1394_v61, 0.0004427343 }
 0x1df   :  { %v5245_v9 = vmul.f32 100.0, %v5242_v28  ;;  %v1029_v17 = vpop.f32.mrf.mxu1  ;;  %v1387_v33 = vsel %vm1386_vm5, %v1384_v4, %v1381_v63 }
 0x1e0   :  { %3811 = vpow2.f32 %v1193_v15  ;;  %v5248_v48 = vadd.f32 %v5128_v8, %v1029_v17  ;;  %3481 = vmatmul.msk.bf16.gmra.mxu1 %vm1725_vm14, %v1577_v40  ;;  %v1393_v12 = vmul.f32 %v3806_v46, %v1392_v7  ;;  %v1523_v52 = vmul.f32 0.01, %v1387_v33 }
 0x1e1   :  { %vm1938_vm9 = vcmp.gt.f32.partialorder %v5245_v9, 20.0 }
 0x1e2   :  { %v1792_v13 = vpop.f32.mrf.mxu0  ;;  %v1970_v56 = vsel %vm1938_vm9, 0.0, %v5245_v9  ;;  %v5256_v54 = vmul.f32 100.0, %v5248_v48  ;;  %v1555_v35 = vsel %vm1107_vm7, %v5194_v14, %v1523_v52  ;;  %v1636_v14 = vpop.permute.xlu1 %1635 }
 0x1e3   :  { %v1793_v49 = vadd.f32 %v1792_v13, %v1632_v37  ;;  %v2002_v27 = vmul.f32 1.442695, %v1970_v56 }
 0x1e4   :  { %v3810_v59 = vpop.eup %3809  ;;  %vm1110_vm3 = vcmp.gt.f32.partialorder %v5256_v54, 20.0 }
 0x1e5   :  { %v5260_v36 = vadd.f32 %v5226_v10, %v1793_v49  ;;  %v1390_v24 = vmul.f32 0.6931472, %v3810_v59  ;;  %3813 = vpow2.f32 %v2002_v27  ;;  %v1142_v18 = vsel %vm1110_vm3, 0.0, %v5256_v54 }
 0x1e6   :  { %v3812_v34 = vpop.eup %3811  ;;  %v1195_v6 = vmul.f32 1.442695, %v1142_v18 }
 0x1e7   :  { %v5266_v0 = vmul.f32 100.0, %v5260_v36  ;;  %v1396_v55 = vsel %vm1395_vm0, %v1393_v12, %v1390_v24  ;;  %v1397_v20 = vadd.f32 1.0, %v3812_v34  ;;  %v1400_v21 = vmul.f32 -0.5, %v3812_v34 }
 0x1e8   :  { %v1524_v62 = vmul.f32 0.01, %v1396_v55  ;;  %3815 = vpow2.f32 %v1195_v6  ;;  %v1403_v45 = vand.u32 2147483647, %v3812_v34 }
 0x1e9   :  { %vm1939_vm2 = vcmp.gt.f32.partialorder %v5266_v0, 20.0  ;;  %3817 = vlog2.f32 %v1397_v20  ;;  %v1401_v31 = vadd.f32 1.0, %v1400_v21 }
 0x1ea   :  { %v1971_v29 = vsel %vm1939_vm2, 0.0, %v5266_v0  ;;  %v1795_v42 = vpop.f32.mrf.mxu0  ;;  %v1556_v53 = vsel %vm1108_vm13, %v5210_v44, %v1524_v62  ;;  %vm5295_vm6 = vcmp.lt.f32.partialorder %v1403_v45, 0.0004427343 }
 0x1eb   :  { %v2004_v39 = vmul.f32 1.442695, %v1971_v29  ;;  %v1796_v2 = vadd.f32 %v1795_v42, %v1634_v57  ;;  %v3814_v25 = vpop.eup %3813  ;;  %v1578_v60 = vpack.c.bf16 %v1556_v53, %v1555_v35  ;;  %v1402_v40 = vmul.f32 %v3812_v34, %v1401_v31  ;;  %v3578_v29 = vld [vmem:[%s6805_s7 + $0x8] sm:$0xff]  ;;  %v1638_v53 = vpop.permute.xlu2 %1637  ;;  %v3577_v35 = vld [vmem:[%s6805_s7] sm:$0xff] }
 0x1ec   :  { %v2066_v22 = vadd.f32 1.0, %v3814_v25  ;;  %v2069_v32 = vmul.f32 -0.5, %v3814_v25  ;;  %v2072_v7 = vand.u32 2147483647, %v3814_v25  ;;  %2524 = vmatpush.bf16.msra.mxu3 %v3578_v29 }
 0x1ed   :  { %3819 = vpow2.f32 %v2004_v39  ;;  %v5282_v1 = vadd.f32 %v5226_v10, %v1796_v2 }
 0x1ee   :  { %v3816_v44 = vpop.eup %3815  ;;  %3821 = vlog2.f32 %v2066_v22  ;;  %v2070_v3 = vadd.f32 1.0, %v2069_v32  ;;  %vm5308_vm1 = vcmp.lt.f32.partialorder %v2072_v7, 0.0004427343 }
 0x1ef   :  { %v3818_v43 = vpop.eup %3817  ;;  %v1406_v41 = vadd.f32 1.0, %v3816_v44  ;;  %v5285_v19 = vmul.f32 100.0, %v5282_v1  ;;  %v1409_v47 = vmul.f32 -0.5, %v3816_v44  ;;  %v1412_v13 = vand.u32 2147483647, %v3816_v44 }
 0x1f0   :  { %v1399_v5 = vmul.f32 0.6931472, %v3818_v43  ;;  %3482 = vmatmul.msk.bf16.gmra.mxu1 %vm1725_vm14, %v1578_v60  ;;  %v2071_v33 = vmul.f32 %v3814_v25, %v2070_v3  ;;  %2525 = vmatpush.bf16.msra.mxu3 %v3577_v35 }
 0x1f1   :  { %3823 = vlog2.f32 %v1406_v41  ;;  %vm1940_vm15 = vcmp.gt.f32.partialorder %v5285_v19, 20.0  ;;  %v1410_v63 = vadd.f32 1.0, %v1409_v47  ;;  %vm1413_vm7 = vcmp.lt.f32.partialorder %v1412_v13, 0.0004427343 }
 0x1f2   :  { %v1797_v46 = vpop.f32.mrf.mxu0  ;;  %v1972_v38 = vsel %vm1940_vm15, 0.0, %v5285_v19  ;;  %v1405_v17 = vsel %vm5295_vm6, %v1402_v40, %v1399_v5 }
 0x1f3   :  { %v3820_v16 = vpop.eup %3819  ;;  %v1798_v58 = vadd.f32 %v1797_v46, %v1636_v14  ;;  %v2006_v61 = vmul.f32 1.442695, %v1972_v38  ;;  %v1525_v59 = vmul.f32 0.01, %v1405_v17  ;;  %v1411_v12 = vmul.f32 %v3816_v44, %v1410_v63 }
 0x1f4   :  { %v2075_v15 = vadd.f32 1.0, %v3820_v16  ;;  %v3822_v11 = vpop.eup %3821  ;;  %v2078_v37 = vmul.f32 -0.5, %v3820_v16  ;;  %v2081_v6 = vand.u32 2147483647, %v3820_v16 }
 0x1f5   :  { %v5302_v4 = vadd.f32 %v5226_v10, %v1798_v58  ;;  %v2068_v56 = vmul.f32 0.6931472, %v3822_v11  ;;  %v1557_v39 = vsel %vm1109_vm11, %v5221_v51, %v1525_v59 }
 0x1f6   :  { %3825 = vlog2.f32 %v2075_v15  ;;  %v2079_v18 = vadd.f32 1.0, %v2078_v37  ;;  %vm2082_vm13 = vcmp.lt.f32.partialorder %v2081_v6, 0.0004427343 }
 0x1f7   :  { %v5305_v49 = vmul.f32 100.0, %v5302_v4  ;;  %v3824_v27 = vpop.eup %3823  ;;  %3827 = vpow2.f32 %v2006_v61  ;;  %v2074_v52 = vsel %vm5308_vm1, %v2071_v33, %v2068_v56 }
 0x1f8   :  { %v1408_v24 = vmul.f32 0.6931472, %v3824_v27  ;;  %v2080_v26 = vmul.f32 %v3820_v16, %v2079_v18  ;;  %v2354_v60 = vmul.f32 0.01, %v2074_v52 }
 0x1f9   :  { %vm1941_vm10 = vcmp.gt.f32.partialorder %v5305_v49, 20.0  ;;  %v1032_v57 = vpop.f32.mrf.mxu1 }
 0x1fa   :  { %v1414_v55 = vsel %vm1413_vm7, %v1411_v12, %v1408_v24  ;;  %v5315_v20 = vadd.f32 %v5128_v8, %v1032_v57  ;;  %v1973_v62 = vsel %vm1941_vm10, 0.0, %v5305_v49 }
 0x1fb   :  { %v1526_v21 = vmul.f32 0.01, %v1414_v55  ;;  %v2008_v44 = vmul.f32 1.442695, %v1973_v62 }
 0x1fc   :  { %v3826_v42 = vpop.eup %3825  ;;  %v5327_v25 = vmul.f32 100.0, %v5315_v20 }
 0x1fd   :  { %v2077_v2 = vmul.f32 0.6931472, %v3826_v42  ;;  %v1558_v22 = vsel %vm1110_vm3, %v5248_v48, %v1526_v21  ;;  %v3828_v45 = vpop.eup %3827  ;;  %v2386_v48 = vsel %vm1938_vm9, %v5242_v28, %v2354_v60  ;;  %3829 = vpow2.f32 %v2008_v44  ;;  %v1640_v28 = vpop.permute.xlu2 %1639 }
 0x1fe   :  { %v1800_v31 = vpop.f32.mrf.mxu0  ;;  %v1579_v30 = vpack.c.bf16 %v1558_v22, %v1557_v39  ;;  %vm1111_vm8 = vcmp.gt.f32.partialorder %v5327_v25, 20.0  ;;  %v2084_v38 = vadd.f32 1.0, %v3828_v45  ;;  %v2087_v58 = vmul.f32 -0.5, %v3828_v45 }
 0x1ff   :  { %v2083_v51 = vsel %vm2082_vm13, %v2080_v26, %v2077_v2  ;;  %v1801_v43 = vadd.f32 %v1800_v31, %v1638_v53  ;;  %v1143_v41 = vsel %vm1111_vm8, 0.0, %v5327_v25  ;;  %v2090_v7 = vand.u32 2147483647, %v3828_v45 }
 0x200   :  { %v2355_v32 = vmul.f32 0.01, %v2083_v51  ;;  %v1197_v5 = vmul.f32 1.442695, %v1143_v41  ;;  %3483 = vmatmul.msk.bf16.gmra.mxu1 %vm1725_vm14, %v1579_v30  ;;  %v2088_v0 = vadd.f32 1.0, %v2087_v58  ;;  %v1642_v41 = vpop.permute.xlu0 %1641 }
 0x201   :  { %v5340_v47 = vadd.f32 %v5226_v10, %v1801_v43  ;;  %v1034_v14 = vpop.f32.mrf.mxu1  ;;  %vm5383_vm5 = vcmp.lt.f32.partialorder %v2090_v7, 0.0004427343 }
 0x202   :  { %v2387_v54 = vsel %vm1939_vm2, %v5260_v36, %v2355_v32  ;;  %3831 = vpow2.f32 %v1197_v5  ;;  %v5350_v16 = vadd.f32 %v5128_v8, %v1034_v14  ;;  %v2089_v27 = vmul.f32 %v3828_v45, %v2088_v0 }
 0x203   :  { %v2418_v46 = vpack.c.bf16 %v2387_v54, %v2386_v48  ;;  %v5353_v40 = vmul.f32 100.0, %v5340_v47  ;;  %3833 = vlog2.f32 %v2084_v38  ;;  %v3830_v15 = vpop.eup %3829 }
 0x204   :  { %v5356_v50 = vmul.f32 100.0, %v5350_v16  ;;  %v2093_v24 = vadd.f32 1.0, %v3830_v15  ;;  %v2096_v6 = vmul.f32 -0.5, %v3830_v15  ;;  %v2099_v2 = vand.u32 2147483647, %v3830_v15 }
 0x205   :  { %vm1942_vm4 = vcmp.gt.f32.partialorder %v5353_v40, 20.0  ;;  %3505 = vmatmul.msk.bf16.vlgmr.msra.gmra.mxu3 %vm919_vm12, %v2418_v46 }
 0x206   :  { %v1974_v9 = vsel %vm1942_vm4, 0.0, %v5353_v40  ;;  %v1802_v36 = vpop.f32.mrf.mxu0  ;;  %vm1112_vm11 = vcmp.gt.f32.partialorder %v5356_v50, 20.0  ;;  %v2097_v29 = vadd.f32 1.0, %v2096_v6  ;;  %vm5402_vm2 = vcmp.lt.f32.partialorder %v2099_v2, 0.0004427343 }
 0x207   :  { %v2010_v23 = vmul.f32 1.442695, %v1974_v9  ;;  %v1803_v3 = vadd.f32 %v1802_v36, %v1640_v28  ;;  %v1144_v11 = vsel %vm1112_vm11, 0.0, %v5356_v50 }
 0x208   :  { %v3832_v17 = vpop.eup %3831  ;;  %v1199_v63 = vmul.f32 1.442695, %v1144_v11  ;;  %v2098_v44 = vmul.f32 %v3830_v15, %v2097_v29  ;;  %v1644_v29 = vpop.permute.xlu1 %1643 }
 0x209   :  { %v5368_v37 = vadd.f32 %v5226_v10, %v1803_v3  ;;  %v1037_v13 = vpop.f32.mrf.mxu1  ;;  %3835 = vpow2.f32 %v2010_v23  ;;  %v1415_v61 = vadd.f32 1.0, %v3832_v17  ;;  %v1418_v56 = vmul.f32 -0.5, %v3832_v17  ;;  %v3834_v12 = vpop.eup %3833 }
 0x20a   :  { %3837 = vpow2.f32 %v1199_v63  ;;  %v5371_v59 = vadd.f32 %v5128_v8, %v1037_v13  ;;  %v1421_v34 = vand.u32 2147483647, %v3832_v17  ;;  %v2086_v52 = vmul.f32 0.6931472, %v3834_v12 }
 0x20b   :  { %v5374_v33 = vmul.f32 100.0, %v5368_v37  ;;  %3839 = vlog2.f32 %v1415_v61  ;;  %v1419_v18 = vadd.f32 1.0, %v1418_v56 }
 0x20c   :  { %v5377_v57 = vmul.f32 100.0, %v5371_v59  ;;  %3841 = vlog2.f32 %v2093_v24  ;;  %v2092_v53 = vsel %vm5383_vm5, %v2089_v27, %v2086_v52  ;;  %vm5395_vm0 = vcmp.lt.f32.partialorder %v1421_v34, 0.0004427343 }
 0x20d   :  { %vm1943_vm9 = vcmp.gt.f32.partialorder %v5374_v33, 20.0  ;;  %v1420_v60 = vmul.f32 %v3832_v17, %v1419_v18  ;;  %v2356_v45 = vmul.f32 0.01, %v2092_v53 }
 0x20e   :  { %v1975_v55 = vsel %vm1943_vm9, 0.0, %v5374_v33  ;;  %vm1113_vm3 = vcmp.gt.f32.partialorder %v5377_v57, 20.0 }
 0x20f   :  { %v2012_v42 = vmul.f32 1.442695, %v1975_v55  ;;  %v5390_v21 = vpop.eup %3835  ;;  %v1145_v39 = vsel %vm1113_vm3, 0.0, %v5377_v57  ;;  %v2388_v15 = vsel %vm1940_vm15, %v5282_v1, %v2356_v45 }
 0x210   :  { %v3838_v26 = vpop.eup %3837  ;;  %v1201_v35 = vmul.f32 1.442695, %v1145_v39  ;;  %v2102_v0 = vadd.f32 1.0, %v5390_v21  ;;  %v2105_v11 = vmul.f32 -0.5, %v5390_v21  ;;  %v2108_v18 = vand.u32 2147483647, %v5390_v21 }
 0x211   :  { %v3840_v31 = vpop.eup %3839  ;;  %v1039_v30 = vpop.f32.mrf.mxu1  ;;  %3843 = vpow2.f32 %v2012_v42  ;;  %v1424_v51 = vadd.f32 1.0, %v3838_v26  ;;  %v1427_v43 = vmul.f32 -0.5, %v3838_v26  ;;  %v1430_v14 = vand.u32 2147483647, %v3838_v26 }
 0x212   :  { %v3842_v32 = vpop.eup %3841  ;;  %3845 = vpow2.f32 %v1201_v35  ;;  %v5400_v5 = vadd.f32 %v5128_v8, %v1039_v30  ;;  %v1805_v48 = vpop.f32.mrf.mxu0  ;;  %v1417_v54 = vmul.f32 0.6931472, %v3840_v31  ;;  %v2106_v12 = vadd.f32 1.0, %v2105_v11 }
 0x213   :  { %v1806_v46 = vadd.f32 %v1805_v48, %v1642_v41  ;;  %3847 = vlog2.f32 %v1424_v51  ;;  %v1428_v38 = vadd.f32 1.0, %v1427_v43  ;;  %v2095_v36 = vmul.f32 0.6931472, %v3842_v32 }
 0x214   :  { %v5407_v28 = vmul.f32 100.0, %v5400_v5  ;;  %v1423_v9 = vsel %vm5395_vm0, %v1420_v60, %v1417_v54  ;;  %vm5420_vm1 = vcmp.lt.f32.partialorder %v1430_v14, 0.0004427343  ;;  %3849 = vlog2.f32 %v2102_v0  ;;  %v1646_v0 = vpop.permute.xlu2 %1645 }
 0x215   :  { %v5413_v23 = vadd.f32 %v5226_v10, %v1806_v46  ;;  %v1527_v3 = vmul.f32 0.01, %v1423_v9  ;;  %v2101_v63 = vsel %vm5402_vm2, %v2098_v44, %v2095_v36  ;;  %v1429_v19 = vmul.f32 %v3838_v26, %v1428_v38 }
 0x216   :  { %vm1114_vm6 = vcmp.gt.f32.partialorder %v5407_v28, 20.0  ;;  %v2357_v61 = vmul.f32 0.01, %v2101_v63  ;;  %v2107_v58 = vmul.f32 %v5390_v21, %v2106_v12 }
 0x217   :  { %v5426_v7 = vpop.eup %3843  ;;  %v1146_v13 = vsel %vm1114_vm6, 0.0, %v5407_v28  ;;  %v5432_v1 = vmul.f32 100.0, %v5413_v23  ;;  %v1559_v24 = vsel %vm1111_vm8, %v5315_v20, %v1527_v3 }
 0x218   :  { %v3846_v56 = vpop.eup %3845  ;;  %v1203_v27 = vmul.f32 1.442695, %v1146_v13  ;;  %v2389_v52 = vsel %vm1941_vm10, %v5302_v4, %v2357_v61  ;;  %v2111_v26 = vadd.f32 1.0, %v5426_v7  ;;  %vm5458_vm10 = vcmp.lt.f32.partialorder %v2108_v18, 0.0004427343 }
 0x219   :  { %v3848_v34 = vpop.eup %3847  ;;  %v1042_v6 = vpop.f32.mrf.mxu1  ;;  %vm1944_vm15 = vcmp.gt.f32.partialorder %v5432_v1, 20.0  ;;  %v1433_v55 = vadd.f32 1.0, %v3846_v56  ;;  %v1436_v62 = vmul.f32 -0.5, %v3846_v56  ;;  %v2419_v2 = vpack.c.bf16 %v2389_v52, %v2388_v15 }
 0x21a   :  { %3851 = vpow2.f32 %v1203_v27  ;;  %v5443_v42 = vadd.f32 %v5128_v8, %v1042_v6  ;;  %v1976_v20 = vsel %vm1944_vm15, 0.0, %v5432_v1  ;;  %v1426_v25 = vmul.f32 0.6931472, %v3848_v34  ;;  %v1807_v53 = vpop.f32.mrf.mxu0  ;;  %v3850_v49 = vpop.eup %3849 }
 0x21b   :  { %v1808_v39 = vadd.f32 %v1807_v53, %v1644_v29  ;;  %3853 = vlog2.f32 %v1433_v55  ;;  %v1437_v60 = vadd.f32 1.0, %v1436_v62  ;;  %v1439_v22 = vand.u32 2147483647, %v3846_v56  ;;  %3506 = vmatmul.msk.bf16.gmra.mxu3 %vm919_vm12, %v2419_v2 }
 0x21c   :  { %v5450_v4 = vmul.f32 100.0, %v5443_v42  ;;  %v1432_v35 = vsel %vm5420_vm1, %v1429_v19, %v1426_v25  ;;  %v2014_v44 = vmul.f32 1.442695, %v1976_v20  ;;  %v5467_v32 = vmul.f32 0.6931472, %v3850_v49 }
 0x21d   :  { %v1528_v31 = vmul.f32 0.01, %v1432_v35  ;;  %v5455_v30 = vadd.f32 %v5226_v10, %v1808_v39  ;;  %v1438_v43 = vmul.f32 %v3846_v56, %v1437_v60  ;;  %vm5463_vm13 = vcmp.lt.f32.partialorder %v1439_v22, 0.0004427343  ;;  %v1648_v22 = vpop.permute.xlu0 %1647 }
 0x21e   :  { %vm1115_vm7 = vcmp.gt.f32.partialorder %v5450_v4, 20.0  ;;  %3855 = vlog2.f32 %v2111_v26  ;;  %v2114_v9 = vmul.f32 -0.5, %v5426_v7  ;;  %v2110_v55 = vsel %vm5458_vm10, %v2107_v58, %v5467_v32 }
 0x21f   :  { %v1147_v41 = vsel %vm1115_vm7, 0.0, %v5450_v4  ;;  %v1560_v48 = vsel %vm1112_vm11, %v5350_v16, %v1528_v31  ;;  %v5476_v54 = vmul.f32 100.0, %v5455_v30  ;;  %v2117_v35 = vand.u32 2147483647, %v5426_v7 }
 0x220   :  { %v3852_v14 = vpop.eup %3851  ;;  %v1205_v46 = vmul.f32 1.442695, %v1147_v41  ;;  %v1580_v38 = vpack.c.bf16 %v1560_v48, %v1559_v24  ;;  %v2115_v29 = vadd.f32 1.0, %v2114_v9 }
 0x221   :  { %v3854_v36 = vpop.eup %3853  ;;  %v1044_v3 = vpop.f32.mrf.mxu1  ;;  %vm1945_vm8 = vcmp.gt.f32.partialorder %v5476_v54, 20.0  ;;  %v1442_v15 = vadd.f32 1.0, %v3852_v14  ;;  %v1445_v11 = vmul.f32 -0.5, %v3852_v14  ;;  %v1448_v50 = vand.u32 2147483647, %v3852_v14 }
 0x222   :  { %3857 = vpow2.f32 %v1205_v46  ;;  %v5482_v16 = vadd.f32 %v5128_v8, %v1044_v3  ;;  %3484 = vmatmul.msk.bf16.vlgmr.msra.gmra.mxu2 %vm1725_vm14, %v1580_v38  ;;  %v1977_v21 = vsel %vm1945_vm8, 0.0, %v5476_v54  ;;  %v1047_v17 = vpop.f32.mrf.mxu3  ;;  %v1810_v63 = vpop.f32.mrf.mxu0  ;;  %v1435_v13 = vmul.f32 0.6931472, %v3854_v36 }
 0x223   :  { %v2016_v19 = vmul.f32 1.442695, %v1977_v21  ;;  %v5489_v61 = vadd.f32 %v5128_v8, %v1047_v17  ;;  %v1811_v56 = vadd.f32 %v1810_v63, %v1646_v0  ;;  %3859 = vlog2.f32 %v1442_v15  ;;  %v1650_v0 = vpop.permute.xlu1 %1649 }
 0x224   :  { %3861 = vpow2.f32 %v2014_v44  ;;  %v5492_v27 = vmul.f32 100.0, %v5482_v16  ;;  %v1441_v24 = vsel %vm5463_vm13, %v1438_v43, %v1435_v13  ;;  %v1446_v12 = vadd.f32 1.0, %v1445_v11  ;;  %v3856_v18 = vpop.eup %3855 }
 0x225   :  { %v5497_v34 = vmul.f32 100.0, %v5489_v61  ;;  %v5500_v6 = vadd.f32 %v5226_v10, %v1811_v56  ;;  %vm5502_vm11 = vcmp.lt.f32.partialorder %v1448_v50, 0.0004427343  ;;  %3863 = vpow2.f32 %v2016_v19 }
 0x226   :  { %vm1116_vm5 = vcmp.gt.f32.partialorder %v5492_v27, 20.0  ;;  %v1529_v62 = vmul.f32 0.01, %v1441_v24  ;;  %v2113_v53 = vmul.f32 0.6931472, %v3856_v18  ;;  %v1447_v49 = vmul.f32 %v3852_v14, %v1446_v12 }
 0x227   :  { %v1148_v20 = vsel %vm1116_vm5, 0.0, %v5492_v27  ;;  %vm1117_vm0 = vcmp.gt.f32.partialorder %v5497_v34, 20.0  ;;  %v5515_v25 = vmul.f32 100.0, %v5500_v6  ;;  %v2116_v31 = vmul.f32 %v5426_v7, %v2115_v29 }
 0x228   :  { %v5517_v39 = vpop.eup %3857  ;;  %v1207_v2 = vmul.f32 1.442695, %v1148_v20  ;;  %v1149_v26 = vsel %vm1117_vm0, 0.0, %v5497_v34  ;;  %v2358_v14 = vmul.f32 0.01, %v2110_v55  ;;  %v1561_v9 = vsel %vm1113_vm3, %v5371_v59, %v1529_v62 }
 0x229   :  { %v3860_v60 = vpop.eup %3859  ;;  %v1209_v44 = vmul.f32 1.442695, %v1149_v26  ;;  %vm1946_vm2 = vcmp.gt.f32.partialorder %v5515_v25, 20.0  ;;  %v1451_v51 = vadd.f32 1.0, %v5517_v39  ;;  %vm2118_vm1 = vcmp.lt.f32.partialorder %v2117_v35, 0.0004427343 }
 0x22a   :  { %v5526_v43 = vpop.eup %3861  ;;  %3865 = vpow2.f32 %v1207_v2  ;;  %v1978_v45 = vsel %vm1946_vm2, 0.0, %v5515_v25  ;;  %v1444_v32 = vmul.f32 0.6931472, %v3860_v60  ;;  %v1049_v41 = vpop.f32.mrf.mxu3  ;;  %v2119_v36 = vsel %vm2118_vm1, %v2116_v31, %v2113_v53  ;;  %v4117_v53 = vld [vmem:[%s6803_s4] ss:$0 sm:$0xff] }
 0x22b   :  { %v1812_v48 = vpop.f32.mrf.mxu0  ;;  %3867 = vpow2.f32 %v1209_v44  ;;  %v5532_v46 = vadd.f32 %v5128_v8, %v1049_v41  ;;  %v5534_v7 = vpop.eup %3863  ;;  %v2018_v3 = vmul.f32 1.442695, %v1978_v45  ;;  %v2359_v21 = vmul.f32 0.01, %v2119_v36 }
 0x22c   :  { %v1813_v38 = vadd.f32 %v1812_v48, %v1648_v22  ;;  %v1450_v58 = vsel %vm5502_vm11, %v1447_v49, %v1444_v32  ;;  %3869 = vlog2.f32 %v1451_v51  ;;  %v2390_v17 = vsel %vm1942_vm4, %v5340_v47, %v2358_v14  ;;  %v1652_v22 = vpop.permute.xlu2 %1651 }
 0x22d   :  { %v1530_v15 = vmul.f32 0.01, %v1450_v58  ;;  %v5542_v11 = vmul.f32 100.0, %v5532_v46  ;;  %v1815_v50 = vpop.f32.mrf.mxu1  ;;  %v1454_v59 = vmul.f32 -0.5, %v5517_v39  ;;  %v1457_v19 = vand.u32 2147483647, %v5517_v39 }
 0x22e   :  { %v5545_v8 = vadd.f32 %v5226_v10, %v1813_v38  ;;  %v1816_v63 = vadd.f32 %v1815_v50, %v1650_v0  ;;  %v2391_v40 = vsel %vm1943_vm9, %v5368_v37, %v2359_v21  ;;  %3871 = vpow2.f32 %v2018_v3 }
 0x22f   :  { %v1562_v57 = vsel %vm1114_vm6, %v5400_v5, %v1530_v15  ;;  %vm1118_vm3 = vcmp.gt.f32.partialorder %v5542_v11, 20.0  ;;  %v2420_v18 = vpack.c.bf16 %v2391_v40, %v2390_v17  ;;  %v1455_v52 = vadd.f32 1.0, %v1454_v59 }
 0x230   :  { %v5556_v13 = vmul.f32 100.0, %v5545_v8  ;;  %v3866_v56 = vpop.eup %3865  ;;  %v1581_v24 = vpack.c.bf16 %v1562_v57, %v1561_v9  ;;  %v1150_v47 = vsel %vm1118_vm3, 0.0, %v5542_v11  ;;  %v5566_v28 = vadd.f32 %v5226_v10, %v1816_v63 }
 0x231   :  { %v5568_v5 = vpop.eup %3867  ;;  %v1211_v12 = vmul.f32 1.442695, %v1150_v47  ;;  %v1460_v29 = vadd.f32 1.0, %v3866_v56  ;;  %3507 = vmatmul.msk.bf16.gmra.mxu3 %vm919_vm12, %v2420_v18  ;;  %v2120_v49 = vadd.f32 1.0, %v5526_v43  ;;  %v1456_v35 = vmul.f32 %v5517_v39, %v1455_v52 }
 0x232   :  { %vm1947_vm4 = vcmp.gt.f32.partialorder %v5556_v13, 20.0  ;;  %v3870_v55 = vpop.eup %3869  ;;  %3485 = vmatmul.msk.bf16.gmra.mxu2 %vm1725_vm14, %v1581_v24  ;;  %v1052_v33 = vpop.f32.mrf.mxu3  ;;  %v5576_v37 = vmul.f32 100.0, %v5566_v28  ;;  %v1463_v60 = vmul.f32 -0.5, %v3866_v56  ;;  %vm1458_vm6 = vcmp.lt.f32.partialorder %v1457_v19, 0.0004427343 }
 0x233   :  { %v1979_v62 = vsel %vm1947_vm4, 0.0, %v5556_v13  ;;  %v5582_v2 = vadd.f32 %v4117_v53, %v1052_v33  ;;  %v1453_v26 = vmul.f32 0.6931472, %v3870_v55  ;;  %3873 = vlog2.f32 %v1460_v29  ;;  %v1654_v33 = vpop.permute.xlu0 %1653 }
 0x234   :  { %v2020_v20 = vmul.f32 1.442695, %v1979_v62  ;;  %vm1948_vm9 = vcmp.gt.f32.partialorder %v5576_v37, 20.0  ;;  %3875 = vpow2.f32 %v1211_v12  ;;  %v1464_v41 = vadd.f32 1.0, %v1463_v60  ;;  %v5594_v39 = vpop.eup %3871 }
 0x235   :  { %v5588_v44 = vmul.f32 100.0, %v5582_v2  ;;  %v1980_v31 = vsel %vm1948_vm9, 0.0, %v5576_v37  ;;  %v1817_v51 = vpop.f32.mrf.mxu1  ;;  %v1459_v32 = vsel %vm1458_vm6, %v1456_v35, %v1453_v26  ;;  %3877 = vlog2.f32 %v2120_v49 }
 0x236   :  { %v2022_v45 = vmul.f32 1.442695, %v1980_v31  ;;  %v1818_v48 = vadd.f32 %v1817_v51, %v1652_v22  ;;  %3879 = vpow2.f32 %v2020_v20  ;;  %v1466_v14 = vand.u32 2147483647, %v3866_v56 }
 0x237   :  { %vm1119_vm10 = vcmp.gt.f32.partialorder %v5588_v44, 20.0  ;;  %v1531_v38 = vmul.f32 0.01, %v1459_v32  ;;  %v2123_v36 = vmul.f32 -0.5, %v5526_v43  ;;  %v1465_v3 = vmul.f32 %v3866_v56, %v1464_v41 }
 0x238   :  { %v5597_v58 = vadd.f32 %v5226_v10, %v1818_v48  ;;  %v1151_v9 = vsel %vm1119_vm10, 0.0, %v5588_v44  ;;  %3881 = vpow2.f32 %v2022_v45  ;;  %v2126_v21 = vand.u32 2147483647, %v5526_v43 }
 0x239   :  { %v3874_v0 = vpop.eup %3873  ;;  %v2129_v17 = vadd.f32 1.0, %v5534_v7  ;;  %v2124_v19 = vadd.f32 1.0, %v2123_v36  ;;  %v2132_v24 = vmul.f32 -0.5, %v5534_v7  ;;  %v1213_v47 = vmul.f32 1.442695, %v1151_v9 }
 0x23a   :  { %v1054_v15 = vpop.f32.mrf.mxu3  ;;  %v5604_v50 = vmul.f32 100.0, %v5597_v58  ;;  %v5608_v63 = vpop.eup %3875  ;;  %v1462_v59 = vmul.f32 0.6931472, %v3874_v0  ;;  %vm1467_vm13 = vcmp.lt.f32.partialorder %v1466_v14, 0.0004427343  ;;  %v1563_v56 = vsel %vm1115_vm7, %v5443_v42, %v1531_v38 }
 0x23b   :  { %v5610_v57 = vadd.f32 %v4117_v53, %v1054_v15  ;;  %3883 = vlog2.f32 %v2129_v17  ;;  %v3878_v40 = vpop.eup %3877  ;;  %v2135_v52 = vand.u32 2147483647, %v5534_v7  ;;  %v2125_v53 = vmul.f32 %v5526_v43, %v2124_v19  ;;  %v1656_v0 = vpop.permute.xlu1 %1655 }
 0x23c   :  { %v1468_v12 = vsel %vm1467_vm13, %v1465_v3, %v1462_v59  ;;  %vm1949_vm11 = vcmp.gt.f32.partialorder %v5604_v50, 20.0  ;;  %v5621_v62 = vpop.eup %3879  ;;  %v2122_v20 = vmul.f32 0.6931472, %v3878_v40  ;;  %vm2127_vm1 = vcmp.lt.f32.partialorder %v2126_v21, 0.0004427343 }
 0x23d   :  { %v5617_v18 = vmul.f32 100.0, %v5610_v57  ;;  %v1820_v55 = vpop.f32.mrf.mxu1  ;;  %v1532_v29 = vmul.f32 0.01, %v1468_v12  ;;  %v2133_v4 = vadd.f32 1.0, %v2132_v24  ;;  %v1469_v49 = vadd.f32 1.0, %v5568_v5 }
 0x23e   :  { %v5624_v42 = vpop.eup %3881  ;;  %v1821_v26 = vadd.f32 %v1820_v55, %v1654_v33  ;;  %3885 = vpow2.f32 %v1213_v47  ;;  %v2128_v22 = vsel %vm2127_vm1, %v2125_v53, %v2122_v20  ;;  %v1981_v51 = vsel %vm1949_vm11, 0.0, %v5604_v50 }
 0x23f   :  { %vm1120_vm7 = vcmp.gt.f32.partialorder %v5617_v18, 20.0  ;;  %v1564_v35 = vsel %vm1116_vm5, %v5482_v16, %v1532_v29  ;;  %v2360_v41 = vmul.f32 0.01, %v2128_v22  ;;  %3887 = vlog2.f32 %v1469_v49 }
 0x240   :  { %v1152_v60 = vsel %vm1120_vm7, 0.0, %v5617_v18  ;;  %v1582_v43 = vpack.c.bf16 %v1564_v35, %v1563_v56  ;;  %v5638_v45 = vadd.f32 %v5226_v10, %v1821_v26  ;;  %v1472_v27 = vmul.f32 -0.5, %v5568_v5 }
 0x241   :  { %v1215_v31 = vmul.f32 1.442695, %v1152_v60  ;;  %v3884_v32 = vpop.eup %3883  ;;  %v1478_v16 = vadd.f32 1.0, %v5608_v63  ;;  %v2134_v14 = vmul.f32 %v5534_v7, %v2133_v4  ;;  %v1475_v9 = vand.u32 2147483647, %v5568_v5 }
 0x242   :  { %3486 = vmatmul.msk.bf16.gmra.mxu2 %vm1725_vm14, %v1582_v43  ;;  %v2131_v48 = vmul.f32 0.6931472, %v3884_v32  ;;  %v5645_v38 = vmul.f32 100.0, %v5638_v45  ;;  %vm2136_vm5 = vcmp.lt.f32.partialorder %v2135_v52, 0.0004427343  ;;  %v1481_v36 = vmul.f32 -0.5, %v5608_v63 }
 0x243   :  { %3889 = vlog2.f32 %v1478_v16  ;;  %v2024_v3 = vmul.f32 1.442695, %v1981_v51  ;;  %v1473_v17 = vadd.f32 1.0, %v1472_v27  ;;  %v2138_v59 = vadd.f32 1.0, %v5594_v39  ;;  %v1658_v16 = vpop.permute.xlu2 %1657 }
 0x244   :  { %v2137_v15 = vsel %vm2136_vm5, %v2134_v14, %v2131_v48  ;;  %v5650_v19 = vpop.eup %3885  ;;  %3891 = vpow2.f32 %v1215_v31  ;;  %v2392_v24 = vsel %vm1944_vm15, %v5413_v23, %v2360_v41  ;;  %vm1950_vm6 = vcmp.gt.f32.partialorder %v5645_v38, 20.0 }
 0x245   :  { %v1822_v21 = vpop.f32.mrf.mxu1  ;;  %v2361_v7 = vmul.f32 0.01, %v2137_v15  ;;  %vm5656_vm13 = vcmp.lt.f32.partialorder %v1475_v9, 0.0004427343  ;;  %v1482_v40 = vadd.f32 1.0, %v1481_v36  ;;  %3893 = vlog2.f32 %v2138_v59  ;;  %v3888_v12 = vpop.eup %3887 }
 0x246   :  { %v1823_v47 = vadd.f32 %v1822_v21, %v1656_v0  ;;  %v1484_v1 = vand.u32 2147483647, %v5608_v63  ;;  %v2141_v23 = vmul.f32 -0.5, %v5594_v39  ;;  %v1471_v29 = vmul.f32 0.6931472, %v3888_v12 }
 0x247   :  { %v2393_v52 = vsel %vm1945_vm8, %v5455_v30, %v2361_v7  ;;  %v1474_v20 = vmul.f32 %v5568_v5, %v1473_v17  ;;  %v2144_v53 = vand.u32 2147483647, %v5594_v39  ;;  %v1982_v26 = vsel %vm1950_vm6, 0.0, %v5645_v38 }
 0x248   :  { %v5664_v55 = vadd.f32 %v5226_v10, %v1823_v47  ;;  %v2421_v33 = vpack.c.bf16 %v2393_v52, %v2392_v24  ;;  %v2142_v10 = vadd.f32 1.0, %v2141_v23  ;;  %v2147_v54 = vadd.f32 1.0, %v5621_v62  ;;  %v5707_v24 = vld [vmem:[%s6804_s6] ss:$0 sm:$0xff] }
 0x249   :  { %v3890_v4 = vpop.eup %3889  ;;  %v1477_v49 = vsel %vm5656_vm13, %v1474_v20, %v1471_v29  ;;  %v1483_v5 = vmul.f32 %v5608_v63, %v1482_v40  ;;  %v2150_v60 = vmul.f32 -0.5, %v5621_v62  ;;  %vm1485_vm8 = vcmp.lt.f32.partialorder %v1484_v1, 0.0004427343 }
 0x24a   :  { %v5674_v30 = vmul.f32 100.0, %v5664_v55  ;;  %3508 = vmatmul.msk.bf16.gmra.mxu3 %vm919_vm12, %v2421_v33  ;;  %v1480_v35 = vmul.f32 0.6931472, %v3890_v4  ;;  %v5682_v22 = vpop.eup %3891  ;;  %v1533_v43 = vmul.f32 0.01, %v1477_v49  ;;  %3895 = vlog2.f32 %v2147_v54  ;;  %v1660_v33 = vpop.permute.xlu0 %1659 }
 0x24b   :  { %v3894_v31 = vpop.eup %3893  ;;  %3897 = vpow2.f32 %v2024_v3  ;;  %v2026_v51 = vmul.f32 1.442695, %v1982_v26  ;;  %vm5685_vm1 = vcmp.lt.f32.partialorder %v2144_v53, 0.0004427343  ;;  %v2143_v9 = vmul.f32 %v5594_v39, %v2142_v10 }
 0x24c   :  { %vm1951_vm15 = vcmp.gt.f32.partialorder %v5674_v30, 20.0  ;;  %v1486_v32 = vsel %vm1485_vm8, %v1483_v5, %v1480_v35  ;;  %v2140_v14 = vmul.f32 0.6931472, %v3894_v31  ;;  %v2151_v36 = vadd.f32 1.0, %v2150_v60 }
 0x24d   :  { %v1825_v27 = vpop.f32.mrf.mxu1  ;;  %v1983_v63 = vsel %vm1951_vm15, 0.0, %v5674_v30  ;;  %v1534_v48 = vmul.f32 0.01, %v1486_v32  ;;  %v1487_v3 = vadd.f32 1.0, %v5650_v19  ;;  %v1490_v15 = vmul.f32 -0.5, %v5650_v19 }
 0x24e   :  { %v1826_v0 = vadd.f32 %v1825_v27, %v1658_v16  ;;  %v1565_v21 = vsel %vm1117_vm0, %v5489_v61, %v1533_v43  ;;  %v2146_v59 = vsel %vm5685_vm1, %v2143_v9, %v2140_v14  ;;  %v2153_v7 = vand.u32 2147483647, %v5621_v62 }
 0x24f   :  { %v1566_v17 = vsel %vm1118_vm3, %v5532_v46, %v1534_v48  ;;  %3899 = vlog2.f32 %v1487_v3  ;;  %v2028_v34 = vmul.f32 1.442695, %v1983_v63  ;;  %v2362_v11 = vmul.f32 0.01, %v2146_v59  ;;  %v1662_v59 = vpop.permute.xlu1 %1661 }
 0x250   :  { %v1583_v39 = vpack.c.bf16 %v1566_v17, %v1565_v21  ;;  %v5710_v47 = vadd.f32 %v5707_v24, %v1826_v0  ;;  %v3896_v61 = vpop.eup %3895  ;;  %3901 = vpow2.f32 %v2026_v51  ;;  %v1496_v46 = vadd.f32 1.0, %v5682_v22 }
 0x251   :  { %v5713_v56 = vpop.eup %3897  ;;  %v2149_v40 = vmul.f32 0.6931472, %v3896_v61  ;;  %v2152_v12 = vmul.f32 %v5621_v62, %v2151_v36  ;;  %v1491_v52 = vadd.f32 1.0, %v1490_v15  ;;  %v1499_v1 = vmul.f32 -0.5, %v5682_v22 }
 0x252   :  { %3487 = vmatmul.msk.bf16.gmra.mxu2 %vm1725_vm14, %v1583_v39  ;;  %vm2154_vm0 = vcmp.lt.f32.partialorder %v2153_v7, 0.0004427343  ;;  %3903 = vlog2.f32 %v1496_v46  ;;  %v2156_v23 = vadd.f32 1.0, %v5624_v42  ;;  %v5720_v20 = vmul.f32 100.0, %v5710_v47 }
 0x253   :  { %v2155_v29 = vsel %vm2154_vm0, %v2152_v12, %v2149_v40  ;;  %v1493_v4 = vand.u32 2147483647, %v5650_v19  ;;  %v2159_v26 = vmul.f32 -0.5, %v5624_v42  ;;  %3905 = vpow2.f32 %v2028_v34 }
 0x254   :  { %v2363_v10 = vmul.f32 0.01, %v2155_v29  ;;  %v2394_v62 = vsel %vm1946_vm2, %v5500_v6, %v2362_v11  ;;  %v1492_v35 = vmul.f32 %v5650_v19, %v1491_v52  ;;  %v1500_v5 = vadd.f32 1.0, %v1499_v1 }
 0x255   :  { %v1827_v53 = vpop.f32.mrf.mxu1  ;;  %v3900_v49 = vpop.eup %3899  ;;  %v1502_v60 = vand.u32 2147483647, %v5682_v22  ;;  %3907 = vlog2.f32 %v2156_v23  ;;  %v2165_v6 = vadd.f32 1.0, %v5713_v56  ;;  %vm1952_vm2 = vcmp.gt.f32.partialorder %v5720_v20, 20.0 }
 0x256   :  { %v1828_v54 = vadd.f32 %v1827_v53, %v1660_v33  ;;  %v5729_v43 = vpop.eup %3901  ;;  %v2395_v31 = vsel %vm1947_vm4, %v5545_v8, %v2363_v10  ;;  %v1489_v32 = vmul.f32 0.6931472, %v3900_v49  ;;  %vm1494_vm3 = vcmp.lt.f32.partialorder %v1493_v4, 0.0004427343 }
 0x257   :  { %v2422_v25 = vpack.c.bf16 %v2395_v31, %v2394_v62  ;;  %v2160_v19 = vadd.f32 1.0, %v2159_v26  ;;  %3909 = vlog2.f32 %v2165_v6  ;;  %v2168_v13 = vmul.f32 -0.5, %v5713_v56  ;;  %v1664_v26 = vpop.permute.xlu2 %1663 }
 0x258   :  { %v5735_v51 = vadd.f32 %v5707_v24, %v1828_v54  ;;  %v3904_v41 = vpop.eup %3903  ;;  %v1495_v16 = vsel %vm1494_vm3, %v1492_v35, %v1489_v32  ;;  %v1501_v63 = vmul.f32 %v5682_v22, %v1500_v5  ;;  %v2162_v48 = vand.u32 2147483647, %v5624_v42 }
 0x259   :  { %v1498_v8 = vmul.f32 0.6931472, %v3904_v41  ;;  %v5746_v14 = vpop.eup %3905  ;;  %v1984_v9 = vsel %vm1952_vm2, 0.0, %v5720_v20  ;;  %vm1503_vm5 = vcmp.lt.f32.partialorder %v1502_v60, 0.0004427343  ;;  %v2169_v21 = vadd.f32 1.0, %v2168_v13 }
 0x25a   :  { %v5740_v27 = vmul.f32 100.0, %v5735_v51  ;;  %3509 = vmatmul.msk.bf16.gmra.mxu3 %vm919_vm12, %v2422_v25  ;;  %v1535_v36 = vmul.f32 0.01, %v1495_v16  ;;  %v2174_v17 = vadd.f32 1.0, %v5729_v43  ;;  %v2161_v61 = vmul.f32 %v5624_v42, %v2160_v19 }
 0x25b   :  { %v3908_v0 = vpop.eup %3907  ;;  %v1504_v15 = vsel %vm1503_vm5, %v1501_v63, %v1498_v8  ;;  %v2171_v34 = vand.u32 2147483647, %v5713_v56  ;;  %v2030_v11 = vmul.f32 1.442695, %v1984_v9  ;;  %vm2163_vm13 = vcmp.lt.f32.partialorder %v2162_v48, 0.0004427343  ;;  %v1666_v63 = vpop.permute.xlu0 %1665 }
 0x25c   :  { %vm1953_vm4 = vcmp.gt.f32.partialorder %v5740_v27, 20.0  ;;  %v1536_v7 = vmul.f32 0.01, %v1504_v15  ;;  %v2158_v39 = vmul.f32 0.6931472, %v3908_v0  ;;  %v1567_v52 = vsel %vm1119_vm10, %v5582_v2, %v1535_v36 }
 0x25d   :  { %v1985_v3 = vsel %vm1953_vm4, 0.0, %v5740_v27  ;;  %v1830_v22 = vpop.f32.mrf.mxu1  ;;  %v3910_v12 = vpop.eup %3909  ;;  %v2183_v33 = vadd.f32 1.0, %v5746_v14  ;;  %v2170_v53 = vmul.f32 %v5713_v56, %v2169_v21  ;;  %3911 = vlog2.f32 %v2174_v17 }
 0x25e   :  { %v2032_v46 = vmul.f32 1.442695, %v1985_v3  ;;  %v1831_v40 = vadd.f32 %v1830_v22, %v1662_v59  ;;  %v1568_v1 = vsel %vm1120_vm7, %v5610_v57, %v1536_v7  ;;  %v2164_v23 = vsel %vm2163_vm13, %v2161_v61, %v2158_v39  ;;  %v3584_v3 = vld [vmem:[%s6807_s9 + $0x18] sm:$0xff] }
 0x25f   :  { %v1584_v29 = vpack.c.bf16 %v1568_v1, %v1567_v52  ;;  %v2167_v42 = vmul.f32 0.6931472, %v3910_v12  ;;  %vm2172_vm8 = vcmp.lt.f32.partialorder %v2171_v34, 0.0004427343  ;;  %v2364_v4 = vmul.f32 0.01, %v2164_v23  ;;  %3223 = vmatpush.bf16.msrb.mxu2 %v3584_v3 }
 0x260   :  { %3913 = vlog2.f32 %v2183_v33  ;;  %v5768_v2 = vadd.f32 %v5707_v24, %v1831_v40  ;;  %v2186_v57 = vmul.f32 -0.5, %v5746_v14  ;;  %v2177_v62 = vmul.f32 -0.5, %v5729_v43 }
 0x261   :  { %3915 = vpow2.f32 %v2032_v46  ;;  %v2173_v44 = vsel %vm2172_vm8, %v2170_v53, %v2167_v42  ;;  %v2396_v56 = vsel %vm1948_vm9, %v5566_v28, %v2364_v4  ;;  %v2189_v25 = vand.u32 2147483647, %v5746_v14 }
 0x262   :  { %3488 = vmatmul.msk.bf16.gmra.mxu2 %vm1725_vm14, %v1584_v29  ;;  %v2365_v18 = vmul.f32 0.01, %v2173_v44  ;;  %3917 = vpow2.f32 %v2030_v11  ;;  %v5779_v60 = vmul.f32 100.0, %v5768_v2  ;;  %v2187_v31 = vadd.f32 1.0, %v2186_v57  ;;  %v1668_v11 = vpop.permute.xlu1 %1667 }
 0x263   :  { %v3912_v35 = vpop.eup %3911  ;;  %v2178_v37 = vadd.f32 1.0, %v2177_v62  ;;  %vm2190_vm10 = vcmp.lt.f32.partialorder %v2189_v25, 0.0004427343 }
 0x264   :  { %v2397_v54 = vsel %vm1949_vm11, %v5597_v58, %v2365_v18  ;;  %v2180_v58 = vand.u32 2147483647, %v5729_v43  ;;  %vm1954_vm14 = vcmp.gt.f32.partialorder %v5779_v60, 20.0  ;;  %v2176_v16 = vmul.f32 0.6931472, %v3912_v35 }
 0x265   :  { %v1832_v10 = vpop.f32.mrf.mxu1  ;;  %v2423_v5 = vpack.c.bf16 %v2397_v54, %v2396_v56  ;;  %v2188_v13 = vmul.f32 %v5746_v14, %v2187_v31  ;;  %v2179_v9 = vmul.f32 %v5729_v43, %v2178_v37  ;;  %v1986_v14 = vsel %vm1954_vm14, 0.0, %v5779_v60  ;;  %v3583_v31 = vld [vmem:[%s6807_s9 + $0x10] sm:$0xff] }
 0x266   :  { %v1833_v49 = vadd.f32 %v1832_v10, %v1664_v26  ;;  %v3914_v32 = vpop.eup %3913  ;;  %vm2181_vm11 = vcmp.lt.f32.partialorder %v2180_v58, 0.0004427343  ;;  %v2034_v43 = vmul.f32 1.442695, %v1986_v14  ;;  %3224 = vmatpush.bf16.msrb.mxu2 %v3583_v31 }
 0x267   :  { %v3916_v19 = vpop.eup %3915  ;;  %v2185_v28 = vmul.f32 0.6931472, %v3914_v32  ;;  %v2182_v17 = vsel %vm2181_vm11, %v2179_v9, %v2176_v16  ;;  %v1670_v32 = vpop.permute.xlu2 %1669 }
 0x268   :  { %v5782_v6 = vadd.f32 %v5707_v24, %v1833_v49  ;;  %v5789_v50 = vpop.eup %3917  ;;  %v2201_v8 = vadd.f32 1.0, %v3916_v19  ;;  %v2366_v7 = vmul.f32 0.01, %v2182_v17  ;;  %v2204_v61 = vmul.f32 -0.5, %v3916_v19  ;;  %v1672_v9 = vpop.permute.xlu0 %1671 }
 0x269   :  { %v2191_v36 = vsel %vm2190_vm10, %v2188_v13, %v2185_v28  ;;  %v2192_v21 = vadd.f32 1.0, %v5789_v50  ;;  %v2195_v40 = vmul.f32 -0.5, %v5789_v50 }
 0x26a   :  { %v5786_v41 = vmul.f32 100.0, %v5782_v6  ;;  %3510 = vmatmul.msk.bf16.gmra.mxu3 %vm919_vm12, %v2423_v5  ;;  %v2367_v59 = vmul.f32 0.01, %v2191_v36  ;;  %3919 = vlog2.f32 %v2201_v8  ;;  %v2398_v52 = vsel %vm1950_vm6, %v5638_v45, %v2366_v7 }
 0x26b   :  { %3921 = vlog2.f32 %v2192_v21  ;;  %v2205_v29 = vadd.f32 1.0, %v2204_v61  ;;  %v2196_v4 = vadd.f32 1.0, %v2195_v40  ;;  %v2198_v45 = vand.u32 2147483647, %v5789_v50 }
 0x26c   :  { %vm1955_vm9 = vcmp.gt.f32.partialorder %v5786_v41, 20.0  ;;  %v2399_v34 = vsel %vm1951_vm15, %v5664_v55, %v2367_v59  ;;  %v2207_v55 = vand.u32 2147483647, %v3916_v19 }
 0x26d   :  { %v1987_v48 = vsel %vm1955_vm9, 0.0, %v5786_v41  ;;  %v1835_v0 = vpop.f32.mrf.mxu1  ;;  %v2424_v33 = vpack.c.bf16 %v2399_v34, %v2398_v52  ;;  %v2206_v26 = vmul.f32 %v3916_v19, %v2205_v29  ;;  %v2197_v49 = vmul.f32 %v5789_v50, %v2196_v4 }
 0x26e   :  { %v1836_v15 = vadd.f32 %v1835_v0, %v1666_v63  ;;  %v2036_v22 = vmul.f32 1.442695, %v1987_v48  ;;  %vm5833_vm15 = vcmp.lt.f32.partialorder %v2207_v55, 0.0004427343  ;;  %vm2199_vm1 = vcmp.lt.f32.partialorder %v2198_v45, 0.0004427343 }
 0x26f   :  { %v5862_v0 = vld [vmem:[%s6806_s8] ss:$0 sm:$0xff] }
 0x270   :  { %v5807_v39 = vadd.f32 %v5707_v24, %v1836_v15  ;;  %3923 = vpow2.f32 %v2036_v22  ;;  %v3920_v12 = vpop.eup %3919 }
 0x271   :  { %3925 = vpow2.f32 %v2034_v43  ;;  %v3922_v42 = vpop.eup %3921  ;;  %v2203_v44 = vmul.f32 0.6931472, %v3920_v12 }
 0x272   :  { %v5817_v1 = vmul.f32 100.0, %v5807_v39  ;;  %v2194_v18 = vmul.f32 0.6931472, %v3922_v42 }
 0x273   :  { %v2209_v35 = vsel %vm5833_vm15, %v2206_v26, %v2203_v44 }
 0x274   :  { %vm1956_vm7 = vcmp.gt.f32.partialorder %v5817_v1, 20.0  ;;  %v2200_v37 = vsel %vm2199_vm1, %v2197_v49, %v2194_v18  ;;  %v2369_v16 = vmul.f32 0.01, %v2209_v35 }
 0x275   :  { %v1837_v46 = vpop.f32.mrf.mxu1  ;;  %v1988_v56 = vsel %vm1956_vm7, 0.0, %v5817_v1  ;;  %v2368_v50 = vmul.f32 0.01, %v2200_v37 }
 0x276   :  { %v1838_v23 = vadd.f32 %v1837_v46, %v1668_v11  ;;  %v5822_v53 = vpop.eup %3923  ;;  %v2038_v58 = vmul.f32 1.442695, %v1988_v56  ;;  %v2401_v48 = vsel %vm1953_vm4, %v5735_v51, %v2369_v16 }
 0x277   :  { %v5829_v57 = vpop.eup %3925  ;;  %v2219_v62 = vadd.f32 1.0, %v5822_v53  ;;  %v2222_v63 = vmul.f32 -0.5, %v5822_v53  ;;  %v2400_v14 = vsel %vm1952_vm2, %v5710_v47, %v2368_v50  ;;  %v2225_v7 = vand.u32 2147483647, %v5822_v53 }
 0x278   :  { %v5820_v30 = vadd.f32 %v5707_v24, %v1838_v23  ;;  %v2210_v25 = vadd.f32 1.0, %v5829_v57  ;;  %v2213_v8 = vmul.f32 -0.5, %v5829_v57  ;;  %v2425_v21 = vpack.c.bf16 %v2401_v48, %v2400_v14 }
 0x279   :  { %3927 = vlog2.f32 %v2219_v62  ;;  %v2223_v27 = vadd.f32 1.0, %v2222_v63  ;;  %v2216_v46 = vand.u32 2147483647, %v5829_v57  ;;  %vm2226_vm3 = vcmp.lt.f32.partialorder %v2225_v7, 0.0004427343 }
 0x27a   :  { %v5826_v38 = vmul.f32 100.0, %v5820_v30  ;;  %3511 = vmatmul.msk.bf16.gmra.mxu3 %vm919_vm12, %v2424_v33  ;;  %3929 = vlog2.f32 %v2210_v25  ;;  %v2214_v17 = vadd.f32 1.0, %v2213_v8 }
 0x27b   :  { %v2224_v23 = vmul.f32 %v5822_v53, %v2223_v27  ;;  %vm2217_vm5 = vcmp.lt.f32.partialorder %v2216_v46, 0.0004427343 }
 0x27c   :  { %vm1957_vm6 = vcmp.gt.f32.partialorder %v5826_v38, 20.0  ;;  %v2215_v52 = vmul.f32 %v5829_v57, %v2214_v17 }
 0x27d   :  { %v1989_v54 = vsel %vm1957_vm6, 0.0, %v5826_v38  ;;  %v1840_v5 = vpop.f32.mrf.mxu1 }
 0x27e   :  { %v2040_v19 = vmul.f32 1.442695, %v1989_v54  ;;  %v1841_v28 = vadd.f32 %v1840_v5, %v1670_v32 }
 0x27f   :  { %v3928_v3 = vpop.eup %3927 }
 0x280   :  { %3931 = vpow2.f32 %v2040_v19  ;;  %v5852_v13 = vadd.f32 %v5707_v24, %v1841_v28  ;;  %v3930_v59 = vpop.eup %3929  ;;  %v2221_v20 = vmul.f32 0.6931472, %v3928_v3 }
 0x281   :  { %3933 = vpow2.f32 %v2038_v58  ;;  %v2212_v12 = vmul.f32 0.6931472, %v3930_v59 }
 0x282   :  { %v5868_v22 = vmul.f32 100.0, %v5852_v13  ;;  %v2227_v55 = vsel %vm2226_vm3, %v2224_v23, %v2221_v20 }
 0x283   :  { %v2218_v45 = vsel %vm2217_vm5, %v2215_v52, %v2212_v12  ;;  %v2371_v57 = vmul.f32 0.01, %v2227_v55  ;;  %v1674_v52 = vpop.permute.xlu1 %1673 }
 0x284   :  { %vm1958_vm0 = vcmp.gt.f32.partialorder %v5868_v22, 20.0  ;;  %v2370_v10 = vmul.f32 0.01, %v2218_v45 }
 0x285   :  { %v1842_v36 = vpop.f32.mrf.mxu1  ;;  %v1990_v53 = vsel %vm1958_vm0, 0.0, %v5868_v22  ;;  %v2403_v54 = vsel %vm1955_vm9, %v5782_v6, %v2371_v57 }
 0x286   :  { %v1843_v15 = vadd.f32 %v1842_v36, %v1672_v9  ;;  %v3932_v34 = vpop.eup %3931  ;;  %v2042_v26 = vmul.f32 1.442695, %v1990_v53  ;;  %v2402_v35 = vsel %vm1954_vm14, %v5768_v2, %v2370_v10 }
 0x287   :  { %v3934_v47 = vpop.eup %3933  ;;  %v2237_v33 = vadd.f32 1.0, %v3932_v34  ;;  %v2240_v62 = vmul.f32 -0.5, %v3932_v34  ;;  %v2426_v32 = vpack.c.bf16 %v2403_v54, %v2402_v35  ;;  %v2243_v28 = vand.u32 2147483647, %v3932_v34 }
 0x288   :  { %v2527_v51 = vpop.f32.mrf.mxu3  ;;  %v5871_v43 = vadd.f32 %v5707_v24, %v1843_v15  ;;  %v2228_v29 = vadd.f32 1.0, %v3934_v47  ;;  %v2231_v56 = vmul.f32 -0.5, %v3934_v47  ;;  %v2234_v41 = vand.u32 2147483647, %v3934_v47 }
 0x289   :  { %v5875_v61 = vadd.f32 %v5862_v0, %v2527_v51  ;;  %3935 = vlog2.f32 %v2237_v33  ;;  %v2241_v31 = vadd.f32 1.0, %v2240_v62  ;;  %vm2244_vm13 = vcmp.lt.f32.partialorder %v2243_v28, 0.0004427343 }
 0x28a   :  { %v5878_v11 = vmul.f32 100.0, %v5871_v43  ;;  %3512 = vmatmul.msk.bf16.gmra.mxu3 %vm919_vm12, %v2425_v21  ;;  %3937 = vlog2.f32 %v2228_v29  ;;  %v2232_v37 = vadd.f32 1.0, %v2231_v56  ;;  %vm2235_vm14 = vcmp.lt.f32.partialorder %v2234_v41, 0.0004427343 }
 0x28b   :  { %v5882_v40 = vmul.f32 100.0, %v5875_v61  ;;  %v2242_v60 = vmul.f32 %v3932_v34, %v2241_v31 }
 0x28c   :  { %vm1959_vm2 = vcmp.gt.f32.partialorder %v5878_v11, 20.0  ;;  %v2233_v48 = vmul.f32 %v3934_v47, %v2232_v37 }
 0x28d   :  { %vm2639_vm4 = vcmp.gt.f32.partialorder %v5882_v40, 20.0  ;;  %v1991_v42 = vsel %vm1959_vm2, 0.0, %v5878_v11 }
 0x28e   :  { %v2671_v4 = vsel %vm2639_vm4, 0.0, %v5882_v40  ;;  %v2044_v44 = vmul.f32 1.442695, %v1991_v42  ;;  %v3582_v42 = vld [vmem:[%s6807_s9 + $0x8] sm:$0xff] }
 0x28f   :  { %v2703_v18 = vmul.f32 1.442695, %v2671_v4  ;;  %v3936_v49 = vpop.eup %3935  ;;  %3225 = vmatpush.bf16.msrb.mxu2 %v3582_v42 }
 0x290   :  { %3939 = vpow2.f32 %v2044_v44  ;;  %v3938_v5 = vpop.eup %3937  ;;  %v2529_v25 = vpop.f32.mrf.mxu3  ;;  %v2239_v6 = vmul.f32 0.6931472, %v3936_v49 }
 0x291   :  { %3941 = vpow2.f32 %v2703_v18  ;;  %v5908_v58 = vadd.f32 %v5862_v0, %v2529_v25  ;;  %v2230_v50 = vmul.f32 0.6931472, %v3938_v5 }
 0x292   :  { %3943 = vpow2.f32 %v2042_v26  ;;  %v2245_v9 = vsel %vm2244_vm13, %v2242_v60, %v2239_v6 }
 0x293   :  { %v5913_v8 = vmul.f32 100.0, %v5908_v58  ;;  %v2236_v14 = vsel %vm2235_vm14, %v2233_v48, %v2230_v50  ;;  %v2373_v17 = vmul.f32 0.01, %v2245_v9 }
 0x294   :  { %v2372_v51 = vmul.f32 0.01, %v2236_v14 }
 0x295   :  { %vm2640_vm8 = vcmp.gt.f32.partialorder %v5913_v8, 20.0  ;;  %v2405_v46 = vsel %vm1957_vm6, %v5820_v30, %v2373_v17 }
 0x296   :  { %v5905_v19 = vpop.eup %3939  ;;  %v2672_v3 = vsel %vm2640_vm8, 0.0, %v5913_v8  ;;  %v2404_v23 = vsel %vm1956_vm7, %v5807_v39, %v2372_v51 }
 0x297   :  { %v5910_v16 = vpop.eup %3941  ;;  %v2255_v63 = vadd.f32 1.0, %v5905_v19  ;;  %v2705_v21 = vmul.f32 1.442695, %v2672_v3  ;;  %v2258_v34 = vmul.f32 -0.5, %v5905_v19  ;;  %v2261_v1 = vand.u32 2147483647, %v5905_v19 }
 0x298   :  { %v3944_v2 = vpop.eup %3943  ;;  %v2767_v36 = vadd.f32 1.0, %v5910_v16  ;;  %v2770_v20 = vmul.f32 -0.5, %v5910_v16  ;;  %v2427_v57 = vpack.c.bf16 %v2405_v46, %v2404_v23  ;;  %v2773_v35 = vand.u32 2147483647, %v5910_v16 }
 0x299   :  { %v2246_v15 = vadd.f32 1.0, %v3944_v2  ;;  %3945 = vlog2.f32 %v2255_v63  ;;  %v2249_v7 = vmul.f32 -0.5, %v3944_v2  ;;  %v2252_v33 = vand.u32 2147483647, %v3944_v2  ;;  %v1676_v63 = vpop.permute.xlu2 %1675 }
 0x29a   :  { %3513 = vmatmul.msk.bf16.gmra.mxu3 %vm919_vm12, %v2426_v32  ;;  %3947 = vpow2.f32 %v2705_v21  ;;  %v2259_v53 = vadd.f32 1.0, %v2258_v34  ;;  %v2771_v39 = vadd.f32 1.0, %v2770_v20  ;;  %vm5959_vm11 = vcmp.lt.f32.partialorder %v2261_v1, 0.0004427343 }
 0x29b   :  { %3949 = vlog2.f32 %v2767_v36  ;;  %v2250_v4 = vadd.f32 1.0, %v2249_v7  ;;  %vm5947_vm10 = vcmp.lt.f32.partialorder %v2252_v33, 0.0004427343  ;;  %vm5971_vm6 = vcmp.lt.f32.partialorder %v2773_v35, 0.0004427343 }
 0x29c   :  { %3951 = vlog2.f32 %v2246_v15  ;;  %v2260_v31 = vmul.f32 %v5905_v19, %v2259_v53  ;;  %v2772_v19 = vmul.f32 %v5910_v16, %v2771_v39  ;;  %v1678_v53 = vpop.permute.xlu0 %1677 }
 0x29d   :  { %v2251_v28 = vmul.f32 %v3944_v2, %v2250_v4  ;;  %v3581_v4 = vld [vmem:[%s6807_s9] sm:$0xff] }
 0x29e   :  { %v2532_v27 = vpop.f32.mrf.mxu3  ;;  %3226 = vmatpush.bf16.msrb.mxu2 %v3581_v4 }
 0x29f   :  { %v5923_v59 = vadd.f32 %v5862_v0, %v2532_v27  ;;  %v3946_v12 = vpop.eup %3945 }
 0x2a0   :  { %v3948_v55 = vpop.eup %3947  ;;  %v2257_v26 = vmul.f32 0.6931472, %v3946_v12 }
 0x2a1   :  { %v5928_v47 = vmul.f32 100.0, %v5923_v59  ;;  %v3950_v38 = vpop.eup %3949  ;;  %v2776_v45 = vadd.f32 1.0, %v3948_v55  ;;  %v2779_v62 = vmul.f32 -0.5, %v3948_v55  ;;  %v2782_v9 = vand.u32 2147483647, %v3948_v55 }
 0x2a2   :  { %v3952_v18 = vpop.eup %3951  ;;  %v2769_v32 = vmul.f32 0.6931472, %v3950_v38  ;;  %v2263_v50 = vsel %vm5959_vm11, %v2260_v31, %v2257_v26 }
 0x2a3   :  { %vm2641_vm9 = vcmp.gt.f32.partialorder %v5928_v47, 20.0  ;;  %3953 = vlog2.f32 %v2776_v45  ;;  %v2248_v37 = vmul.f32 0.6931472, %v3952_v18  ;;  %v2780_v60 = vadd.f32 1.0, %v2779_v62 }
 0x2a4   :  { %v2673_v30 = vsel %vm2641_vm9, 0.0, %v5928_v47  ;;  %v2775_v3 = vsel %vm5971_vm6, %v2772_v19, %v2769_v32  ;;  %v2375_v27 = vmul.f32 0.01, %v2263_v50  ;;  %vm2783_vm1 = vcmp.lt.f32.partialorder %v2782_v9, 0.0004427343  ;;  %v1680_v50 = vpop.permute.xlu1 %1679 }
 0x2a5   :  { %v1845_v29 = vpop.f32.mrf.mxu2  ;;  %v2707_v56 = vmul.f32 1.442695, %v2673_v30  ;;  %v2254_v17 = vsel %vm5947_vm10, %v2251_v28, %v2248_v37  ;;  %v2781_v20 = vmul.f32 %v3948_v55, %v2780_v60  ;;  %v3055_v12 = vmul.f32 0.01, %v2775_v3 }
 0x2a6   :  { %v1846_v44 = vadd.f32 %v1845_v29, %v1674_v52  ;;  %v2534_v54 = vpop.f32.mrf.mxu3  ;;  %v2374_v23 = vmul.f32 0.01, %v2254_v17  ;;  %v2407_v55 = vsel %vm1959_vm2, %v5871_v43, %v2375_v27 }
 0x2a7   :  { %v5953_v5 = vadd.f32 %v5862_v0, %v2534_v54  ;;  %3955 = vpow2.f32 %v2707_v56 }
 0x2a8   :  { %v5945_v10 = vadd.f32 %v5707_v24, %v1846_v44  ;;  %v3087_v44 = vsel %vm2639_vm4, %v5875_v61, %v3055_v12  ;;  %v2406_v43 = vsel %vm1958_vm0, %v5852_v13, %v2374_v23 }
 0x2a9   :  { %v5965_v6 = vmul.f32 100.0, %v5953_v5  ;;  %v3954_v21 = vpop.eup %3953  ;;  %v2428_v8 = vpack.c.bf16 %v2407_v55, %v2406_v43 }
 0x2aa   :  { %v5957_v25 = vmul.f32 100.0, %v5945_v10  ;;  %3514 = vmatmul.msk.bf16.gmra.mxu3 %vm919_vm12, %v2427_v57  ;;  %v2778_v34 = vmul.f32 0.6931472, %v3954_v21 }
 0x2ab   :  { %vm2642_vm15 = vcmp.gt.f32.partialorder %v5965_v6, 20.0 }
 0x2ac   :  { %vm1960_vm7 = vcmp.gt.f32.partialorder %v5957_v25, 20.0  ;;  %v2674_v15 = vsel %vm2642_vm15, 0.0, %v5965_v6  ;;  %v2784_v33 = vsel %vm2783_vm1, %v2781_v20, %v2778_v34 }
 0x2ad   :  { %v1992_v48 = vsel %vm1960_vm7, 0.0, %v5957_v25  ;;  %v1847_v36 = vpop.f32.mrf.mxu2  ;;  %v2709_v51 = vmul.f32 1.442695, %v2674_v15  ;;  %v3956_v7 = vpop.eup %3955  ;;  %v3056_v42 = vmul.f32 0.01, %v2784_v33 }
 0x2ae   :  { %v2046_v16 = vmul.f32 1.442695, %v1992_v48  ;;  %v1848_v14 = vadd.f32 %v1847_v36, %v1676_v63  ;;  %v2785_v52 = vadd.f32 1.0, %v3956_v7  ;;  %v2788_v39 = vmul.f32 -0.5, %v3956_v7 }
 0x2af   :  { %v3088_v30 = vsel %vm2640_vm8, %v5908_v58, %v3056_v42  ;;  %v2791_v56 = vand.u32 2147483647, %v3956_v7 }
 0x2b0   :  { %3957 = vpow2.f32 %v2046_v16  ;;  %v5987_v46 = vadd.f32 %v5707_v24, %v1848_v14  ;;  %v3119_v45 = vpack.c.bf16 %v3088_v30, %v3087_v44  ;;  %v2789_v49 = vadd.f32 1.0, %v2788_v39 }
 0x2b1   :  { %3959 = vpow2.f32 %v2709_v51  ;;  %vm6030_vm4 = vcmp.lt.f32.partialorder %v2791_v56, 0.0004427343 }
 0x2b2   :  { %v5990_v29 = vmul.f32 100.0, %v5987_v46  ;;  %3961 = vlog2.f32 %v2785_v52  ;;  %3537 = vmatmul.msk.bf16.vlgmr.msrb.gmra.mxu2 %vm919_vm12, %v3119_v45  ;;  %v2790_v2 = vmul.f32 %v3956_v7, %v2789_v49 }
 0x2b4   :  { %vm1961_vm3 = vcmp.gt.f32.partialorder %v5990_v29, 20.0  ;;  %v2537_v61 = vpop.f32.mrf.mxu3 }
 0x2b5   :  { %v1993_v38 = vsel %vm1961_vm3, 0.0, %v5990_v29  ;;  %v1850_v1 = vpop.f32.mrf.mxu2  ;;  %v6012_v58 = vadd.f32 %v5862_v0, %v2537_v61  ;;  %v1682_v61 = vpop.permute.xlu2 %1681 }
 0x2b6   :  { %v3958_v11 = vpop.eup %3957  ;;  %v2048_v57 = vmul.f32 1.442695, %v1993_v38  ;;  %v1851_v40 = vadd.f32 %v1850_v1, %v1678_v53 }
 0x2b7   :  { %v3960_v18 = vpop.eup %3959  ;;  %v2264_v26 = vadd.f32 1.0, %v3958_v11  ;;  %v6019_v13 = vmul.f32 100.0, %v6012_v58  ;;  %v2267_v32 = vmul.f32 -0.5, %v3958_v11  ;;  %v2270_v36 = vand.u32 2147483647, %v3958_v11 }
 0x2b8   :  { %3963 = vpow2.f32 %v2048_v57  ;;  %v6015_v62 = vadd.f32 %v5707_v24, %v1851_v40  ;;  %v2794_v54 = vadd.f32 1.0, %v3960_v18  ;;  %v3962_v22 = vpop.eup %3961  ;;  %v2797_v35 = vmul.f32 -0.5, %v3960_v18 }
 0x2b9   :  { %3965 = vlog2.f32 %v2264_v26  ;;  %vm2643_vm0 = vcmp.gt.f32.partialorder %v6019_v13, 20.0  ;;  %v2787_v37 = vmul.f32 0.6931472, %v3962_v22  ;;  %v2800_v15 = vand.u32 2147483647, %v3960_v18 }
 0x2ba   :  { %v6022_v31 = vmul.f32 100.0, %v6015_v62  ;;  %3967 = vlog2.f32 %v2794_v54  ;;  %3515 = vmatmul.msk.bf16.gmra.mxu3 %vm919_vm12, %v2428_v8  ;;  %v2675_v28 = vsel %vm2643_vm0, 0.0, %v6019_v13  ;;  %v2798_v48 = vadd.f32 1.0, %v2797_v35 }
 0x2bb   :  { %v2711_v63 = vmul.f32 1.442695, %v2675_v28  ;;  %v2268_v17 = vadd.f32 1.0, %v2267_v32  ;;  %v2793_v51 = vsel %vm6030_vm4, %v2790_v2, %v2787_v37  ;;  %vm2801_vm5 = vcmp.lt.f32.partialorder %v2800_v15, 0.0004427343 }
 0x2bc   :  { %vm1962_vm2 = vcmp.gt.f32.partialorder %v6022_v31, 20.0  ;;  %v2539_v14 = vpop.f32.mrf.mxu3  ;;  %v2799_v33 = vmul.f32 %v3960_v18, %v2798_v48  ;;  %v3057_v55 = vmul.f32 0.01, %v2793_v51  ;;  %vm6051_vm13 = vcmp.lt.f32.partialorder %v2270_v36, 0.0004427343 }
 0x2bd   :  { %v1994_v19 = vsel %vm1962_vm2, 0.0, %v6022_v31  ;;  %v1852_v60 = vpop.f32.mrf.mxu2  ;;  %3969 = vpow2.f32 %v2711_v63  ;;  %v6043_v7 = vadd.f32 %v5862_v0, %v2539_v14  ;;  %v2269_v53 = vmul.f32 %v3958_v11, %v2268_v17 }
 0x2be   :  { %v3964_v9 = vpop.eup %3963  ;;  %v2050_v3 = vmul.f32 1.442695, %v1994_v19  ;;  %v1853_v16 = vadd.f32 %v1852_v60, %v1680_v50  ;;  %v3089_v56 = vsel %vm2641_vm9, %v5923_v59, %v3057_v55 }
 0x2bf   :  { %v3966_v21 = vpop.eup %3965  ;;  %v2273_v27 = vadd.f32 1.0, %v3964_v9  ;;  %v2276_v20 = vmul.f32 -0.5, %v3964_v9  ;;  %v6049_v4 = vmul.f32 100.0, %v6043_v7  ;;  %v2279_v45 = vand.u32 2147483647, %v3964_v9 }
 0x2c0   :  { %v3968_v34 = vpop.eup %3967  ;;  %3971 = vpow2.f32 %v2050_v3  ;;  %v6040_v12 = vadd.f32 %v5707_v24, %v1853_v16  ;;  %v2266_v52 = vmul.f32 0.6931472, %v3966_v21 }
 0x2c1   :  { %3973 = vlog2.f32 %v2273_v27  ;;  %v2796_v23 = vmul.f32 0.6931472, %v3968_v34  ;;  %v2277_v38 = vadd.f32 1.0, %v2276_v20  ;;  %vm2644_vm14 = vcmp.gt.f32.partialorder %v6049_v4, 20.0 }
 0x2c2   :  { %v6046_v42 = vmul.f32 100.0, %v6040_v12  ;;  %v2272_v43 = vsel %vm6051_vm13, %v2269_v53, %v2266_v52  ;;  %v2676_v57 = vsel %vm2644_vm14, 0.0, %v6049_v4  ;;  %vm2280_vm10 = vcmp.lt.f32.partialorder %v2279_v45, 0.0004427343 }
 0x2c3   :  { %v2802_v30 = vsel %vm2801_vm5, %v2799_v33, %v2796_v23  ;;  %v6057_v39 = vpop.eup %3969  ;;  %v2713_v8 = vmul.f32 1.442695, %v2676_v57  ;;  %v2278_v41 = vmul.f32 %v3964_v9, %v2277_v38  ;;  %v2376_v19 = vmul.f32 0.01, %v2272_v43 }
 0x2c4   :  { %vm1963_vm8 = vcmp.gt.f32.partialorder %v6046_v42, 20.0  ;;  %v3058_v1 = vmul.f32 0.01, %v2802_v30  ;;  %v2803_v37 = vadd.f32 1.0, %v6057_v39  ;;  %v2809_v17 = vand.u32 2147483647, %v6057_v39 }
 0x2c5   :  { %v1995_v11 = vsel %vm1963_vm8, 0.0, %v6046_v42  ;;  %v1855_v26 = vpop.f32.mrf.mxu2  ;;  %v2408_v2 = vsel %vm1960_vm7, %v5945_v10, %v2376_v19  ;;  %v1684_v10 = vpop.permute.xlu0 %1683 }
 0x2c6   :  { %v3972_v40 = vpop.eup %3971  ;;  %v2052_v18 = vmul.f32 1.442695, %v1995_v11  ;;  %v3090_v54 = vsel %vm2642_vm15, %v5953_v5, %v3058_v1  ;;  %v1856_v32 = vadd.f32 %v1855_v26, %v1682_v61  ;;  %v2806_v5 = vmul.f32 -0.5, %v6057_v39 }
 0x2c7   :  { %v3974_v22 = vpop.eup %3973  ;;  %v2282_v49 = vadd.f32 1.0, %v3972_v40  ;;  %v2285_v35 = vmul.f32 -0.5, %v3972_v40  ;;  %v3120_v50 = vpack.c.bf16 %v3090_v54, %v3089_v56  ;;  %v2288_v9 = vand.u32 2147483647, %v3972_v40 }
 0x2c8   :  { %v2275_v28 = vmul.f32 0.6931472, %v3974_v22  ;;  %3975 = vpow2.f32 %v2052_v18  ;;  %v6075_v47 = vadd.f32 %v5707_v24, %v1856_v32  ;;  %v2807_v21 = vadd.f32 1.0, %v2806_v5  ;;  %v1686_v18 = vpop.permute.xlu1 %1685 }
 0x2c9   :  { %3977 = vlog2.f32 %v2282_v49  ;;  %3538 = vmatmul.msk.bf16.gmra.mxu2 %vm919_vm12, %v3120_v50  ;;  %v2286_v60 = vadd.f32 1.0, %v2285_v35  ;;  %vm6097_vm11 = vcmp.lt.f32.partialorder %v2288_v9, 0.0004427343  ;;  %vm6110_vm7 = vcmp.lt.f32.partialorder %v2809_v17, 0.0004427343 }
 0x2ca   :  { %v2281_v59 = vsel %vm2280_vm10, %v2278_v41, %v2275_v28  ;;  %3979 = vpow2.f32 %v2713_v8  ;;  %v6080_v63 = vmul.f32 100.0, %v6075_v47  ;;  %v2808_v11 = vmul.f32 %v6057_v39, %v2807_v21 }
 0x2cb   :  { %v2377_v6 = vmul.f32 0.01, %v2281_v59  ;;  %3981 = vlog2.f32 %v2803_v37  ;;  %v2287_v27 = vmul.f32 %v3972_v40, %v2286_v60 }
 0x2cc   :  { %vm1964_vm9 = vcmp.gt.f32.partialorder %v6080_v63, 20.0 }
 0x2cd   :  { %v2409_v48 = vsel %vm1961_vm3, %v5987_v46, %v2377_v6  ;;  %v1996_v3 = vsel %vm1964_vm9, 0.0, %v6080_v63  ;;  %v1857_v16 = vpop.f32.mrf.mxu2  ;;  %v2542_v14 = vpop.f32.mrf.mxu3 }
 0x2ce   :  { %v3976_v36 = vpop.eup %3975  ;;  %v2429_v15 = vpack.c.bf16 %v2409_v48, %v2408_v2  ;;  %v2054_v46 = vmul.f32 1.442695, %v1996_v3  ;;  %v1858_v23 = vadd.f32 %v1857_v16, %v1684_v10  ;;  %v6094_v33 = vadd.f32 %v5862_v0, %v2542_v14  ;;  %v6142_v14 = vld [vmem:[%s6804_s6] ss:$0 sm:$0xff] }
 0x2cf   :  { %v3978_v25 = vpop.eup %3977  ;;  %v2291_v51 = vadd.f32 1.0, %v3976_v36  ;;  %v2294_v29 = vmul.f32 -0.5, %v3976_v36  ;;  %v2297_v52 = vand.u32 2147483647, %v3976_v36 }
 0x2d0   :  { %v3980_v34 = vpop.eup %3979  ;;  %v2284_v20 = vmul.f32 0.6931472, %v3978_v25  ;;  %3516 = vmatmul.msk.bf16.gmra.mxu3 %vm919_vm12, %v2429_v15  ;;  %v6104_v1 = vadd.f32 %v5707_v24, %v1858_v23  ;;  %v6107_v43 = vmul.f32 100.0, %v6094_v33 }
 0x2d1   :  { %v3982_v55 = vpop.eup %3981  ;;  %3983 = vlog2.f32 %v2291_v51  ;;  %v2295_v44 = vadd.f32 1.0, %v2294_v29  ;;  %v2812_v30 = vadd.f32 1.0, %v3980_v34  ;;  %vm6114_vm6 = vcmp.lt.f32.partialorder %v2297_v52, 0.0004427343  ;;  %v1688_v29 = vpop.permute.xlu2 %1687 }
 0x2d2   :  { %v2290_v38 = vsel %vm6097_vm11, %v2287_v27, %v2284_v20  ;;  %3985 = vpow2.f32 %v2054_v46  ;;  %v2805_v45 = vmul.f32 0.6931472, %v3982_v55  ;;  %v6119_v61 = vmul.f32 100.0, %v6104_v1 }
 0x2d3   :  { %3987 = vlog2.f32 %v2812_v30  ;;  %vm2645_vm15 = vcmp.gt.f32.partialorder %v6107_v43, 20.0  ;;  %v2815_v24 = vmul.f32 -0.5, %v3980_v34  ;;  %v2378_v26 = vmul.f32 0.01, %v2290_v38 }
 0x2d4   :  { %v2296_v8 = vmul.f32 %v3976_v36, %v2295_v44  ;;  %v2677_v39 = vsel %vm2645_vm15, 0.0, %v6107_v43  ;;  %v2811_v56 = vsel %vm6110_vm7, %v2808_v11, %v2805_v45  ;;  %vm1965_vm1 = vcmp.gt.f32.partialorder %v6119_v61, 20.0 }
 0x2d5   :  { %v2715_v54 = vmul.f32 1.442695, %v2677_v39  ;;  %v2544_v22 = vpop.f32.mrf.mxu3  ;;  %v1860_v49 = vpop.f32.mrf.mxu2  ;;  %v2816_v35 = vadd.f32 1.0, %v2815_v24  ;;  %v2818_v32 = vand.u32 2147483647, %v3980_v34  ;;  %v1997_v28 = vsel %vm1965_vm1, 0.0, %v6119_v61 }
 0x2d6   :  { %v6132_v41 = vadd.f32 %v5862_v0, %v2544_v22  ;;  %v1861_v50 = vadd.f32 %v1860_v49, %v1686_v18  ;;  %v3059_v19 = vmul.f32 0.01, %v2811_v56  ;;  %v2056_v6 = vmul.f32 1.442695, %v1997_v28 }
 0x2d7   :  { %v3984_v37 = vpop.eup %3983  ;;  %3989 = vpow2.f32 %v2715_v54  ;;  %v2817_v60 = vmul.f32 %v3980_v34, %v2816_v35  ;;  %v2410_v17 = vsel %vm1962_vm2, %v6015_v62, %v2378_v26  ;;  %vm2819_vm3 = vcmp.lt.f32.partialorder %v2818_v32, 0.0004427343 }
 0x2d8   :  { %v3986_v59 = vpop.eup %3985  ;;  %v2293_v5 = vmul.f32 0.6931472, %v3984_v37  ;;  %v6135_v3 = vmul.f32 100.0, %v6132_v41  ;;  %3991 = vpow2.f32 %v2056_v6  ;;  %v6145_v15 = vadd.f32 %v6142_v14, %v1861_v50 }
 0x2d9   :  { %v3988_v2 = vpop.eup %3987  ;;  %v2300_v48 = vadd.f32 1.0, %v3986_v59  ;;  %v2303_v9 = vmul.f32 -0.5, %v3986_v59  ;;  %v2306_v36 = vand.u32 2147483647, %v3986_v59 }
 0x2da   :  { %v2299_v16 = vsel %vm6114_vm6, %v2296_v8, %v2293_v5  ;;  %v2814_v21 = vmul.f32 0.6931472, %v3988_v2  ;;  %vm2646_vm4 = vcmp.gt.f32.partialorder %v6135_v3, 20.0  ;;  %v6152_v27 = vmul.f32 100.0, %v6145_v15 }
 0x2db   :  { %v2379_v25 = vmul.f32 0.01, %v2299_v16  ;;  %3993 = vlog2.f32 %v2300_v48  ;;  %v2304_v10 = vadd.f32 1.0, %v2303_v9  ;;  %vm6157_vm5 = vcmp.lt.f32.partialorder %v2306_v36, 0.0004427343 }
 0x2dc   :  { %v2820_v51 = vsel %vm2819_vm3, %v2817_v60, %v2814_v21  ;;  %v2678_v62 = vsel %vm2646_vm4, 0.0, %v6135_v3  ;;  %vm1966_vm2 = vcmp.gt.f32.partialorder %v6152_v27, 20.0 }
 0x2dd   :  { %v2411_v46 = vsel %vm1963_vm8, %v6040_v12, %v2379_v25  ;;  %v3060_v31 = vmul.f32 0.01, %v2820_v51  ;;  %v6164_v20 = vpop.eup %3989  ;;  %v2717_v52 = vmul.f32 1.442695, %v2678_v62  ;;  %v2547_v23 = vpop.f32.mrf.mxu3  ;;  %v3091_v12 = vsel %vm2643_vm0, %v6012_v58, %v3059_v19 }
 0x2de   :  { %v2430_v55 = vpack.c.bf16 %v2411_v46, %v2410_v17  ;;  %v1862_v53 = vpop.f32.mrf.mxu2  ;;  %v1998_v42 = vsel %vm1966_vm2, 0.0, %v6152_v27  ;;  %v6174_v44 = vadd.f32 %v5862_v0, %v2547_v23  ;;  %v3992_v45 = vpop.eup %3991  ;;  %v2305_v11 = vmul.f32 %v3986_v59, %v2304_v10 }
 0x2df   :  { %v1863_v30 = vadd.f32 %v1862_v53, %v1688_v29  ;;  %v3092_v38 = vsel %vm2644_vm14, %v6043_v7, %v3060_v31  ;;  %3995 = vpow2.f32 %v2717_v52  ;;  %v2058_v57 = vmul.f32 1.442695, %v1998_v42  ;;  %v1690_v59 = vpop.permute.xlu0 %1689 }
 0x2e0   :  { %3517 = vmatmul.msk.bf16.gmra.mxu3 %vm919_vm12, %v2430_v55  ;;  %v3121_v13 = vpack.c.bf16 %v3092_v38, %v3091_v12  ;;  %v2309_v40 = vadd.f32 1.0, %v3992_v45  ;;  %v2312_v24 = vmul.f32 -0.5, %v3992_v45  ;;  %v6181_v18 = vmul.f32 100.0, %v6174_v44 }
 0x2e1   :  { %v3994_v58 = vpop.eup %3993  ;;  %v2821_v26 = vadd.f32 1.0, %v6164_v20  ;;  %v2315_v39 = vand.u32 2147483647, %v3992_v45  ;;  %3997 = vpow2.f32 %v2058_v57  ;;  %v6185_v7 = vadd.f32 %v6142_v14, %v1863_v30 }
 0x2e2   :  { %v2302_v8 = vmul.f32 0.6931472, %v3994_v58  ;;  %3539 = vmatmul.msk.bf16.gmra.mxu2 %vm919_vm12, %v3121_v13  ;;  %3999 = vlog2.f32 %v2309_v40  ;;  %v2313_v4 = vadd.f32 1.0, %v2312_v24  ;;  %vm2647_vm0 = vcmp.gt.f32.partialorder %v6181_v18, 20.0  ;;  %v1692_v13 = vpop.permute.xlu1 %1691 }
 0x2e3   :  { %v2824_v56 = vmul.f32 -0.5, %v6164_v20  ;;  %v2679_v22 = vsel %vm2647_vm0, 0.0, %v6181_v18  ;;  %v6196_v49 = vmul.f32 100.0, %v6185_v7  ;;  %4001 = vlog2.f32 %v2821_v26 }
 0x2e4   :  { %v2308_v54 = vsel %vm6157_vm5, %v2305_v11, %v2302_v8  ;;  %v2719_v35 = vmul.f32 1.442695, %v2679_v22  ;;  %vm6200_vm13 = vcmp.lt.f32.partialorder %v2315_v39, 0.0004427343  ;;  %v2314_v5 = vmul.f32 %v3992_v45, %v2313_v4 }
 0x2e5   :  { %v6198_v32 = vpop.eup %3995  ;;  %v2380_v37 = vmul.f32 0.01, %v2308_v54  ;;  %vm1967_vm8 = vcmp.gt.f32.partialorder %v6196_v49, 20.0  ;;  %v2549_v50 = vpop.f32.mrf.mxu3  ;;  %v2825_v2 = vadd.f32 1.0, %v2824_v56  ;;  %v2827_v16 = vand.u32 2147483647, %v6164_v20 }
 0x2e6   :  { %v1865_v19 = vpop.f32.mrf.mxu2  ;;  %v1999_v6 = vsel %vm1967_vm8, 0.0, %v6196_v49  ;;  %v6209_v60 = vadd.f32 %v5862_v0, %v2549_v50  ;;  %4003 = vpow2.f32 %v2719_v35  ;;  %v2830_v34 = vadd.f32 1.0, %v6198_v32 }
 0x2e7   :  { %v3998_v48 = vpop.eup %3997  ;;  %v2060_v9 = vmul.f32 1.442695, %v1999_v6  ;;  %v1866_v36 = vadd.f32 %v1865_v19, %v1690_v59  ;;  %v2412_v31 = vsel %vm1964_vm9, %v6075_v47, %v2380_v37  ;;  %v2826_v52 = vmul.f32 %v6164_v20, %v2825_v2 }
 0x2e8   :  { %v4000_v21 = vpop.eup %3999  ;;  %v2318_v17 = vadd.f32 1.0, %v3998_v48  ;;  %v2321_v25 = vmul.f32 -0.5, %v3998_v48  ;;  %v2324_v10 = vand.u32 2147483647, %v3998_v48  ;;  %v6213_v51 = vmul.f32 100.0, %v6209_v60 }
 0x2e9   :  { %v2311_v29 = vmul.f32 0.6931472, %v4000_v21  ;;  %4005 = vpow2.f32 %v2060_v9  ;;  %v6216_v46 = vadd.f32 %v6142_v14, %v1866_v36  ;;  %v4002_v62 = vpop.eup %4001  ;;  %vm6232_vm10 = vcmp.lt.f32.partialorder %v2827_v16, 0.0004427343 }
 0x2ea   :  { %4007 = vlog2.f32 %v2318_v17  ;;  %vm2648_vm14 = vcmp.gt.f32.partialorder %v6213_v51, 20.0  ;;  %v2322_v63 = vadd.f32 1.0, %v2321_v25  ;;  %vm6238_vm9 = vcmp.lt.f32.partialorder %v2324_v10, 0.0004427343 }
 0x2eb   :  { %v2317_v23 = vsel %vm6200_vm13, %v2314_v5, %v2311_v29  ;;  %v2680_v55 = vsel %vm2648_vm14, 0.0, %v6213_v51  ;;  %v6230_v53 = vmul.f32 100.0, %v6216_v46  ;;  %4009 = vlog2.f32 %v2830_v34 }
 0x2ec   :  { %v2381_v47 = vmul.f32 0.01, %v2317_v23  ;;  %v2721_v42 = vmul.f32 1.442695, %v2680_v55  ;;  %v6236_v30 = vpop.eup %4003  ;;  %v2823_v11 = vmul.f32 0.6931472, %v4002_v62  ;;  %v2323_v28 = vmul.f32 %v3998_v48, %v2322_v63 }
 0x2ed   :  { %vm1968_vm11 = vcmp.gt.f32.partialorder %v6230_v53, 20.0  ;;  %v2552_v38 = vpop.f32.mrf.mxu3  ;;  %v2833_v57 = vmul.f32 -0.5, %v6198_v32  ;;  %v2836_v26 = vand.u32 2147483647, %v6198_v32  ;;  %v2839_v25 = vadd.f32 1.0, %v6236_v30 }
 0x2ee   :  { %v1867_v45 = vpop.f32.mrf.mxu2  ;;  %v2413_v58 = vsel %vm1965_vm1, %v6104_v1, %v2381_v47  ;;  %v2000_v40 = vsel %vm1968_vm11, 0.0, %v6230_v53  ;;  %v6251_v24 = vadd.f32 %v5862_v0, %v2552_v38  ;;  %4011 = vpow2.f32 %v2721_v42 }
 0x2ef   :  { %v4006_v8 = vpop.eup %4005  ;;  %v2062_v39 = vmul.f32 1.442695, %v2000_v40  ;;  %v2431_v4 = vpack.c.bf16 %v2413_v58, %v2412_v31  ;;  %v1868_v56 = vadd.f32 %v1867_v45, %v1692_v13  ;;  %v2834_v54 = vadd.f32 1.0, %v2833_v57 }
 0x2f0   :  { %v4008_v22 = vpop.eup %4007  ;;  %v2327_v35 = vadd.f32 1.0, %v4006_v8  ;;  %v2330_v37 = vmul.f32 -0.5, %v4006_v8  ;;  %v6255_v1 = vmul.f32 100.0, %v6251_v24  ;;  %v2333_v59 = vand.u32 2147483647, %v4006_v8 }
 0x2f1   :  { %v2320_v61 = vmul.f32 0.6931472, %v4008_v22  ;;  %4013 = vpow2.f32 %v2062_v39  ;;  %3518 = vmatmul.msk.bf16.gmra.mxu3 %vm919_vm12, %v2431_v4  ;;  %v6259_v50 = vadd.f32 %v6142_v14, %v1868_v56  ;;  %v4010_v19 = vpop.eup %4009  ;;  %v2829_v5 = vsel %vm6232_vm10, %v2826_v52, %v2823_v11 }
 0x2f2   :  { %4015 = vlog2.f32 %v2327_v35  ;;  %vm2649_vm7 = vcmp.gt.f32.partialorder %v6255_v1, 20.0  ;;  %v2832_v48 = vmul.f32 0.6931472, %v4010_v19  ;;  %v2835_v9 = vmul.f32 %v6198_v32, %v2834_v54 }
 0x2f3   :  { %v2681_v6 = vsel %vm2649_vm7, 0.0, %v6255_v1  ;;  %v6268_v2 = vmul.f32 100.0, %v6259_v50  ;;  %v2326_v14 = vsel %vm6238_vm9, %v2323_v28, %v2320_v61  ;;  %v2331_v36 = vadd.f32 1.0, %v2330_v37 }
 0x2f4   :  { %v2723_v16 = vmul.f32 1.442695, %v2681_v6  ;;  %vm2837_vm6 = vcmp.lt.f32.partialorder %v2836_v26, 0.0004427343  ;;  %v6275_v10 = vpop.eup %4011  ;;  %vm6277_vm3 = vcmp.lt.f32.partialorder %v2333_v59, 0.0004427343  ;;  %4017 = vlog2.f32 %v2839_v25 }
 0x2f5   :  { %vm1969_vm1 = vcmp.gt.f32.partialorder %v6268_v2, 20.0  ;;  %v2554_v21 = vpop.f32.mrf.mxu3  ;;  %v2838_v17 = vsel %vm2837_vm6, %v2835_v9, %v2832_v48  ;;  %v3061_v62 = vmul.f32 0.01, %v2829_v5  ;;  %v2382_v52 = vmul.f32 0.01, %v2326_v14 }
 0x2f6   :  { %v2001_v32 = vsel %vm1969_vm1, 0.0, %v6268_v2  ;;  %v6285_v34 = vadd.f32 %v5862_v0, %v2554_v21  ;;  %v3062_v55 = vmul.f32 0.01, %v2838_v17  ;;  %v2332_v47 = vmul.f32 %v4006_v8, %v2331_v36 }
 0x2f7   :  { %v4014_v31 = vpop.eup %4013  ;;  %v2064_v23 = vmul.f32 1.442695, %v2001_v32  ;;  %4019 = vpow2.f32 %v2723_v16  ;;  %v2842_v45 = vmul.f32 -0.5, %v6236_v30  ;;  %v3093_v57 = vsel %vm2645_vm15, %v6094_v33, %v3061_v62 }
 0x2f8   :  { %v4016_v12 = vpop.eup %4015  ;;  %v2336_v63 = vadd.f32 1.0, %v4014_v31  ;;  %v6288_v42 = vmul.f32 100.0, %v6285_v34  ;;  %v3094_v38 = vsel %vm2646_vm4, %v6132_v41, %v3062_v55  ;;  %v2339_v11 = vmul.f32 -0.5, %v4014_v31 }
 0x2f9   :  { %v2329_v20 = vmul.f32 0.6931472, %v4016_v12  ;;  %4021 = vpow2.f32 %v2064_v23  ;;  %v3122_v40 = vpack.c.bf16 %v3094_v38, %v3093_v57  ;;  %v2843_v3 = vadd.f32 1.0, %v2842_v45 }
 0x2fa   :  { %4023 = vlog2.f32 %v2336_v63  ;;  %vm2650_vm5 = vcmp.gt.f32.partialorder %v6288_v42, 20.0  ;;  %v2414_v41 = vsel %vm1966_vm2, %v6145_v15, %v2382_v52  ;;  %v4018_v39 = vpop.eup %4017  ;;  %v2342_v4 = vand.u32 2147483647, %v4014_v31 }
 0x2fb   :  { %v2335_v13 = vsel %vm6277_vm3, %v2332_v47, %v2329_v20  ;;  %v2682_v58 = vsel %vm2650_vm5, 0.0, %v6288_v42  ;;  %3540 = vmatmul.msk.bf16.gmra.mxu2 %vm919_vm12, %v3122_v40  ;;  %v2845_v43 = vand.u32 2147483647, %v6236_v30  ;;  %v2848_v56 = vadd.f32 1.0, %v6275_v10  ;;  %v6345_v47 = vld [vmem:[%s6806_s8] ss:$0 sm:$0xff] }
 0x2fc   :  { %v2383_v26 = vmul.f32 0.01, %v2335_v13  ;;  %v2725_v8 = vmul.f32 1.442695, %v2682_v58  ;;  %v2851_v54 = vmul.f32 -0.5, %v6275_v10  ;;  %v2340_v61 = vadd.f32 1.0, %v2339_v11 }
 0x2fd   :  { %v2557_v33 = vpop.f32.mrf.mxu3  ;;  %v6310_v22 = vpop.eup %4019  ;;  %v2841_v35 = vmul.f32 0.6931472, %v4018_v39  ;;  %v2844_v19 = vmul.f32 %v6236_v30, %v2843_v3  ;;  %vm6323_vm15 = vcmp.lt.f32.partialorder %v2845_v43, 0.0004427343  ;;  %vm6327_vm4 = vcmp.lt.f32.partialorder %v2342_v4, 0.0004427343 }
 0x2fe   :  { %v2415_v27 = vsel %vm1967_vm8, %v6185_v7, %v2383_v26  ;;  %4025 = vpow2.f32 %v2725_v8  ;;  %v6316_v15 = vadd.f32 %v5862_v0, %v2557_v33  ;;  %v2852_v9 = vadd.f32 1.0, %v2851_v54 }
 0x2ff   :  { %v4022_v37 = vpop.eup %4021  ;;  %v2432_v28 = vpack.c.bf16 %v2415_v27, %v2414_v41  ;;  %4027 = vlog2.f32 %v2848_v56  ;;  %v2847_v30 = vsel %vm6323_vm15, %v2844_v19, %v2841_v35  ;;  %v2341_v14 = vmul.f32 %v4014_v31, %v2340_v61 }
 0x300   :  { %v4024_v59 = vpop.eup %4023  ;;  %v2345_v5 = vadd.f32 1.0, %v4022_v37  ;;  %v2348_v6 = vmul.f32 -0.5, %v4022_v37  ;;  %v6320_v48 = vmul.f32 100.0, %v6316_v15  ;;  %v2854_v16 = vand.u32 2147483647, %v6275_v10 }
 0x301   :  { %v2338_v49 = vmul.f32 0.6931472, %v4024_v59  ;;  %3519 = vmatmul.msk.bf16.gmra.mxu3 %vm919_vm12, %v2432_v28  ;;  %v2857_v21 = vadd.f32 1.0, %v6310_v22  ;;  %v2351_v29 = vand.u32 2147483647, %v4022_v37  ;;  %v2853_v62 = vmul.f32 %v6275_v10, %v2852_v9 }
 0x302   :  { %4029 = vlog2.f32 %v2345_v5  ;;  %vm2651_vm2 = vcmp.gt.f32.partialorder %v6320_v48, 20.0  ;;  %v2349_v25 = vadd.f32 1.0, %v2348_v6  ;;  %v3063_v31 = vmul.f32 0.01, %v2847_v30 }
 0x303   :  { %v2683_v36 = vsel %vm2651_vm2, 0.0, %v6320_v48  ;;  %v2344_v23 = vsel %vm6327_vm4, %v2341_v14, %v2338_v49  ;;  %4031 = vlog2.f32 %v2857_v21  ;;  %v2860_v10 = vmul.f32 -0.5, %v6310_v22 }
 0x304   :  { %v4026_v17 = vpop.eup %4025  ;;  %v2727_v32 = vmul.f32 1.442695, %v2683_v36  ;;  %vm2855_vm13 = vcmp.lt.f32.partialorder %v2854_v16, 0.0004427343  ;;  %v2384_v13 = vmul.f32 0.01, %v2344_v23  ;;  %v2350_v40 = vmul.f32 %v4022_v37, %v2349_v25 }
 0x305   :  { %v4028_v52 = vpop.eup %4027  ;;  %v2559_v55 = vpop.f32.mrf.mxu3  ;;  %v2866_v12 = vadd.f32 1.0, %v4026_v17  ;;  %v2869_v38 = vmul.f32 -0.5, %v4026_v17  ;;  %vm2352_vm8 = vcmp.lt.f32.partialorder %v2351_v29, 0.0004427343  ;;  %v3095_v41 = vsel %vm2647_vm0, %v6174_v44, %v3063_v31 }
 0x306   :  { %4033 = vpow2.f32 %v2727_v32  ;;  %v6348_v63 = vadd.f32 %v6345_v47, %v2559_v55  ;;  %v2850_v20 = vmul.f32 0.6931472, %v4028_v52  ;;  %v2861_v26 = vadd.f32 1.0, %v2860_v10 }
 0x307   :  { %4035 = vlog2.f32 %v2866_v12  ;;  %v2870_v43 = vadd.f32 1.0, %v2869_v38  ;;  %v2872_v37 = vand.u32 2147483647, %v4026_v17  ;;  %v2416_v44 = vsel %vm1968_vm11, %v6216_v46, %v2384_v13 }
 0x308   :  { %v4030_v45 = vpop.eup %4029  ;;  %v6352_v11 = vmul.f32 100.0, %v6348_v63  ;;  %v2856_v57 = vsel %vm2855_vm13, %v2853_v62, %v2850_v20  ;;  %v2863_v28 = vand.u32 2147483647, %v6310_v22  ;;  %v2862_v46 = vmul.f32 %v6310_v22, %v2861_v26 }
 0x309   :  { %v2347_v58 = vmul.f32 0.6931472, %v4030_v45  ;;  %v3064_v3 = vmul.f32 0.01, %v2856_v57  ;;  %v4032_v8 = vpop.eup %4031  ;;  %v2871_v6 = vmul.f32 %v4026_v17, %v2870_v43  ;;  %vm2873_vm0 = vcmp.lt.f32.partialorder %v2872_v37, 0.0004427343 }
 0x30a   :  { %vm2652_vm10 = vcmp.gt.f32.partialorder %v6352_v11, 20.0  ;;  %v2859_v19 = vmul.f32 0.6931472, %v4032_v8  ;;  %vm3308_vm13 = vcmask 72704  }
 0x30b   :  { %v2353_v39 = vsel %vm2352_vm8, %v2350_v40, %v2347_v58  ;;  %v2684_v4 = vsel %vm2652_vm10, 0.0, %v6352_v11  ;;  %v3096_v33 = vsel %vm2648_vm14, %v6209_v60, %v3064_v3  ;;  %vm2864_vm14 = vcmp.lt.f32.partialorder %v2863_v28, 0.0004427343 }
 0x30c   :  { %v6364_v56 = vpop.eup %4033  ;;  %v2385_v54 = vmul.f32 0.01, %v2353_v39  ;;  %v2729_v27 = vmul.f32 1.442695, %v2684_v4  ;;  %v3123_v35 = vpack.c.bf16 %v3096_v33, %v3095_v41  ;;  %v2865_v2 = vsel %vm2864_vm14, %v2862_v46, %v2859_v19 }
 0x30d   :  { %v4036_v18 = vpop.eup %4035  ;;  %v2562_v61 = vpop.f32.mrf.mxu3  ;;  %v2875_v9 = vadd.f32 1.0, %v6364_v56  ;;  %v3065_v22 = vmul.f32 0.01, %v2865_v2  ;;  %v2878_v29 = vmul.f32 -0.5, %v6364_v56  ;;  %v2881_v45 = vand.u32 2147483647, %v6364_v56 }
 0x30e   :  { %v2417_v51 = vsel %vm1969_vm1, %v6259_v50, %v2385_v54  ;;  %4037 = vpow2.f32 %v2729_v27  ;;  %3541 = vmatmul.msk.bf16.gmra.mxu2 %vm919_vm12, %v3123_v35  ;;  %v6375_v60 = vadd.f32 %v6345_v47, %v2562_v61  ;;  %v2868_v5 = vmul.f32 0.6931472, %v4036_v18 }
 0x30f   :  { %v2433_v59 = vpack.c.bf16 %v2417_v51, %v2416_v44  ;;  %4039 = vlog2.f32 %v2875_v9  ;;  %v3097_v32 = vsel %vm2649_vm7, %v6251_v24, %v3065_v22  ;;  %v2879_v12 = vadd.f32 1.0, %v2878_v29 }
 0x310   :  { %v6378_v53 = vmul.f32 100.0, %v6375_v60  ;;  %v2874_v50 = vsel %vm2873_vm0, %v2871_v6, %v2868_v5  ;;  %vm2882_vm6 = vcmp.lt.f32.partialorder %v2881_v45, 0.0004427343 }
 0x311   :  { %3520 = vmatmul.msk.bf16.gmra.mxu3 %vm919_vm12, %v2433_v59  ;;  %v3066_v0 = vmul.f32 0.01, %v2874_v50  ;;  %v2880_v40 = vmul.f32 %v6364_v56, %v2879_v12  ;;  %v6463_v12 = vld [vmem:[%s6808_s10] ss:$0 sm:$0xff] }
 0x312   :  { %vm2653_vm9 = vcmp.gt.f32.partialorder %v6378_v53, 20.0 }
 0x313   :  { %v2685_v49 = vsel %vm2653_vm9, 0.0, %v6378_v53  ;;  %v3098_v17 = vsel %vm2650_vm5, %v6285_v34, %v3066_v0 }
 0x314   :  { %v4038_v7 = vpop.eup %4037  ;;  %v2731_v30 = vmul.f32 1.442695, %v2685_v49  ;;  %v3124_v52 = vpack.c.bf16 %v3098_v17, %v3097_v32 }
 0x315   :  { %v2564_v14 = vpop.f32.mrf.mxu3  ;;  %v2884_v36 = vadd.f32 1.0, %v4038_v7  ;;  %v2887_v21 = vmul.f32 -0.5, %v4038_v7  ;;  %v4040_v62 = vpop.eup %4039  ;;  %v2890_v34 = vand.u32 2147483647, %v4038_v7 }
 0x316   :  { %4041 = vpow2.f32 %v2731_v30  ;;  %v6388_v16 = vadd.f32 %v6345_v47, %v2564_v14  ;;  %v2877_v38 = vmul.f32 0.6931472, %v4040_v62 }
 0x317   :  { %4043 = vlog2.f32 %v2884_v36  ;;  %v2888_v23 = vadd.f32 1.0, %v2887_v21  ;;  %vm2891_vm7 = vcmp.lt.f32.partialorder %v2890_v34, 0.0004427343 }
 0x318   :  { %v6394_v25 = vmul.f32 100.0, %v6388_v16  ;;  %v2883_v41 = vsel %vm2882_vm6, %v2880_v40, %v2877_v38 }
 0x319   :  { %v2889_v57 = vmul.f32 %v4038_v7, %v2888_v23  ;;  %v3067_v54 = vmul.f32 0.01, %v2883_v41 }
 0x31a   :  { %vm2654_vm11 = vcmp.gt.f32.partialorder %v6394_v25, 20.0 }
 0x31b   :  { %v2686_v42 = vsel %vm2654_vm11, 0.0, %v6394_v25  ;;  %v3099_v44 = vsel %vm2651_vm2, %v6316_v15, %v3067_v54 }
 0x31c   :  { %v4042_v55 = vpop.eup %4041  ;;  %v2733_v31 = vmul.f32 1.442695, %v2686_v42 }
 0x31d   :  { %v4044_v20 = vpop.eup %4043  ;;  %v2567_v10 = vpop.f32.mrf.mxu3  ;;  %v2893_v13 = vadd.f32 1.0, %v4042_v55  ;;  %v2896_v37 = vmul.f32 -0.5, %v4042_v55  ;;  %v2899_v9 = vand.u32 2147483647, %v4042_v55 }
 0x31e   :  { %4045 = vpow2.f32 %v2733_v31  ;;  %3542 = vmatmul.msk.bf16.gmra.mxu2 %vm919_vm12, %v3124_v52  ;;  %v6407_v24 = vadd.f32 %v6345_v47, %v2567_v10  ;;  %v2886_v1 = vmul.f32 0.6931472, %v4044_v20 }
 0x31f   :  { %4047 = vlog2.f32 %v2893_v13  ;;  %vm2900_vm15 = vcmp.lt.f32.partialorder %v2899_v9, 0.0004427343 }
 0x320   :  { %v6410_v58 = vmul.f32 100.0, %v6407_v24  ;;  %v2892_v3 = vsel %vm2891_vm7, %v2889_v57, %v2886_v1 }
 0x321   :  { %v3068_v8 = vmul.f32 0.01, %v2892_v3 }
 0x322   :  { %vm2655_vm1 = vcmp.gt.f32.partialorder %v6410_v58, 20.0 }
 0x323   :  { %v2687_v26 = vsel %vm2655_vm1, 0.0, %v6410_v58  ;;  %v3100_v35 = vsel %vm2652_vm10, %v6348_v63, %v3068_v8  ;;  %v2897_v63 = vadd.f32 1.0, %v2896_v37 }
 0x324   :  { %v4046_v39 = vpop.eup %4045  ;;  %v2735_v4 = vmul.f32 1.442695, %v2687_v26  ;;  %v3125_v51 = vpack.c.bf16 %v3100_v35, %v3099_v44 }
 0x325   :  { %v2902_v33 = vadd.f32 1.0, %v4046_v39  ;;  %v2569_v43 = vpop.f32.mrf.mxu3  ;;  %v2905_v27 = vmul.f32 -0.5, %v4046_v39  ;;  %v4048_v61 = vpop.eup %4047  ;;  %v2908_v19 = vand.u32 2147483647, %v4046_v39  ;;  %v2898_v49 = vmul.f32 %v4042_v55, %v2897_v63 }
 0x326   :  { %4049 = vpow2.f32 %v2735_v4  ;;  %v6418_v56 = vadd.f32 %v6345_v47, %v2569_v43  ;;  %v2895_v46 = vmul.f32 0.6931472, %v4048_v61 }
 0x327   :  { %4051 = vlog2.f32 %v2902_v33  ;;  %v2906_v28 = vadd.f32 1.0, %v2905_v27  ;;  %vm2909_vm5 = vcmp.lt.f32.partialorder %v2908_v19, 0.0004427343 }
 0x328   :  { %v6424_v18 = vmul.f32 100.0, %v6418_v56  ;;  %v2901_v14 = vsel %vm2900_vm15, %v2898_v49, %v2895_v46 }
 0x329   :  { %v2907_v15 = vmul.f32 %v4046_v39, %v2906_v28  ;;  %v3069_v29 = vmul.f32 0.01, %v2901_v14 }
 0x32a   :  { %vm2656_vm3 = vcmp.gt.f32.partialorder %v6424_v18, 20.0 }
 0x32b   :  { %v2688_v59 = vsel %vm2656_vm3, 0.0, %v6424_v18  ;;  %v3101_v31 = vsel %vm2653_vm9, %v6375_v60, %v3069_v29 }
 0x32c   :  { %v6433_v11 = vpop.eup %4049  ;;  %v2737_v5 = vmul.f32 1.442695, %v2688_v59 }
 0x32d   :  { %v4052_v6 = vpop.eup %4051  ;;  %v2572_v50 = vpop.f32.mrf.mxu3  ;;  %v2911_v7 = vadd.f32 1.0, %v6433_v11  ;;  %v2914_v34 = vmul.f32 -0.5, %v6433_v11  ;;  %v2917_v40 = vand.u32 2147483647, %v6433_v11 }
 0x32e   :  { %v2904_v48 = vmul.f32 0.6931472, %v4052_v6  ;;  %4053 = vpow2.f32 %v2737_v5  ;;  %3543 = vmatmul.msk.bf16.gmra.mxu2 %vm919_vm12, %v3125_v51  ;;  %v6437_v2 = vadd.f32 %v6345_v47, %v2572_v50 }
 0x32f   :  { %4055 = vlog2.f32 %v2911_v7  ;;  %v2915_v53 = vadd.f32 1.0, %v2914_v34  ;;  %vm2918_vm10 = vcmp.lt.f32.partialorder %v2917_v40, 0.0004427343 }
 0x330   :  { %v2910_v0 = vsel %vm2909_vm5, %v2907_v15, %v2904_v48  ;;  %v6441_v30 = vmul.f32 100.0, %v6437_v2 }
 0x331   :  { %v3070_v22 = vmul.f32 0.01, %v2910_v0  ;;  %v2916_v4 = vmul.f32 %v6433_v11, %v2915_v53 }
 0x332   :  { %vm2657_vm4 = vcmp.gt.f32.partialorder %v6441_v30, 20.0 }
 0x333   :  { %v2689_v36 = vsel %vm2657_vm4, 0.0, %v6441_v30  ;;  %v3102_v42 = vsel %vm2654_vm11, %v6388_v16, %v3070_v22 }
 0x334   :  { %v4054_v21 = vpop.eup %4053  ;;  %v2739_v17 = vmul.f32 1.442695, %v2689_v36  ;;  %v3126_v10 = vpack.c.bf16 %v3102_v42, %v3101_v31 }
 0x335   :  { %v2920_v32 = vadd.f32 1.0, %v4054_v21  ;;  %v2574_v62 = vpop.f32.mrf.mxu3  ;;  %v2923_v52 = vmul.f32 -0.5, %v4054_v21  ;;  %v4056_v20 = vpop.eup %4055  ;;  %v2926_v38 = vand.u32 2147483647, %v4054_v21 }
 0x336   :  { %v6448_v23 = vadd.f32 %v6345_v47, %v2574_v62  ;;  %v3228_v16 = vpop.f32.mrf.mxu2  ;;  %v2913_v13 = vmul.f32 0.6931472, %v4056_v20 }
 0x337   :  { %4057 = vlog2.f32 %v2920_v32  ;;  %v2924_v25 = vadd.f32 1.0, %v2923_v52  ;;  %v3229_v1 = vadd.f32 %v6463_v12, %v3228_v16  ;;  %vm2927_vm8 = vcmp.lt.f32.partialorder %v2926_v38, 0.0004427343 }
 0x338   :  { %4059 = vpow2.f32 %v2739_v17  ;;  %v6455_v55 = vmul.f32 100.0, %v6448_v23  ;;  %v2919_v27 = vsel %vm2918_vm10, %v2916_v4, %v2913_v13 }
 0x339   :  { %3309 = vst.msk [vmem:[%s6809_s11] sm:$0xff] %vm3308_vm13, %v3229_v1  ;;  %v2925_v8 = vmul.f32 %v4054_v21, %v2924_v25  ;;  %v3071_v19 = vmul.f32 0.01, %v2919_v27 }
 0x33a   :  { %vm2658_vm2 = vcmp.gt.f32.partialorder %v6455_v55, 20.0 }
 0x33b   :  { %v2690_v45 = vsel %vm2658_vm2, 0.0, %v6455_v55  ;;  %v3103_v50 = vsel %vm2655_vm1, %v6407_v24, %v3071_v19 }
 0x33c   :  { %v2741_v60 = vmul.f32 1.442695, %v2690_v45 }
 0x33d   :  { %v4058_v57 = vpop.eup %4057  ;;  %v2577_v3 = vpop.f32.mrf.mxu3 }
 0x33e   :  { %v4060_v41 = vpop.eup %4059  ;;  %v2922_v26 = vmul.f32 0.6931472, %v4058_v57  ;;  %4061 = vpow2.f32 %v2741_v60  ;;  %3544 = vmatmul.msk.bf16.gmra.mxu2 %vm919_vm12, %v3126_v10  ;;  %v6477_v39 = vadd.f32 %v6345_v47, %v2577_v3  ;;  %v3230_v35 = vpop.f32.mrf.mxu2 }
 0x33f   :  { %v2929_v54 = vadd.f32 1.0, %v4060_v41  ;;  %v3231_v61 = vadd.f32 %v6463_v12, %v3230_v35  ;;  %v2932_v46 = vmul.f32 -0.5, %v4060_v41  ;;  %v2935_v36 = vand.u32 2147483647, %v4060_v41 }
 0x340   :  { %v2928_v33 = vsel %vm2927_vm8, %v2925_v8, %v2922_v26  ;;  %v6481_v43 = vmul.f32 100.0, %v6477_v39 }
 0x341   :  { %v3072_v37 = vmul.f32 0.01, %v2928_v33  ;;  %4063 = vlog2.f32 %v2929_v54  ;;  %3310 = vst.msk [vmem:[%s6809_s11 + $0x8] sm:$0xff] %vm3308_vm13, %v3231_v61  ;;  %v2933_v18 = vadd.f32 1.0, %v2932_v46  ;;  %vm2936_vm11 = vcmp.lt.f32.partialorder %v2935_v36, 0.0004427343 }
 0x342   :  { %vm2659_vm0 = vcmp.gt.f32.partialorder %v6481_v43, 20.0 }
 0x343   :  { %v2691_v44 = vsel %vm2659_vm0, 0.0, %v6481_v43  ;;  %v3104_v6 = vsel %vm2656_vm3, %v6418_v56, %v3072_v37  ;;  %v2934_v32 = vmul.f32 %v4060_v41, %v2933_v18 }
 0x344   :  { %v4062_v28 = vpop.eup %4061  ;;  %v2743_v51 = vmul.f32 1.442695, %v2691_v44  ;;  %v3127_v48 = vpack.c.bf16 %v3104_v6, %v3103_v50 }
 0x345   :  { %v2938_v59 = vadd.f32 1.0, %v4062_v28  ;;  %v2579_v11 = vpop.f32.mrf.mxu3  ;;  %v2941_v63 = vmul.f32 -0.5, %v4062_v28  ;;  %v2944_v0 = vand.u32 2147483647, %v4062_v28 }
 0x346   :  { %v6493_v5 = vadd.f32 %v6345_v47, %v2579_v11 }
 0x347   :  { %4065 = vlog2.f32 %v2938_v59  ;;  %v2942_v15 = vadd.f32 1.0, %v2941_v63  ;;  %v4064_v49 = vpop.eup %4063  ;;  %vm2945_vm9 = vcmp.lt.f32.partialorder %v2944_v0, 0.0004427343 }
 0x348   :  { %4067 = vpow2.f32 %v2743_v51  ;;  %v6499_v9 = vmul.f32 100.0, %v6493_v5  ;;  %v2931_v58 = vmul.f32 0.6931472, %v4064_v49 }
 0x349   :  { %v2943_v29 = vmul.f32 %v4062_v28, %v2942_v15 }
 0x34a   :  { %vm2660_vm14 = vcmp.gt.f32.partialorder %v6499_v9, 20.0  ;;  %v2937_v42 = vsel %vm2936_vm11, %v2934_v32, %v2931_v58 }
 0x34b   :  { %v2692_v56 = vsel %vm2660_vm14, 0.0, %v6499_v9  ;;  %v3073_v16 = vmul.f32 0.01, %v2937_v42 }
 0x34c   :  { %v2745_v7 = vmul.f32 1.442695, %v2692_v56  ;;  %v3233_v14 = vpop.f32.mrf.mxu2 }
 0x34d   :  { %v4066_v22 = vpop.eup %4065  ;;  %v3234_v21 = vadd.f32 %v6463_v12, %v3233_v14  ;;  %v3105_v40 = vsel %vm2657_vm4, %v6437_v2, %v3073_v16 }
 0x34e   :  { %v4068_v17 = vpop.eup %4067  ;;  %v2940_v24 = vmul.f32 0.6931472, %v4066_v22  ;;  %4069 = vpow2.f32 %v2745_v7  ;;  %3545 = vmatmul.msk.bf16.gmra.mxu2 %vm919_vm12, %v3127_v48 }
 0x34f   :  { %3311 = vst.msk [vmem:[%s6809_s11 + $0x10] sm:$0xff] %vm3308_vm13, %v3234_v21  ;;  %v2947_v52 = vadd.f32 1.0, %v4068_v17  ;;  %v2950_v57 = vmul.f32 -0.5, %v4068_v17  ;;  %v2953_v27 = vand.u32 2147483647, %v4068_v17 }
 0x350   :  { %v2946_v62 = vsel %vm2945_vm9, %v2943_v29, %v2940_v24 }
 0x351   :  { %v3074_v31 = vmul.f32 0.01, %v2946_v62  ;;  %4071 = vlog2.f32 %v2947_v52  ;;  %v2951_v33 = vadd.f32 1.0, %v2950_v57  ;;  %vm2954_vm3 = vcmp.lt.f32.partialorder %v2953_v27, 0.0004427343 }
 0x353   :  { %v2582_v34 = vpop.f32.mrf.mxu3  ;;  %v3106_v60 = vsel %vm2658_vm2, %v6448_v23, %v3074_v31  ;;  %v2952_v2 = vmul.f32 %v4068_v17, %v2951_v33 }
 0x354   :  { %v6515_v20 = vadd.f32 %v6345_v47, %v2582_v34  ;;  %v4070_v10 = vpop.eup %4069  ;;  %v3235_v25 = vpop.f32.mrf.mxu2  ;;  %v3128_v55 = vpack.c.bf16 %v3106_v60, %v3105_v40 }
 0x355   :  { %v2956_v38 = vadd.f32 1.0, %v4070_v10  ;;  %v2959_v1 = vmul.f32 -0.5, %v4070_v10  ;;  %v3236_v53 = vadd.f32 %v6463_v12, %v3235_v25  ;;  %v2962_v8 = vand.u32 2147483647, %v4070_v10 }
 0x356   :  { %v6518_v45 = vmul.f32 100.0, %v6515_v20 }
 0x357   :  { %4073 = vlog2.f32 %v2956_v38  ;;  %3312 = vst.msk [vmem:[%s6809_s11 + $0x18] sm:$0xff] %vm3308_vm13, %v3236_v53  ;;  %v2960_v23 = vadd.f32 1.0, %v2959_v1  ;;  %v4072_v26 = vpop.eup %4071  ;;  %vm2963_vm6 = vcmp.lt.f32.partialorder %v2962_v8, 0.0004427343 }
 0x358   :  { %vm2661_vm7 = vcmp.gt.f32.partialorder %v6518_v45, 20.0  ;;  %v2949_v37 = vmul.f32 0.6931472, %v4072_v26 }
 0x359   :  { %v2693_v13 = vsel %vm2661_vm7, 0.0, %v6518_v45  ;;  %v2961_v30 = vmul.f32 %v4070_v10, %v2960_v23 }
 0x35a   :  { %v2747_v3 = vmul.f32 1.442695, %v2693_v13  ;;  %v2955_v59 = vsel %vm2954_vm3, %v2952_v2, %v2949_v37 }
 0x35b   :  { %v2584_v41 = vpop.f32.mrf.mxu3  ;;  %v3075_v48 = vmul.f32 0.01, %v2955_v59 }
 0x35c   :  { %4075 = vpow2.f32 %v2747_v3  ;;  %v6536_v4 = vadd.f32 %v6345_v47, %v2584_v41 }
 0x35d   :  { %v4074_v54 = vpop.eup %4073  ;;  %v3107_v14 = vsel %vm2659_vm0, %v6477_v39, %v3075_v48 }
 0x35e   :  { %v6539_v35 = vmul.f32 100.0, %v6536_v4  ;;  %v2958_v44 = vmul.f32 0.6931472, %v4074_v54  ;;  %3546 = vmatmul.msk.bf16.gmra.mxu2 %vm919_vm12, %v3128_v55 }
 0x360   :  { %vm2662_vm1 = vcmp.gt.f32.partialorder %v6539_v35, 20.0  ;;  %v2964_v61 = vsel %vm2963_vm6, %v2961_v30, %v2958_v44 }
 0x361   :  { %v2694_v28 = vsel %vm2662_vm1, 0.0, %v6539_v35  ;;  %v3076_v6 = vmul.f32 0.01, %v2964_v61 }
 0x362   :  { %v4076_v51 = vpop.eup %4075  ;;  %v2749_v19 = vmul.f32 1.442695, %v2694_v28 }
 0x363   :  { %v2965_v11 = vadd.f32 1.0, %v4076_v51  ;;  %v2587_v63 = vpop.f32.mrf.mxu3  ;;  %v3108_v0 = vsel %vm2660_vm14, %v6493_v5, %v3076_v6  ;;  %v2968_v56 = vmul.f32 -0.5, %v4076_v51  ;;  %v2971_v32 = vand.u32 2147483647, %v4076_v51 }
 0x364   :  { %4077 = vpow2.f32 %v2749_v19  ;;  %v6547_v46 = vadd.f32 %v6345_v47, %v2587_v63  ;;  %v3129_v9 = vpack.c.bf16 %v3108_v0, %v3107_v14 }
 0x365   :  { %v3238_v50 = vpop.f32.mrf.mxu2  ;;  %4079 = vlog2.f32 %v2965_v11  ;;  %v2969_v24 = vadd.f32 1.0, %v2968_v56  ;;  %vm2972_vm4 = vcmp.lt.f32.partialorder %v2971_v32, 0.0004427343 }
 0x366   :  { %v6550_v15 = vmul.f32 100.0, %v6547_v46  ;;  %v3239_v49 = vadd.f32 %v6463_v12, %v3238_v50 }
 0x367   :  { %v2970_v42 = vmul.f32 %v4076_v51, %v2969_v24 }
 0x368   :  { %vm2663_vm5 = vcmp.gt.f32.partialorder %v6550_v15, 20.0  ;;  %3313 = vst.msk [vmem:[%s6809_s11 + $0x20] sm:$0xff] %vm3308_vm13, %v3239_v49 }
 0x369   :  { %v2695_v18 = vsel %vm2663_vm5, 0.0, %v6550_v15 }
 0x36a   :  { %v4078_v7 = vpop.eup %4077  ;;  %v2751_v22 = vmul.f32 1.442695, %v2695_v18 }
 0x36b   :  { %v2974_v5 = vadd.f32 1.0, %v4078_v7  ;;  %v2589_v36 = vpop.f32.mrf.mxu3  ;;  %v4080_v21 = vpop.eup %4079  ;;  %v2977_v17 = vmul.f32 -0.5, %v4078_v7  ;;  %v2980_v34 = vand.u32 2147483647, %v4078_v7 }
 0x36c   :  { %4081 = vpow2.f32 %v2751_v22  ;;  %v6568_v58 = vadd.f32 %v6345_v47, %v2589_v36  ;;  %v2967_v39 = vmul.f32 0.6931472, %v4080_v21 }
 0x36d   :  { %4083 = vlog2.f32 %v2974_v5  ;;  %v3240_v29 = vpop.f32.mrf.mxu2  ;;  %v2978_v52 = vadd.f32 1.0, %v2977_v17  ;;  %vm2981_vm2 = vcmp.lt.f32.partialorder %v2980_v34, 0.0004427343 }
 0x36e   :  { %v6571_v62 = vmul.f32 100.0, %v6568_v58  ;;  %v3241_v43 = vadd.f32 %v6463_v12, %v3240_v29  ;;  %3547 = vmatmul.msk.bf16.gmra.mxu2 %vm919_vm12, %v3129_v9  ;;  %v2973_v38 = vsel %vm2972_vm4, %v2970_v42, %v2967_v39 }
 0x36f   :  { %v2979_v60 = vmul.f32 %v4078_v7, %v2978_v52  ;;  %v3077_v13 = vmul.f32 0.01, %v2973_v38 }
 0x370   :  { %vm2664_vm15 = vcmp.gt.f32.partialorder %v6571_v62, 20.0  ;;  %3314 = vst.msk [vmem:[%s6809_s11 + $0x28] sm:$0xff] %vm3308_vm13, %v3241_v43 }
 0x371   :  { %v2696_v31 = vsel %vm2664_vm15, 0.0, %v6571_v62  ;;  %v3109_v33 = vsel %vm2661_vm7, %v6515_v20, %v3077_v13 }
 0x372   :  { %v4082_v10 = vpop.eup %4081  ;;  %v2753_v25 = vmul.f32 1.442695, %v2696_v31 }
 0x373   :  { %v4084_v16 = vpop.eup %4083  ;;  %v2983_v1 = vadd.f32 1.0, %v4082_v10  ;;  %v2986_v26 = vmul.f32 -0.5, %v4082_v10  ;;  %v2989_v35 = vand.u32 2147483647, %v4082_v10 }
 0x374   :  { %v2976_v53 = vmul.f32 0.6931472, %v4084_v16  ;;  %4085 = vpow2.f32 %v2753_v25  ;;  %v2592_v57 = vpop.f32.mrf.mxu3 }
 0x375   :  { %4087 = vlog2.f32 %v2983_v1  ;;  %v6584_v3 = vadd.f32 %v6345_v47, %v2592_v57  ;;  %v2987_v61 = vadd.f32 1.0, %v2986_v26  ;;  %vm2990_vm10 = vcmp.lt.f32.partialorder %v2989_v35, 0.0004427343 }
 0x376   :  { %v2982_v40 = vsel %vm2981_vm2, %v2979_v60, %v2976_v53 }
 0x377   :  { %v3078_v55 = vmul.f32 0.01, %v2982_v40  ;;  %v6587_v23 = vmul.f32 100.0, %v6584_v3  ;;  %v2988_v19 = vmul.f32 %v4082_v10, %v2987_v61 }
 0x379   :  { %v3110_v41 = vsel %vm2662_vm1, %v6536_v4, %v3078_v55  ;;  %vm2665_vm8 = vcmp.gt.f32.partialorder %v6587_v23, 20.0 }
 0x37a   :  { %v4086_v8 = vpop.eup %4085  ;;  %v3130_v54 = vpack.c.bf16 %v3110_v41, %v3109_v33  ;;  %v2697_v37 = vsel %vm2665_vm8, 0.0, %v6587_v23 }
 0x37b   :  { %v2992_v27 = vadd.f32 1.0, %v4086_v8  ;;  %v4088_v44 = vpop.eup %4087  ;;  %v2995_v30 = vmul.f32 -0.5, %v4086_v8  ;;  %v2755_v2 = vmul.f32 1.442695, %v2697_v37  ;;  %v2998_v59 = vand.u32 2147483647, %v4086_v8 }
 0x37c   :  { %v2594_v4 = vpop.f32.mrf.mxu3  ;;  %v2985_v20 = vmul.f32 0.6931472, %v4088_v44 }
 0x37d   :  { %4089 = vlog2.f32 %v2992_v27  ;;  %v6600_v28 = vadd.f32 %v6345_v47, %v2594_v4  ;;  %v2996_v45 = vadd.f32 1.0, %v2995_v30  ;;  %vm2999_vm14 = vcmp.lt.f32.partialorder %v2998_v59, 0.0004427343 }
 0x37e   :  { %4091 = vpow2.f32 %v2755_v2  ;;  %3548 = vmatmul.msk.bf16.gmra.mxu2 %vm919_vm12, %v3130_v54  ;;  %v3243_v11 = vpop.f32.mrf.mxu2  ;;  %v2991_v50 = vsel %vm2990_vm10, %v2988_v19, %v2985_v20 }
 0x37f   :  { %v6604_v51 = vmul.f32 100.0, %v6600_v28  ;;  %v3244_v63 = vadd.f32 %v6463_v12, %v3243_v11  ;;  %v2997_v56 = vmul.f32 %v4086_v8, %v2996_v45  ;;  %v3079_v22 = vmul.f32 0.01, %v2991_v50 }
 0x381   :  { %vm2666_vm0 = vcmp.gt.f32.partialorder %v6604_v51, 20.0  ;;  %3315 = vst.msk [vmem:[%s6809_s11 + $0x30] sm:$0xff] %vm3308_vm13, %v3244_v63  ;;  %v3111_v29 = vsel %vm2663_vm5, %v6547_v46, %v3079_v22 }
 0x382   :  { %v2698_v48 = vsel %vm2666_vm0, 0.0, %v6604_v51 }
 0x383   :  { %v4090_v6 = vpop.eup %4089  ;;  %v2757_v18 = vmul.f32 1.442695, %v2698_v48 }
 0x384   :  { %v4092_v49 = vpop.eup %4091  ;;  %v2994_v0 = vmul.f32 0.6931472, %v4090_v6  ;;  %v2597_v14 = vpop.f32.mrf.mxu3 }
 0x385   :  { %v3001_v7 = vadd.f32 1.0, %v4092_v49  ;;  %4093 = vpow2.f32 %v2757_v18  ;;  %v6616_v5 = vadd.f32 %v6345_v47, %v2597_v14  ;;  %v3004_v32 = vmul.f32 -0.5, %v4092_v49 }
 0x386   :  { %v3000_v9 = vsel %vm2999_vm14, %v2997_v56, %v2994_v0  ;;  %v3245_v24 = vpop.f32.mrf.mxu2  ;;  %v3007_v25 = vand.u32 2147483647, %v4092_v49 }
 0x387   :  { %v3080_v36 = vmul.f32 0.01, %v3000_v9  ;;  %4095 = vlog2.f32 %v3001_v7  ;;  %v6619_v21 = vmul.f32 100.0, %v6616_v5  ;;  %v3246_v43 = vadd.f32 %v6463_v12, %v3245_v24 }
 0x388   :  { %v3005_v34 = vadd.f32 1.0, %v3004_v32  ;;  %vm3008_vm7 = vcmp.lt.f32.partialorder %v3007_v25, 0.0004427343 }
 0x389   :  { %v3112_v17 = vsel %vm2664_vm15, %v6568_v58, %v3080_v36  ;;  %vm2667_vm9 = vcmp.gt.f32.partialorder %v6619_v21, 20.0  ;;  %3316 = vst.msk [vmem:[%s6809_s11 + $0x38] sm:$0xff] %vm3308_vm13, %v3246_v43 }
 0x38a   :  { %v3131_v39 = vpack.c.bf16 %v3112_v17, %v3111_v29  ;;  %v2699_v52 = vsel %vm2667_vm9, 0.0, %v6619_v21  ;;  %v3006_v1 = vmul.f32 %v4092_v49, %v3005_v34 }
 0x38b   :  { %v4094_v42 = vpop.eup %4093  ;;  %v2759_v58 = vmul.f32 1.442695, %v2699_v52 }
 0x38c   :  { %v3010_v15 = vadd.f32 1.0, %v4094_v42  ;;  %v2599_v46 = vpop.f32.mrf.mxu3  ;;  %v3013_v31 = vmul.f32 -0.5, %v4094_v42  ;;  %v3016_v57 = vand.u32 2147483647, %v4094_v42 }
 0x38d   :  { %v4096_v62 = vpop.eup %4095  ;;  %4097 = vpow2.f32 %v2759_v58  ;;  %v6637_v10 = vadd.f32 %v6345_v47, %v2599_v46 }
 0x38e   :  { %4099 = vlog2.f32 %v3010_v15  ;;  %3549 = vmatmul.msk.bf16.gmra.mxu2 %vm919_vm12, %v3131_v39  ;;  %v3003_v16 = vmul.f32 0.6931472, %v4096_v62  ;;  %v3014_v53 = vadd.f32 1.0, %v3013_v31  ;;  %vm3017_vm6 = vcmp.lt.f32.partialorder %v3016_v57, 0.0004427343 }
 0x38f   :  { %v6641_v38 = vmul.f32 100.0, %v6637_v10 }
 0x390   :  { %v3009_v41 = vsel %vm3008_vm7, %v3006_v1, %v3003_v16  ;;  %v3015_v37 = vmul.f32 %v4094_v42, %v3014_v53 }
 0x391   :  { %v3248_v60 = vpop.f32.mrf.mxu2  ;;  %vm2668_vm11 = vcmp.gt.f32.partialorder %v6641_v38, 20.0  ;;  %v3081_v30 = vmul.f32 0.01, %v3009_v41 }
 0x392   :  { %v3249_v13 = vadd.f32 %v6463_v12, %v3248_v60  ;;  %v2700_v40 = vsel %vm2668_vm11, 0.0, %v6641_v38 }
 0x393   :  { %v4098_v55 = vpop.eup %4097  ;;  %v2761_v26 = vmul.f32 1.442695, %v2700_v40  ;;  %v3113_v45 = vsel %vm2665_vm8, %v6584_v3, %v3081_v30 }
 0x394   :  { %v4100_v8 = vpop.eup %4099  ;;  %v3019_v33 = vadd.f32 1.0, %v4098_v55  ;;  %3317 = vst.msk [vmem:[%s6809_s11 + $0x40] sm:$0xff] %vm3308_vm13, %v3249_v13  ;;  %v2602_v54 = vpop.f32.mrf.mxu3  ;;  %v3022_v35 = vmul.f32 -0.5, %v4098_v55  ;;  %v3025_v0 = vand.u32 2147483647, %v4098_v55 }
 0x395   :  { %v3012_v27 = vmul.f32 0.6931472, %v4100_v8  ;;  %4101 = vpow2.f32 %v2761_v26  ;;  %v6653_v44 = vadd.f32 %v6345_v47, %v2602_v54 }
 0x396   :  { %4103 = vlog2.f32 %v3019_v33  ;;  %v3023_v23 = vadd.f32 1.0, %v3022_v35  ;;  %vm3026_vm5 = vcmp.lt.f32.partialorder %v3025_v0, 0.0004427343 }
 0x397   :  { %v3018_v2 = vsel %vm3017_vm6, %v3015_v37, %v3012_v27  ;;  %v6656_v61 = vmul.f32 100.0, %v6653_v44 }
 0x398   :  { %v3082_v4 = vmul.f32 0.01, %v3018_v2  ;;  %v3024_v7 = vmul.f32 %v4098_v55, %v3023_v23 }
 0x399   :  { %v3250_v20 = vpop.f32.mrf.mxu2  ;;  %vm2669_vm1 = vcmp.gt.f32.partialorder %v6656_v61, 20.0 }
 0x39a   :  { %v3114_v19 = vsel %vm2666_vm0, %v6600_v28, %v3082_v4  ;;  %v3251_v59 = vadd.f32 %v6463_v12, %v3250_v20  ;;  %v2701_v11 = vsel %vm2669_vm1, 0.0, %v6656_v61 }
 0x39b   :  { %v4102_v63 = vpop.eup %4101  ;;  %v3132_v6 = vpack.c.bf16 %v3114_v19, %v3113_v45  ;;  %v2763_v50 = vmul.f32 1.442695, %v2701_v11 }
 0x39c   :  { %v4104_v48 = vpop.eup %4103  ;;  %v3028_v49 = vadd.f32 1.0, %v4102_v63  ;;  %3318 = vst.msk [vmem:[%s6809_s11 + $0x48] sm:$0xff] %vm3308_vm13, %v3251_v59  ;;  %v2604_v3 = vpop.f32.mrf.mxu3  ;;  %v3031_v51 = vmul.f32 -0.5, %v4102_v63  ;;  %v3034_v9 = vand.u32 2147483647, %v4102_v63 }
 0x39d   :  { %4105 = vpow2.f32 %v2763_v50  ;;  %v2605_v28 = vadd.f32 %v6345_v47, %v2604_v3  ;;  %v3021_v56 = vmul.f32 0.6931472, %v4104_v48 }
 0x39e   :  { %4107 = vlog2.f32 %v3028_v49  ;;  %3550 = vmatmul.msk.bf16.gmra.mxu2 %vm919_vm12, %v3132_v6  ;;  %v3032_v14 = vadd.f32 1.0, %v3031_v51  ;;  %vm3035_vm15 = vcmp.lt.f32.partialorder %v3034_v9, 0.0004427343 }
 0x39f   :  { %v2638_v18 = vmul.f32 100.0, %v2605_v28  ;;  %v3027_v29 = vsel %vm3026_vm5, %v3024_v7, %v3021_v56 }
 0x3a0   :  { %v3033_v52 = vmul.f32 %v4102_v63, %v3032_v14  ;;  %v3083_v42 = vmul.f32 0.01, %v3027_v29 }
 0x3a1   :  { %v3253_v22 = vpop.f32.mrf.mxu2  ;;  %vm2670_vm3 = vcmp.gt.f32.partialorder %v2638_v18, 20.0 }
 0x3a2   :  { %v3254_v36 = vadd.f32 %v6463_v12, %v3253_v22  ;;  %v2702_v17 = vsel %vm2670_vm3, 0.0, %v2638_v18  ;;  %v3115_v34 = vsel %vm2667_vm9, %v6616_v5, %v3083_v42 }
 0x3a3   :  { %v4106_v24 = vpop.eup %4105  ;;  %v2765_v32 = vmul.f32 1.442695, %v2702_v17 }
 0x3a4   :  { %v4108_v47 = vpop.eup %4107  ;;  %v3037_v43 = vadd.f32 1.0, %v4106_v24  ;;  %3319 = vst.msk [vmem:[%s6809_s11 + $0x50] sm:$0xff] %vm3308_vm13, %v3254_v36  ;;  %v3040_v15 = vmul.f32 -0.5, %v4106_v24  ;;  %v3043_v40 = vand.u32 2147483647, %v4106_v24 }
 0x3a5   :  { %v3030_v39 = vmul.f32 0.6931472, %v4108_v47  ;;  %4109 = vpow2.f32 %v2765_v32 }
 0x3a6   :  { %4111 = vlog2.f32 %v3037_v43  ;;  %v3041_v57 = vadd.f32 1.0, %v3040_v15  ;;  %vm3044_vm4 = vcmp.lt.f32.partialorder %v3043_v40, 0.0004427343 }
 0x3a7   :  { %v3036_v58 = vsel %vm3035_vm15, %v3033_v52, %v3030_v39 }
 0x3a8   :  { %v3084_v62 = vmul.f32 0.01, %v3036_v58  ;;  %v3042_v21 = vmul.f32 %v4106_v24, %v3041_v57 }
 0x3a9   :  { %v3255_v46 = vpop.f32.mrf.mxu2 }
 0x3aa   :  { %v3116_v31 = vsel %vm2668_vm11, %v6637_v10, %v3084_v62  ;;  %v3256_v25 = vadd.f32 %v6463_v12, %v3255_v46 }
 0x3ab   :  { %v4110_v16 = vpop.eup %4109  ;;  %v3133_v1 = vpack.c.bf16 %v3116_v31, %v3115_v34 }
 0x3ac   :  { %v4112_v53 = vpop.eup %4111  ;;  %v3046_v60 = vadd.f32 1.0, %v4110_v16  ;;  %3320 = vst.msk [vmem:[%s6809_s11 + $0x58] sm:$0xff] %vm3308_vm13, %v3256_v25  ;;  %v3049_v13 = vmul.f32 -0.5, %v4110_v16  ;;  %v3052_v55 = vand.u32 2147483647, %v4110_v16 }
 0x3ad   :  { %v3039_v5 = vmul.f32 0.6931472, %v4112_v53 }
 0x3ae   :  { %4113 = vlog2.f32 %v3046_v60  ;;  %3551 = vmatmul.msk.bf16.gmra.mxu2 %vm919_vm12, %v3133_v1  ;;  %v3050_v10 = vadd.f32 1.0, %v3049_v13  ;;  %vm3053_vm2 = vcmp.lt.f32.partialorder %v3052_v55, 0.0004427343 }
 0x3af   :  { %v3045_v26 = vsel %vm3044_vm4, %v3042_v21, %v3039_v5 }
 0x3b0   :  { %v3051_v54 = vmul.f32 %v4110_v16, %v3050_v10  ;;  %v3085_v27 = vmul.f32 0.01, %v3045_v26 }
 0x3b1   :  { %v3258_v38 = vpop.f32.mrf.mxu2 }
 0x3b2   :  { %v3259_v41 = vadd.f32 %v6463_v12, %v3258_v38  ;;  %v3117_v4 = vsel %vm2669_vm1, %v6653_v44, %v3085_v27 }
 0x3b4   :  { %v4114_v8 = vpop.eup %4113  ;;  %3321 = vst.msk [vmem:[%s6809_s11 + $0x60] sm:$0xff] %vm3308_vm13, %v3259_v41 }
 0x3b5   :  { %v3048_v33 = vmul.f32 0.6931472, %v4114_v8 }
 0x3b7   :  { %v3054_v37 = vsel %vm3053_vm2, %v3051_v54, %v3048_v33 }
 0x3b8   :  { %v3086_v30 = vmul.f32 0.01, %v3054_v37 }
 0x3b9   :  { %v3260_v2 = vpop.f32.mrf.mxu2 }
 0x3ba   :  { %v3118_v35 = vsel %vm2670_vm3, %v2605_v28, %v3086_v30  ;;  %v3261_v20 = vadd.f32 %v6463_v12, %v3260_v2 }
 0x3bb   :  { %v3134_v45 = vpack.c.bf16 %v3118_v35, %v3117_v4 }
 0x3bc   :  { %3322 = vst.msk [vmem:[%s6809_s11 + $0x68] sm:$0xff] %vm3308_vm13, %v3261_v20 }
 0x3be   :  { %3552 = vmatmul.msk.bf16.gmra.mxu2 %vm919_vm12, %v3134_v45 }
 0x3c1   :  { %v3263_v19 = vpop.f32.mrf.mxu2 }
 0x3c2   :  { %v3264_v59 = vadd.f32 %v6463_v12, %v3263_v19 }
 0x3c4   :  { %3323 = vst.msk [vmem:[%s6809_s11 + $0x70] sm:$0xff] %vm3308_vm13, %v3264_v59 }
 0x3c9   :  { %v3265_v44 = vpop.f32.mrf.mxu2 }
 0x3ca   :  { %v3266_v61 = vadd.f32 %v6463_v12, %v3265_v44 }
 0x3cc   :  { %3324 = vst.msk [vmem:[%s6809_s11 + $0x78] sm:$0xff] %vm3308_vm13, %v3266_v61 }
 0x3d1   :  { %v3268_v11 = vpop.f32.mrf.mxu2 }
 0x3d2   :  { %v3269_v63 = vadd.f32 %v6463_v12, %v3268_v11 }
 0x3d4   :  { %3325 = vst.msk [vmem:[%s6809_s11 + $0x80] sm:$0xff] %vm3308_vm13, %v3269_v63 }
 0x3d9   :  { %v3270_v6 = vpop.f32.mrf.mxu2 }
 0x3da   :  { %v3271_v50 = vadd.f32 %v6463_v12, %v3270_v6 }
 0x3dc   :  { %3326 = vst.msk [vmem:[%s6809_s11 + $0x88] sm:$0xff] %vm3308_vm13, %v3271_v50 }
 0x3e1   :  { %v3273_v48 = vpop.f32.mrf.mxu2 }
 0x3e2   :  { %v3274_v49 = vadd.f32 %v6463_v12, %v3273_v48 }
 0x3e4   :  { %3327 = vst.msk [vmem:[%s6809_s11 + $0x90] sm:$0xff] %vm3308_vm13, %v3274_v49 }
 0x3e9   :  { %v3275_v3 = vpop.f32.mrf.mxu2 }
 0x3ea   :  { %v3276_v23 = vadd.f32 %v6463_v12, %v3275_v3 }
 0x3ec   :  { %3328 = vst.msk [vmem:[%s6809_s11 + $0x98] sm:$0xff] %vm3308_vm13, %v3276_v23 }
 0x3f1   :  { %v3278_v51 = vpop.f32.mrf.mxu2 }
 0x3f2   :  { %v3279_v28 = vadd.f32 %v6463_v12, %v3278_v51 }
 0x3f4   :  { %3329 = vst.msk [vmem:[%s6809_s11 + $0xa0] sm:$0xff] %vm3308_vm13, %v3279_v28 }
 0x3f9   :  { %v3280_v0 = vpop.f32.mrf.mxu2 }
 0x3fa   :  { %v3281_v56 = vadd.f32 %v6463_v12, %v3280_v0 }
 0x3fc   :  { %3330 = vst.msk [vmem:[%s6809_s11 + $0xa8] sm:$0xff] %vm3308_vm13, %v3281_v56 }
 0x401   :  { %v3283_v18 = vpop.f32.mrf.mxu2 }
 0x402   :  { %v3284_v7 = vadd.f32 %v6463_v12, %v3283_v18 }
 0x404   :  { %3331 = vst.msk [vmem:[%s6809_s11 + $0xb0] sm:$0xff] %vm3308_vm13, %v3284_v7 }
 0x409   :  { %v3285_v14 = vpop.f32.mrf.mxu2 }
 0x40a   :  { %v3286_v22 = vadd.f32 %v6463_v12, %v3285_v14 }
 0x40c   :  { %3332 = vst.msk [vmem:[%s6809_s11 + $0xb8] sm:$0xff] %vm3308_vm13, %v3286_v22 }
 0x411   :  { %v3288_v9 = vpop.f32.mrf.mxu2 }
 0x412   :  { %v3289_v36 = vadd.f32 %v6463_v12, %v3288_v9 }
 0x414   :  { %3333 = vst.msk [vmem:[%s6809_s11 + $0xc0] sm:$0xff] %vm3308_vm13, %v3289_v36 }
 0x419   :  { %v3290_v17 = vpop.f32.mrf.mxu2 }
 0x41a   :  { %v3291_v24 = vadd.f32 %v6463_v12, %v3290_v17 }
 0x41c   :  { %3334 = vst.msk [vmem:[%s6809_s11 + $0xc8] sm:$0xff] %vm3308_vm13, %v3291_v24 }
 0x421   :  { %v3293_v29 = vpop.f32.mrf.mxu2 }
 0x422   :  { %v3294_v32 = vadd.f32 %v6463_v12, %v3293_v29 }
 0x424   :  { %3335 = vst.msk [vmem:[%s6809_s11 + $0xd0] sm:$0xff] %vm3308_vm13, %v3294_v32 }
 0x429   :  { %v3295_v47 = vpop.f32.mrf.mxu2 }
 0x42a   :  { %v3296_v43 = vadd.f32 %v6463_v12, %v3295_v47 }
 0x42c   :  { %3336 = vst.msk [vmem:[%s6809_s11 + $0xd8] sm:$0xff] %vm3308_vm13, %v3296_v43 }
 0x431   :  { %v3298_v39 = vpop.f32.mrf.mxu2 }
 0x432   :  { %v3299_v52 = vadd.f32 %v6463_v12, %v3298_v39 }
 0x434   :  { %3337 = vst.msk [vmem:[%s6809_s11 + $0xe0] sm:$0xff] %vm3308_vm13, %v3299_v52 }
 0x439   :  { %v3300_v42 = vpop.f32.mrf.mxu2 }
 0x43a   :  { %v3301_v58 = vadd.f32 %v6463_v12, %v3300_v42 }
 0x43c   :  { %3338 = vst.msk [vmem:[%s6809_s11 + $0xe8] sm:$0xff] %vm3308_vm13, %v3301_v58 }
 0x441   :  { %v3303_v62 = vpop.f32.mrf.mxu2 }
 0x442   :  { %v3304_v15 = vadd.f32 %v6463_v12, %v3303_v62 }
 0x444   :  { %3339 = vst.msk [vmem:[%s6809_s11 + $0xf0] sm:$0xff] %vm3308_vm13, %v3304_v15 }
 0x449   :  { %v3305_v46 = vpop.f32.mrf.mxu2 }
 0x44a   :  { %v3306_v34 = vadd.f32 %v6463_v12, %v3305_v46 }
 0x44c   :  { %3340 = vst.msk [vmem:[%s6809_s11 + $0xf8] sm:$0xff] %vm3308_vm13, %v3306_v34 }

</bundles_post_ra>
